<compile_context>
chip_gen: v5e
topology: v5e:2x2
jax: 0.10.0
libtpu: 0.0.40
codegen_flags: <defaults>
</compile_context>

<pallas_src>
import jax
import jax.numpy as jnp
from jax.experimental import pallas as pl
from jax.experimental.pallas import tpu as pltpu


DEFAULT_TM = 512   # adj row tile    (output rows per grid step)
DEFAULT_TK = 512   # adj column tile (reduction chunk per grid step); sweepable to 1024


def _round_up(x, m):
    return (x + m - 1) // m * m


def _choose_tiles(n_nodes, tm=DEFAULT_TM, tk=DEFAULT_TK):
    """Clamp tiles to the (bf16-sublane-aligned) problem size; keep >=2 row
    tiles so the 'parallel' row axis can shard across v7x's 2 TensorCores."""
    n_pad = _round_up(max(n_nodes, 16), 16)
    tm = min(tm, n_pad)
    tk = min(tk, n_pad)
    if n_pad // tm < 2 and n_pad >= 32:
        tm = _round_up(n_pad // 2, 16)
    return tm, tk


def gcn_prepare_adj(adj, *, tm=DEFAULT_TM, tk=DEFAULT_TK):
    """One-time (graph-load) bf16 cast + zero-pad of the adjacency to tile
    multiples.  Do NOT call per forward: that would add a full extra HBM pass
    over the largest array, comparable to the kernel's own adj traffic."""
    n_nodes = adj.shape[0]
    tm, tk = _choose_tiles(n_nodes, tm, tk)
    n_m = _round_up(n_nodes, tm)
    n_k = _round_up(n_nodes, tk)
    adj_bf16 = adj.astype(jnp.bfloat16)
    if (n_m, n_k) != adj.shape:
        adj_bf16 = jnp.zeros((n_m, n_k), jnp.bfloat16).at[
            : adj.shape[0], : adj.shape[1]].set(adj_bf16)
    return adj_bf16, tm, tk


# --------------------------------------------------------------------------
# Fused kernel: out = PReLU(adj @ (seq @ W) + bias)
#   grid = (rows of N / tm  [parallel],  reduction over N / tk  [arbitrary])
# --------------------------------------------------------------------------
def gcn_kernel(adj_ref, seq_ref, w_ref, b_ref, alpha_ref, out_ref):
    k = pl.program_id(1)

    @pl.when(k == 0)
    def _():
        out_ref[...] = jnp.zeros_like(out_ref)

    # Fused linear projection: (tk, in_ft_p) @ (in_ft_p, out_ft_p) on the MXU.
    # Tiny vs. the adj matmul; saves the seq_fts HBM round-trip entirely.
    fts = jnp.dot(seq_ref[...], w_ref[...],
                  preferred_element_type=jnp.float32).astype(jnp.bfloat16)

    # Aggregation: adj tile [tm, tk] (bf16) @ fts [tk, F] (bf16), f32 accumulate
    # directly into the resident output block (block index constant over k).
    out_ref[...] += jnp.dot(adj_ref[...], fts,
                            preferred_element_type=jnp.float32)

    @pl.when(k == pl.num_programs(1) - 1)
    def _():
        o = out_ref[...] + b_ref[...]            # broadcast (1, F) bias
        alpha = alpha_ref[0]                     # shared PReLU slope (SMEM)
        out_ref[...] = jnp.where(o > 0, o, alpha * o)


# --------------------------------------------------------------------------
# Wrapper
# --------------------------------------------------------------------------
def gcn_forward(seq, adj_p, weight_t, bias, alpha, *, n_nodes=None,
                tm=DEFAULT_TM, tk=DEFAULT_TK):
    """seq: [N, in_ft] (f32), adj_p: [N_m, N_k] bf16 from gcn_prepare_adj,
    weight_t: [in_ft, out_ft], bias: [out_ft] (or [1, out_ft]), alpha: [1]."""
    N, in_ft = seq.shape
    if n_nodes is None:
        n_nodes = N
    out_ft = weight_t.shape[1]
    N_m, N_k = adj_p.shape
    assert N_m % tm == 0 and N_k % tk == 0, "adj_p must be padded to tile multiples"

    in_ft_p = _round_up(in_ft, 128)    # lane-dense K for the fused projection
    out_ft_p = _round_up(out_ft, 128)  # lane-dense output features (unmasked vst)

    # Small per-call pads (node features + params); negligible vs. adj traffic.
    seq_p = jnp.zeros((N_k, in_ft_p), jnp.bfloat16).at[:N, :in_ft].set(
        seq.astype(jnp.bfloat16))
    w_p = jnp.zeros((in_ft_p, out_ft_p), jnp.bfloat16).at[:in_ft, :out_ft].set(
        weight_t.astype(jnp.bfloat16))
    b_p = jnp.zeros((1, out_ft_p), jnp.float32).at[0, :out_ft].set(
        bias.reshape(-1).astype(jnp.float32))
    alpha = alpha.reshape((1,)).astype(jnp.float32)   # 1-D scalar in SMEM

    n_row_tiles = N_m // tm
    flops = (2 * N_m * N_k * out_ft_p                       # aggregation
             + 2 * n_row_tiles * N_k * in_ft_p * out_ft_p)  # fused projection
    bytes_accessed = (N_m * N_k * 2                      # adj stream (bf16), dominant
                      + n_row_tiles * N_k * in_ft_p * 2  # seq re-read per row tile
                      + in_ft_p * out_ft_p * 2           # W (resident)
                      + N_m * out_ft_p * 4               # output
                      + out_ft_p * 4)                    # bias

    out_p = pl.pallas_call(
        gcn_kernel,
        out_shape=jax.ShapeDtypeStruct((N_m, out_ft_p), jnp.float32),
        grid_spec=pltpu.PrefetchScalarGridSpec(
            num_scalar_prefetch=0,
            grid=(N_m // tm, N_k // tk),
            in_specs=[
                pl.BlockSpec((tm, tk), lambda i, k: (i, k)),             # adj
                pl.BlockSpec((tk, in_ft_p), lambda i, k: (k, 0)),        # seq
                pl.BlockSpec((in_ft_p, out_ft_p), lambda i, k: (0, 0)),  # W
                pl.BlockSpec((1, out_ft_p), lambda i, k: (0, 0)),        # bias
                pl.BlockSpec(memory_space=pltpu.MemorySpace.SMEM),       # alpha
            ],
            out_specs=pl.BlockSpec((tm, out_ft_p), lambda i, k: (i, 0)),
        ),
        compiler_params=pltpu.CompilerParams(
            dimension_semantics=("parallel", "arbitrary")),
        cost_estimate=pl.CostEstimate(
            flops=flops, transcendentals=0, bytes_accessed=bytes_accessed),
    )(adj_p, seq_p, w_p, b_p, alpha)

    # Strip node-row and feature-lane padding.
    return out_p[:n_nodes, :out_ft]


if __name__ == "__main__":
    # Small shapes consistent with the module; N=1024 exercises a real
    # (2 x 2) grid (parallel row tiles + a 2-step k reduction) at tm=tk=512.
    N, in_ft, out_ft = 1024, 32, 64

    key = jax.random.PRNGKey(0)
    k_seq, k_adj, k_w = jax.random.split(key, 3)

    # Inputs
    seq = jax.random.normal(k_seq, (N, in_ft), dtype=jnp.float32)
    # Row-normalized dense "adjacency" (stand-in for the sparse adj in spmm).
    adj_raw = (jax.random.uniform(k_adj, (N, N)) > 0.7).astype(jnp.float32)
    adj_raw = adj_raw + jnp.eye(N, dtype=jnp.float32)
    adj = adj_raw / jnp.sum(adj_raw, axis=1, keepdims=True)

    # Parameters (deterministic init matching the PyTorch module):
    # nn.Linear weight: xavier_normal_ with gain=1.414 on shape (out_ft, in_ft)
    gain = 1.414
    std = gain * (2.0 / (in_ft + out_ft)) ** 0.5
    w = std * jax.random.normal(k_w, (out_ft, in_ft), dtype=jnp.float32)
    weight_t = w.T                                   # [in_ft, out_ft]
    bias = jnp.zeros((out_ft,), dtype=jnp.float32)   # filled with 0.0
    alpha = jnp.array([0.25], dtype=jnp.float32)     # PReLU default

    # One-time (graph-load) bf16 cast + pad of adj, reused across forwards.
    adj_p, tm, tk = gcn_prepare_adj(adj)

    out = gcn_forward(seq, adj_p, weight_t, bias, alpha, n_nodes=N, tm=tm, tk=tk)
    jax.block_until_ready(out)

    # Reference check in plain f32 JAX (kernel uses bf16 MXU inputs with f32
    # accumulation, so tolerance is loosened accordingly).
    ref = adj @ (seq @ weight_t) + bias[None, :]
    ref = jnp.where(ref > 0, ref, 0.25 * ref)
    assert out.shape == (N, out_ft)
    max_err = float(jnp.max(jnp.abs(out - ref)))
    assert jnp.allclose(out, ref, atol=2e-2, rtol=2e-2), f"max abs err {max_err}"

    print("KERNEL_OK")
</pallas_src>

<mosaic_0001>
module attributes {stable_mosaic.version = 11 : i64} {
  func.func @gcn_kernel(%arg0: i32, %arg1: i32, %arg2: memref<512x512xbf16, #tpu.memory_space<vmem>>, %arg3: memref<512x128xbf16, #tpu.memory_space<vmem>>, %arg4: memref<128x128xbf16, #tpu.memory_space<vmem>>, %arg5: memref<1x128xf32, #tpu.memory_space<vmem>>, %arg6: memref<1xf32, #tpu.memory_space<smem>>, %arg7: memref<512x128xf32, #tpu.memory_space<vmem>>) attributes {dimension_semantics = [#tpu.dimension_semantics<parallel>, #tpu.dimension_semantics<arbitrary>], iteration_bounds = array<i64: 2, 2>, scalar_prefetch = 0 : i64, scratch_operands = 0 : i64, tpu.core_type = #tpu.core_type<tc>, window_params = [{transform_indices = @transform_0, window_bounds = array<i64: 512, 512>}, {transform_indices = @transform_1, window_bounds = array<i64: 512, 128>}, {pipeline_mode = #tpu.pipeline_mode<synchronous>, transform_indices = @transform_2, window_bounds = array<i64: 128, 128>}, {pipeline_mode = #tpu.pipeline_mode<synchronous>, transform_indices = @transform_3, window_bounds = array<i64: 1, 128>}, {transform_indices = @transform_4, window_bounds = array<i64: 1>}, {transform_indices = @transform_5, window_bounds = array<i64: 512, 128>}]} {
    %c0_i32 = arith.constant 0 : i32
    %0 = arith.cmpi eq, %arg1, %c0_i32 : i32
    %1 = arith.extui %0 : i1 to i32
    %c0_i32_0 = arith.constant 0 : i32
    %2 = arith.cmpi ne, %1, %c0_i32_0 : i32
    scf.if %2 {
      %cst_12 = arith.constant 0.000000e+00 : f32
      %15 = vector.broadcast %cst_12 : f32 to vector<512x128xf32>
      %c0_13 = arith.constant 0 : index
      %c0_14 = arith.constant 0 : index
      %16 = vector.load %arg7[%c0_13, %c0_14] : memref<512x128xf32, #tpu.memory_space<vmem>>, vector<512x128xf32>
      tpu.vector_store %arg7[%c0_13, %c0_14], %15 {strides = array<i32>} : memref<512x128xf32, #tpu.memory_space<vmem>>, vector<512x128xf32>,
    } else {
    }
    %c0 = arith.constant 0 : index
    %c0_1 = arith.constant 0 : index
    %3 = vector.load %arg3[%c0, %c0_1] : memref<512x128xbf16, #tpu.memory_space<vmem>>, vector<512x128xbf16>
    %c0_2 = arith.constant 0 : index
    %c0_3 = arith.constant 0 : index
    %4 = vector.load %arg4[%c0_2, %c0_3] : memref<128x128xbf16, #tpu.memory_space<vmem>>, vector<128x128xbf16>
    %cst = arith.constant dense<0.000000e+00> : vector<512x128xf32>
    %5 = tpu.matmul %3, %4, %cst {dimension_numbers = #tpu.dot_dimension_numbers<[1], [0], [0], [1], [0, 0, 1, 1], [], []>} : vector<512x128xbf16>, vector<128x128xbf16>, vector<512x128xf32> -> vector<512x128xf32>
    %6 = arith.truncf %5 : vector<512x128xf32> to vector<512x128xbf16>
    %c0_4 = arith.constant 0 : index
    %c0_5 = arith.constant 0 : index
    %7 = vector.load %arg7[%c0_4, %c0_5] : memref<512x128xf32, #tpu.memory_space<vmem>>, vector<512x128xf32>
    %c0_6 = arith.constant 0 : index
    %c0_7 = arith.constant 0 : index
    %8 = vector.load %arg2[%c0_6, %c0_7] : memref<512x512xbf16, #tpu.memory_space<vmem>>, vector<512x512xbf16>
    %cst_8 = arith.constant dense<0.000000e+00> : vector<512x128xf32>
    %9 = tpu.matmul %8, %6, %cst_8 {dimension_numbers = #tpu.dot_dimension_numbers<[1], [0], [0], [1], [0, 0, 1, 1], [], []>} : vector<512x512xbf16>, vector<512x128xbf16>, vector<512x128xf32> -> vector<512x128xf32>
    %10 = arith.addf %7, %9 : vector<512x128xf32>
    %c0_9 = arith.constant 0 : index
    %c0_10 = arith.constant 0 : index
    %11 = vector.load %arg7[%c0_9, %c0_10] : memref<512x128xf32, #tpu.memory_space<vmem>>, vector<512x128xf32>
    tpu.vector_store %arg7[%c0_9, %c0_10], %10 {strides = array<i32>} : memref<512x128xf32, #tpu.memory_space<vmem>>, vector<512x128xf32>,
    %c1_i32 = arith.constant 1 : i32
    %12 = arith.cmpi eq, %arg1, %c1_i32 : i32
    %13 = arith.extui %12 : i1 to i32
    %c0_i32_11 = arith.constant 0 : i32
    %14 = arith.cmpi ne, %13, %c0_i32_11 : i32
    scf.if %14 {
      %c0_12 = arith.constant 0 : index
      %c0_13 = arith.constant 0 : index
      %15 = vector.load %arg7[%c0_12, %c0_13] : memref<512x128xf32, #tpu.memory_space<vmem>>, vector<512x128xf32>
      %c0_14 = arith.constant 0 : index
      %c0_15 = arith.constant 0 : index
      %16 = vector.load %arg5[%c0_14, %c0_15] : memref<1x128xf32, #tpu.memory_space<vmem>>, vector<1x128xf32>
      %17 = vector.broadcast %16 : vector<1x128xf32> to vector<512x128xf32>
      %18 = arith.addf %15, %17 : vector<512x128xf32>
      %c0_16 = arith.constant 0 : index
      %19 = memref.load %arg6[%c0_16] : memref<1xf32, #tpu.memory_space<smem>>
      %cst_17 = arith.constant 0.000000e+00 : f32
      %20 = vector.broadcast %cst_17 : f32 to vector<512x128xf32>
      %21 = arith.cmpf ogt, %18, %20 : vector<512x128xf32>
      %22 = vector.broadcast %19 : f32 to vector<512x128xf32>
      %23 = arith.mulf %22, %18 : vector<512x128xf32>
      %24 = arith.select %21, %18, %23 : vector<512x128xi1>, vector<512x128xf32>
      %c0_18 = arith.constant 0 : index
      %c0_19 = arith.constant 0 : index
      %25 = vector.load %arg7[%c0_18, %c0_19] : memref<512x128xf32, #tpu.memory_space<vmem>>, vector<512x128xf32>
      tpu.vector_store %arg7[%c0_18, %c0_19], %24 {strides = array<i32>} : memref<512x128xf32, #tpu.memory_space<vmem>>, vector<512x128xf32>,
    } else {
    }
    return
  }
  func.func @transform_0(%arg0: i32, %arg1: i32) -> (i32, i32) {
    %c0_i32 = arith.constant 0 : i32
    return %arg0, %arg1 : i32, i32
  }
  func.func @transform_1(%arg0: i32, %arg1: i32) -> (i32, i32) {
    %c0_i32 = arith.constant 0 : i32
    %c0_i32_0 = arith.constant 0 : i32
    return %arg1, %c0_i32 : i32, i32
  }
  func.func @transform_2(%arg0: i32, %arg1: i32) -> (i32, i32) {
    %c0_i32 = arith.constant 0 : i32
    %c0_i32_0 = arith.constant 0 : i32
    %c0_i32_1 = arith.constant 0 : i32
    return %c0_i32, %c0_i32_0 : i32, i32
  }
  func.func @transform_3(%arg0: i32, %arg1: i32) -> (i32, i32) {
    %c0_i32 = arith.constant 0 : i32
    %c0_i32_0 = arith.constant 0 : i32
    %c0_i32_1 = arith.constant 0 : i32
    return %c0_i32, %c0_i32_0 : i32, i32
  }
  func.func @transform_4(%arg0: i32, %arg1: i32) -> i32 {
    %c0_i32 = arith.constant 0 : i32
    %c0_i32_0 = arith.constant 0 : i32
    return %c0_i32 : i32
  }
  func.func @transform_5(%arg0: i32, %arg1: i32) -> (i32, i32) {
    %c0_i32 = arith.constant 0 : i32
    %c0_i32_0 = arith.constant 0 : i32
    return %arg0, %c0_i32 : i32, i32
  }
}

</mosaic_0001>

<bundles_post_ra>
// kernel: tpu_custom_call.1
= control target key start
LH: loop header
LB: loop body
LE: loop exit
PB: predicated region body
PF: predicated region fallthrough
CT: control target
= control target key end

     0   :  { %s5725_s0 = inlined_call_operand.hbm [shape: bf16[1024,1024], index: 0, kind: input, shape index: {}]   ;;  %s5726_s1 = inlined_call_operand.hbm [shape: bf16[1024,128], index: 1, kind: input, shape index: {}]   ;;  %s5727_s2 = inlined_call_operand.hbm [shape: bf16[128,128], index: 2, kind: input, shape index: {}]   ;;  %s5728_s3 = inlined_call_operand.hbm [shape: f32[1,128], index: 3, kind: input, shape index: {}]   ;;  %s5729_s4 = inlined_call_operand.<no memory space> [shape: f32[1], index: 4, kind: input, shape index: {}]   ;;  %s5730_s5 = inlined_call_operand.hbm [shape: f32[1024,128], index: 5, kind: output, shape index: {}]  }
   0x1   :  { %5742 = sst [smem:[#allocation38_spill]] %s5725_s0 }
   0x2   :  { %5743 = sst [smem:[#allocation39_spill]] %s5727_s2 }
   0x3   :  { %5744 = sst [smem:[#allocation40_spill]] %s5728_s3 }
   0x4   :  { %5745 = sst [smem:[#allocation41_spill]] %s5730_s5 }
   0x5   :  { %10 = sst [smem:[#allocation2]] %s5729_s4 }
   0x6   :  { %11 = vsyncpa [#allocation4], 0 }
   0x7   :  { %13 = vsyncpa [#allocation4 + $0x1], 0 }
   0x8   :  { %14 = vsyncpa [#allocation7], 0 }
   0x9   :  { %16 = vsyncpa [#allocation7 + $0x1], 0 }
   0xa   :  { %17 = vsyncpa [#allocation10], 0 }
   0xb   :  { %18 = vsyncpa [#allocation5], 0 }
   0xc   :  { %20 = vsyncpa [#allocation5 + $0x1], 0  ;;  %s4482_s20 = smov 0   ;;  %s4484_s21 = smov 0  }
   0xd   :  { %s4486_s22 = smov 0   ;;  %s4488_s23 = smov 0  }
   0xe   :  { %s4490_s24 = smov 0   ;;  %s4492_s25 = smov 0  }
   0xf   :  { %s4494_s4 = smov 0   ;;  %s4496_s26 = smov 0  }
  0x10   :  { %s4498_s27 = smov 0   ;;  %s4500_s28 = smov 0  }
  0x11   :  { %s4502_s29 = smov 0   ;;  %s4504_s30 = smov 0  }
  0x12   :  { %s4506_s6 = smov 0   ;;  %s4508_s7 = smov 0  }
  0x13 LB: > { %5746 = sst [smem:[#allocation17_spill]] %s4385_s20  ;;  %s4549_s8 = sadd.s32 4294967295, %s4437_s7   ;;  %s4437_s7 = sphi %s4508_s7, %s26_s7   ;;  %s4433_s6 = sphi %s4506_s6, %s5814_s6   ;;  %s4429_s30 = sphi %s4504_s30, %s5813_s30   ;;  %s4425_s29 = sphi %s4502_s29, %s5812_s29   ;;  %s4421_s28 = sphi %s4500_s28, %s5811_s28   ;;  %s4417_s27 = sphi %s4498_s27, %s5799_s27   ;;  %s4413_s26 = sphi %s4496_s26, %s5810_s26   ;;  %s4409_s4 = sphi %s4494_s4, %s5809_s4   ;;  %s4405_s25 = sphi %s4492_s25, %s5808_s25   ;;  %s4401_s24 = sphi %s4490_s24, %s5807_s24   ;;  %s4397_s23 = sphi %s4488_s23, %s5806_s23   ;;  %s4393_s22 = sphi %s4486_s22, %s5805_s22   ;;  %s4389_s21 = sphi %s4484_s21, %s5804_s21   ;;  %s4385_s20 = sphi %s4482_s20, %s5803_s20  }
  0x14   : > { %5747 = sst [smem:[#allocation18_spill]] %s4417_s27  ;;  %s3105_s9 = sadd.s32 4294967294, %s4437_s7  }
  0x15   : > { %5748 = sst [smem:[#allocation19_spill]] %s4421_s28  ;;  %p60_p0 = scmp.ne.s32.totalorder %s4413_s26, %s4409_s4 }
  0x16   : > { %5749 = sst [smem:[#allocation20_spill]] %s4425_s29  ;;  %p61_p1 = scmp.eq.s32.totalorder %s4549_s8, 0 }
  0x17   : > { %5750 = sst [smem:[#allocation21_spill]] %s4433_s6  ;;  %p86_p2 = scmp.ne.s32.totalorder %s4401_s24, %s4397_s23 }
  0x18   : > { %p172_p3 = scmp.ne.s32.totalorder %s4393_s22, %s4389_s21  ;;  %p4559_p4 = por %p61_p1, %p60_p0 }
  0x19   : > { %p173_p5 = scmp.eq.s32.totalorder %s4549_s8, 3  ;;  %p4566_p6 = por %p86_p2, %p61_p1 }
  0x1a   : > { %p178_p7 = scmp.ne.s32.totalorder %s4389_s21, %s4385_s20  ;;  %p179_p9 = scmp.eq.s32.totalorder %s3105_s9, 3 }
  0x1b   : > { %p4572_p8 = por %p173_p5, %p172_p3  ;;  %p3106_p10 = scmp.ge.s32.totalorder %s4437_s7, 1 }
  0x1c   : > { %p186_p11 = scmp.lt.s32.totalorder %s4437_s7, 5  ;;  %p4578_p12 = por %p179_p9, %p178_p7 }
  0x1d   : > { %s5753_s12 = scalar_select %p4572_p8, 1, 0 }
  0x1e   : > { %s5755_s13 = scalar_select %p4578_p12, 1, 0 }
  0x1f   : > { %5754 = sst [smem:[#allocation22_spill]] %s5753_s12  ;;  %p4582_p13 = pnand %p3106_p10, %p186_p11 }
  0x20   : > { %5756 = sst [smem:[#allocation23_spill]] %s5755_s13  ;;  %s4439_s18 = smov [#allocation8]  }
  0x21   : > { %s5758_s2 = sld [smem:[#allocation39_spill]]  ;;  %p4012_p0 = pneg %p4582_p13 }
  0x22   : > { %s199_s19 = sshll.u32 %s4439_s18, 4  ;;  %s5759_s3 = sld [smem:[#allocation40_spill]]  ;;  %s200_s19 = int_to_ptr.vmem [resolvable:$true] %s199_s19 }
  0x23   : > { %p4013_p2 = pnand %p4012_p0, %p61_p1  ;;  %s5731_s15 = smov 64  }
  0x24   : > { %s5732_s16 = smov 4   ;;  %s4442_s18 = smov [#allocation9]  }
  0x25   : > { %s35_s23 = sadd.s32 1, %s4429_s30  ;;  %s38_s4 = sadd.s32 1, %s4433_s6 }
  0x26   : > { %p36_p3 = scmp.ge.s32.totalorder %s35_s23, 2  ;;  %p54_p5 = scmp.ne.s32.totalorder %s4417_s27, %s4413_s26 }
  0x27   : > { %s197_s17 = sshll.u32 %s5758_s2, 4  ;;  %s214_s2 = sshll.u32 %s4442_s18, 4  ;;  %s198_s17 = int_to_ptr.hbm [resolvable:$true] %s197_s17  ;;  %s215_s2 = int_to_ptr.vmem [resolvable:$true] %s214_s2 }
  0x28   : > { %s212_s9 = sshll.u32 %s5759_s3, 4  ;;  %s47_s3 = sadd.s32 1, %s4417_s27  ;;  %s213_s9 = int_to_ptr.hbm [resolvable:$true] %s212_s9 }
  0x29   : > { %4015 = dma.hbm_to_vmem [thread:$0]  (!%p4013_p2), %s198_s17, 1024, %s200_s19, [#allocation7], %s5731_s15, %s5731_s15, %s5732_s16  }
  0x2a   : > { %4018 = dma.hbm_to_vmem [thread:$0]  (!%p4013_p2), %s213_s9, 16, %s215_s2, [#allocation10]  }
  0x2b   : > { %s5816_s23 = smov (%p36_p3, %s35_s23), 0  ;;  %s5818_s4 = smov (!%p36_p3, %s38_s4), %s4433_s6 }
  0x2c   : > { %5760 = sst [smem:[#allocation24_spill]] %s5816_s23  ;;  %s4609_s17 = ssub.s32 %s4429_s30, %s5816_s23 }
  0x2d   : > { %p55_p7 = scmp.eq.s32.totalorder %s4437_s7, 0  ;;  %p40_p9 = scmp.ge.s32.totalorder %s5818_s4, 2 }
  0x2e   : > { %p71_p10 = scmp.eq.s32.totalorder %s4609_s17, 0  ;;  %s162_s19 = sadd.s32 1, %s4393_s22 }
  0x2f   : > { %p4615_p11 = por %p55_p7, %p54_p5  ;;  %s5820_s4 = smov (%p40_p9, %s5818_s4), 0 }
  0x30   : > { %5762 = sst [smem:[#allocation25_spill]] %s5820_s4  ;;  %p4032_p0 = scmp.lt.s32.totalorder %s4437_s7, 4 }
  0x31   : > { %s228_s9 = sand.u32 1, %s4417_s27   ;;  %s42_s18 = ssub.s32 %s4433_s6, %s5820_s4 }
  0x32   : > { %s44_s15 = sor.u32 %s4609_s17, %s42_s18  ;;  %p160_p2 = scmp.eq.s32.totalorder %s42_s18, 0 }
  0x33   : > { %p45_p3 = scmp.eq.s32.totalorder %s44_s15, 0  ;;  %s3110_s16 = sshll.u32 %s228_s9, 10 }
  0x34   : > { %s4628_s23 = scalar_select %p160_p2, %s4393_s22, %s162_s19  }
  0x35   : > { %s4631_s13 = scalar_select %p45_p3, %s4417_s27, %s47_s3  }
  0x36   : > { %5763 = sst [smem:[#allocation26_spill]] %s4628_s23  ;;  %s3112_s20 = sshll.u32 %s4429_s30, 2 }
  0x37   : > { %5764 = sst [smem:[#allocation27_spill]] %s4631_s13  ;;  %s3803_s5 = sshll.u32 %s4433_s6, 9 }
  0x38   : > { %s232_s12 = scalar_lea.vmem [#allocation3], %s3110_s16  ;;  %s238_s28 = sadd.s32 %s3803_s5, %s3112_s20 }
  0x39   : > { %s243_s29 = sshll.u32 %s232_s12, 4  ;;  %s3114_s15 = sshll.u32 %s238_s28, 2  ;;  %s244_s29 = int_to_ptr.vmem [resolvable:$true] %s243_s29 }
  0x3a   : > { %p4020_p5 = pnand %p4032_p0, %p4615_p11  ;;  %s5765_s0 = sld [smem:[#allocation38_spill]] }
  0x3b   : > { %s229_s16 = scalar_lea.sflag [#allocation4], %s228_s9  ;;  %s4443_s6 = smov 512  }
  0x3c   : > { %s4444_s12 = smov 256   ;;  %s4445_s13 = smov 16  }
  0x3d   : > { %s253_s5 = sand.u32 1, %s4437_s7   ;;  %s73_s20 = sadd.s32 1, %s4405_s25 }
  0x3e   : > { %p80_p9 = scmp.ne.s32.totalorder %s4405_s25, %s4401_s24  ;;  %s255_s2 = sand.u32 1, %s4405_s25  }
  0x3f   : > { %s4649_s28 = scalar_select %p71_p10, %s4405_s25, %s73_s20  }
  0x40   : > { %s240_s18 = scalar_lea.hbm %s5765_s0, %s3114_s15  ;;  %p82_p11 = por %p80_p9, %p55_p7 }
  0x41   : > { %s241_s4 = sshll.u32 %s240_s18, 4  ;;  %s3804_s27 = sshll.u32 %s4429_s30, 8  ;;  %s242_s4 = int_to_ptr.hbm [resolvable:$true] %s241_s4 }
  0x42   : > { %4022 = dma.hbm_to_vmem [thread:$0]  (!%p4020_p5), %s242_s4, 16384, %s244_s29, %s229_s16, %s4443_s6, %s4444_s12, %s4445_s13  }
  0x43   : > { %s3115_s3 = sshll.u32 %s255_s2, 8  ;;  %s262_s9 = scalar_lea.hbm %s5726_s1, %s3804_s27 }
  0x44   : > { %s263_s18 = sshll.u32 %s262_s9, 4  ;;  %s257_s0 = scalar_lea.vmem [#allocation6], %s3115_s3  ;;  %s264_s18 = int_to_ptr.hbm [resolvable:$true] %s263_s18 }
  0x45   : > { %s265_s23 = sshll.u32 %s257_s0, 4  ;;  %p4023_p2 = pnand %p4032_p0, %p82_p11  ;;  %s266_s23 = int_to_ptr.vmem [resolvable:$true] %s265_s23 }
  0x46   : > { %s254_s29 = scalar_lea.sflag [#allocation7], %s253_s5  ;;  %s5766_s6 = smov 4  }
  0x47   : > { %s5767_s13 = smov 64   ;;  %277 = sbr.rel (%p4582_p13) target bundleno = 1222 (0x4c6), region = 40 }
  0x48   : > { %4025 = dma.hbm_to_vmem [thread:$0]  (!%p4023_p2), %s264_s18, 4096, %s266_s23, %s254_s29, %s5767_s13, %s5767_s13, %s5766_s6  }
  0x4c   : > { %s279_s4 = sand.u32 1, %s4413_s26  }
  0x4d   : > { %s3119_s17 = sshll.u32 %s279_s4, 10  ;;  %s280_s27 = scalar_lea.sflag [#allocation4], %s279_s4 }
  0x4e   : > { %s4666_s16 = scalar_lea.vmem [#allocation3], %s3119_s17 }
  0x4f   : > { %4364 = dma.done.wait (%p4559_p4), %s280_s27, 16384  }
  0x50   : > { %4366 = vsyncadd (%p4559_p4), %s280_s27, 4294950912  ;;  %s289_s0 = sand.u32 1, %s4549_s8   ;;  %s291_s23 = sand.u32 1, %s4401_s24  }
  0x51   : > { %s3120_s12 = sshll.u32 %s291_s23, 8  ;;  %s290_s14 = scalar_lea.sflag [#allocation7], %s289_s0 }
  0x52   : > { %s4674_s5 = scalar_lea.vmem [#allocation6], %s3120_s12 }
  0x53   : > { %4368 = dma.done.wait (%p4566_p6), %s290_s14, 4096  }
  0x54   : > { %4370 = vsyncadd (%p4566_p6), %s290_s14, 4294963200 }
  0x55   : > { %4372 = dma.done.wait (%p61_p1), [#allocation7], 1024  }
  0x56   : > { %4374 = vsyncadd (%p61_p1), [#allocation7], 4294966272 }
  0x57   : > { %4376 = dma.done.wait (%p61_p1), [#allocation10], 16  }
  0x58   : > { %4378 = vsyncadd (%p61_p1), [#allocation10], 4294967280  ;;  %s333_s10 = sand.u32 1, %s4389_s21   ;;  %s5768_s11 = sld [smem:[#allocation19_spill]] }
  0x59   : > { %s3123_s20 = sshll.u32 %s333_s10, 9 }
  0x5a   : > { %s4691_s2 = scalar_lea.vmem [#allocation11], %s3123_s20 }
  0x5e   : > { %p3124_p4 = scmp.ne.s32.totalorder %s5768_s11, 0 }
  0x60   : > { %343 = sbr.rel (%p3124_p4) target bundleno = 166 (0xa6), region = 60 }
  0x65   : > { %v4446_v0 = vmov 0.0  }
  0x66   : > { %344 = vst [vmem:[%s4691_s2] sm:$0xff] %v4446_v0 }
  0x67   : > { %345 = vst [vmem:[%s4691_s2 + $0x8] sm:$0xff] %v4446_v0 }
  0x68   : > { %346 = vst [vmem:[%s4691_s2 + $0x10] sm:$0xff] %v4446_v0 }
  0x69   : > { %347 = vst [vmem:[%s4691_s2 + $0x18] sm:$0xff] %v4446_v0 }
  0x6a   : > { %348 = vst [vmem:[%s4691_s2 + $0x20] sm:$0xff] %v4446_v0 }
  0x6b   : > { %349 = vst [vmem:[%s4691_s2 + $0x28] sm:$0xff] %v4446_v0 }
  0x6c   : > { %350 = vst [vmem:[%s4691_s2 + $0x30] sm:$0xff] %v4446_v0 }
  0x6d   : > { %351 = vst [vmem:[%s4691_s2 + $0x38] sm:$0xff] %v4446_v0 }
  0x6e   : > { %352 = vst [vmem:[%s4691_s2 + $0x40] sm:$0xff] %v4446_v0 }
  0x6f   : > { %353 = vst [vmem:[%s4691_s2 + $0x48] sm:$0xff] %v4446_v0 }
  0x70   : > { %354 = vst [vmem:[%s4691_s2 + $0x50] sm:$0xff] %v4446_v0 }
  0x71   : > { %355 = vst [vmem:[%s4691_s2 + $0x58] sm:$0xff] %v4446_v0 }
  0x72   : > { %356 = vst [vmem:[%s4691_s2 + $0x60] sm:$0xff] %v4446_v0 }
  0x73   : > { %357 = vst [vmem:[%s4691_s2 + $0x68] sm:$0xff] %v4446_v0 }
  0x74   : > { %358 = vst [vmem:[%s4691_s2 + $0x70] sm:$0xff] %v4446_v0 }
  0x75   : > { %359 = vst [vmem:[%s4691_s2 + $0x78] sm:$0xff] %v4446_v0 }
  0x76   : > { %360 = vst [vmem:[%s4691_s2 + $0x80] sm:$0xff] %v4446_v0 }
  0x77   : > { %361 = vst [vmem:[%s4691_s2 + $0x88] sm:$0xff] %v4446_v0 }
  0x78   : > { %362 = vst [vmem:[%s4691_s2 + $0x90] sm:$0xff] %v4446_v0 }
  0x79   : > { %363 = vst [vmem:[%s4691_s2 + $0x98] sm:$0xff] %v4446_v0 }
  0x7a   : > { %364 = vst [vmem:[%s4691_s2 + $0xa0] sm:$0xff] %v4446_v0 }
  0x7b   : > { %365 = vst [vmem:[%s4691_s2 + $0xa8] sm:$0xff] %v4446_v0 }
  0x7c   : > { %366 = vst [vmem:[%s4691_s2 + $0xb0] sm:$0xff] %v4446_v0 }
  0x7d   : > { %367 = vst [vmem:[%s4691_s2 + $0xb8] sm:$0xff] %v4446_v0 }
  0x7e   : > { %368 = vst [vmem:[%s4691_s2 + $0xc0] sm:$0xff] %v4446_v0 }
  0x7f   : > { %369 = vst [vmem:[%s4691_s2 + $0xc8] sm:$0xff] %v4446_v0 }
  0x80   : > { %370 = vst [vmem:[%s4691_s2 + $0xd0] sm:$0xff] %v4446_v0 }
  0x81   : > { %371 = vst [vmem:[%s4691_s2 + $0xd8] sm:$0xff] %v4446_v0 }
  0x82   : > { %372 = vst [vmem:[%s4691_s2 + $0xe0] sm:$0xff] %v4446_v0 }
  0x83   : > { %373 = vst [vmem:[%s4691_s2 + $0xe8] sm:$0xff] %v4446_v0 }
  0x84   : > { %374 = vst [vmem:[%s4691_s2 + $0xf0] sm:$0xff] %v4446_v0 }
  0x85   : > { %375 = vst [vmem:[%s4691_s2 + $0xf8] sm:$0xff] %v4446_v0 }
  0x86   : > { %376 = vst [vmem:[%s4691_s2 + $0x100] sm:$0xff] %v4446_v0 }
  0x87   : > { %377 = vst [vmem:[%s4691_s2 + $0x108] sm:$0xff] %v4446_v0 }
  0x88   : > { %378 = vst [vmem:[%s4691_s2 + $0x110] sm:$0xff] %v4446_v0 }
  0x89   : > { %379 = vst [vmem:[%s4691_s2 + $0x118] sm:$0xff] %v4446_v0 }
  0x8a   : > { %380 = vst [vmem:[%s4691_s2 + $0x120] sm:$0xff] %v4446_v0 }
  0x8b   : > { %381 = vst [vmem:[%s4691_s2 + $0x128] sm:$0xff] %v4446_v0 }
  0x8c   : > { %382 = vst [vmem:[%s4691_s2 + $0x130] sm:$0xff] %v4446_v0 }
  0x8d   : > { %383 = vst [vmem:[%s4691_s2 + $0x138] sm:$0xff] %v4446_v0 }
  0x8e   : > { %384 = vst [vmem:[%s4691_s2 + $0x140] sm:$0xff] %v4446_v0 }
  0x8f   : > { %385 = vst [vmem:[%s4691_s2 + $0x148] sm:$0xff] %v4446_v0 }
  0x90   : > { %386 = vst [vmem:[%s4691_s2 + $0x150] sm:$0xff] %v4446_v0 }
  0x91   : > { %387 = vst [vmem:[%s4691_s2 + $0x158] sm:$0xff] %v4446_v0 }
  0x92   : > { %388 = vst [vmem:[%s4691_s2 + $0x160] sm:$0xff] %v4446_v0 }
  0x93   : > { %389 = vst [vmem:[%s4691_s2 + $0x168] sm:$0xff] %v4446_v0 }
  0x94   : > { %390 = vst [vmem:[%s4691_s2 + $0x170] sm:$0xff] %v4446_v0 }
  0x95   : > { %391 = vst [vmem:[%s4691_s2 + $0x178] sm:$0xff] %v4446_v0 }
  0x96   : > { %392 = vst [vmem:[%s4691_s2 + $0x180] sm:$0xff] %v4446_v0 }
  0x97   : > { %393 = vst [vmem:[%s4691_s2 + $0x188] sm:$0xff] %v4446_v0 }
  0x98   : > { %394 = vst [vmem:[%s4691_s2 + $0x190] sm:$0xff] %v4446_v0 }
  0x99   : > { %395 = vst [vmem:[%s4691_s2 + $0x198] sm:$0xff] %v4446_v0 }
  0x9a   : > { %396 = vst [vmem:[%s4691_s2 + $0x1a0] sm:$0xff] %v4446_v0 }
  0x9b   : > { %397 = vst [vmem:[%s4691_s2 + $0x1a8] sm:$0xff] %v4446_v0 }
  0x9c   : > { %398 = vst [vmem:[%s4691_s2 + $0x1b0] sm:$0xff] %v4446_v0 }
  0x9d   : > { %399 = vst [vmem:[%s4691_s2 + $0x1b8] sm:$0xff] %v4446_v0 }
  0x9e   : > { %400 = vst [vmem:[%s4691_s2 + $0x1c0] sm:$0xff] %v4446_v0 }
  0x9f   : > { %401 = vst [vmem:[%s4691_s2 + $0x1c8] sm:$0xff] %v4446_v0 }
  0xa0   : > { %402 = vst [vmem:[%s4691_s2 + $0x1d0] sm:$0xff] %v4446_v0 }
  0xa1   : > { %403 = vst [vmem:[%s4691_s2 + $0x1d8] sm:$0xff] %v4446_v0 }
  0xa2   : > { %404 = vst [vmem:[%s4691_s2 + $0x1e0] sm:$0xff] %v4446_v0 }
  0xa3   : > { %405 = vst [vmem:[%s4691_s2 + $0x1e8] sm:$0xff] %v4446_v0 }
  0xa4   : > { %406 = vst [vmem:[%s4691_s2 + $0x1f0] sm:$0xff] %v4446_v0 }
  0xa5   : > { %407 = vst [vmem:[%s4691_s2 + $0x1f8] sm:$0xff] %v4446_v0 }
  0xa6 PF: > { %v3844_v1 = vld [vmem:[#allocation8 + $0x38] sm:$0xff]  ;;  %v3843_v2 = vld [vmem:[#allocation8 + $0x30] sm:$0xff]  ;;  %v3842_v3 = vld [vmem:[#allocation8 + $0x28] sm:$0xff]  ;;  %s5789_s8 = sld [smem:[#allocation19_spill]] }
  0xa7   : > { %728 = vmatpush.bf16.msra.mxu0 %v3844_v1  ;;  %3974 = vmatpush.bf16.msra.mxu1 %v3844_v1  ;;  %v3841_v4 = vld [vmem:[#allocation8 + $0x20] sm:$0xff]  ;;  %v3840_v5 = vld [vmem:[#allocation8 + $0x18] sm:$0xff]  ;;  %v3839_v6 = vld [vmem:[#allocation8 + $0x10] sm:$0xff] }
  0xa8   : > { %3975 = vmatpush.bf16.msra.mxu2 %v3844_v1  ;;  %3976 = vmatpush.bf16.msra.mxu3 %v3844_v1  ;;  %v3838_v7 = vld [vmem:[#allocation8 + $0x8] sm:$0xff]  ;;  %v3837_v8 = vld [vmem:[#allocation8] sm:$0xff]  ;;  %v3807_v17 = vld [vmem:[%s4674_s5 + $0x10] sm:$0xff] }
  0xa9   : > { %v3805_v9 = vld [vmem:[%s4674_s5] sm:$0xff]  ;;  %v3806_v13 = vld [vmem:[%s4674_s5 + $0x8] sm:$0xff]  ;;  %v3815_v18 = vld [vmem:[%s4674_s5 + $0x50] sm:$0xff] }
  0xaa   : > { %v3813_v10 = vld [vmem:[%s4674_s5 + $0x40] sm:$0xff]  ;;  %v3814_v14 = vld [vmem:[%s4674_s5 + $0x48] sm:$0xff]  ;;  %v3823_v19 = vld [vmem:[%s4674_s5 + $0x90] sm:$0xff] }
  0xab   : > { %729 = vmatpush.bf16.msra.mxu0 %v3843_v2  ;;  %3977 = vmatpush.bf16.msra.mxu1 %v3843_v2  ;;  %v3821_v11 = vld [vmem:[%s4674_s5 + $0x80] sm:$0xff]  ;;  %v3822_v15 = vld [vmem:[%s4674_s5 + $0x88] sm:$0xff]  ;;  %v3831_v20 = vld [vmem:[%s4674_s5 + $0xd0] sm:$0xff] }
  0xac   : > { %3978 = vmatpush.bf16.msra.mxu2 %v3843_v2  ;;  %3979 = vmatpush.bf16.msra.mxu3 %v3843_v2  ;;  %v3829_v12 = vld [vmem:[%s4674_s5 + $0xc0] sm:$0xff]  ;;  %v3830_v16 = vld [vmem:[%s4674_s5 + $0xc8] sm:$0xff]  ;;  %v3808_v21 = vld [vmem:[%s4674_s5 + $0x18] sm:$0xff]  ;;  %p3797_p1 = scmp.ne.s32.totalorder %s5789_s8, 1 }
  0xad   : > { %v3816_v22 = vld [vmem:[%s4674_s5 + $0x58] sm:$0xff]  ;;  %v3809_v25 = vld [vmem:[%s4674_s5 + $0x20] sm:$0xff]  ;;  %v3810_v29 = vld [vmem:[%s4674_s5 + $0x28] sm:$0xff]  ;;  %s2701_s3 = sld [smem:[#allocation2]] (!%p3797_p1) }
  0xae   : > { %v3824_v23 = vld [vmem:[%s4674_s5 + $0x98] sm:$0xff]  ;;  %v3817_v26 = vld [vmem:[%s4674_s5 + $0x60] sm:$0xff]  ;;  %v3818_v30 = vld [vmem:[%s4674_s5 + $0x68] sm:$0xff] }
  0xaf   : > { %730 = vmatpush.bf16.msra.mxu0 %v3842_v3  ;;  %3980 = vmatpush.bf16.msra.mxu1 %v3842_v3  ;;  %v3832_v24 = vld [vmem:[%s4674_s5 + $0xd8] sm:$0xff]  ;;  %v3825_v27 = vld [vmem:[%s4674_s5 + $0xa0] sm:$0xff]  ;;  %v3826_v31 = vld [vmem:[%s4674_s5 + $0xa8] sm:$0xff] }
  0xb0   : > { %3981 = vmatpush.bf16.msra.mxu2 %v3842_v3  ;;  %3982 = vmatpush.bf16.msra.mxu3 %v3842_v3  ;;  %v3833_v28 = vld [vmem:[%s4674_s5 + $0xe0] sm:$0xff]  ;;  %v3834_v32 = vld [vmem:[%s4674_s5 + $0xe8] sm:$0xff]  ;;  %v3811_v33 = vld [vmem:[%s4674_s5 + $0x30] sm:$0xff] }
  0xb1   : > { %v3819_v34 = vld [vmem:[%s4674_s5 + $0x70] sm:$0xff]  ;;  %v3812_v37 = vld [vmem:[%s4674_s5 + $0x38] sm:$0xff] }
  0xb2   : > { %v3827_v35 = vld [vmem:[%s4674_s5 + $0xb0] sm:$0xff]  ;;  %v3820_v38 = vld [vmem:[%s4674_s5 + $0x78] sm:$0xff] }
  0xb3   : > { %731 = vmatpush.bf16.msra.mxu0 %v3841_v4  ;;  %3983 = vmatpush.bf16.msra.mxu1 %v3841_v4  ;;  %v3835_v36 = vld [vmem:[%s4674_s5 + $0xf0] sm:$0xff]  ;;  %v3828_v39 = vld [vmem:[%s4674_s5 + $0xb8] sm:$0xff] }
  0xb4   : > { %3984 = vmatpush.bf16.msra.mxu2 %v3841_v4  ;;  %3985 = vmatpush.bf16.msra.mxu3 %v3841_v4  ;;  %v3836_v40 = vld [vmem:[%s4674_s5 + $0xf8] sm:$0xff] }
  0xb7   : > { %732 = vmatpush.bf16.msra.mxu0 %v3840_v5  ;;  %3986 = vmatpush.bf16.msra.mxu1 %v3840_v5 }
  0xb8   : > { %3987 = vmatpush.bf16.msra.mxu2 %v3840_v5  ;;  %3988 = vmatpush.bf16.msra.mxu3 %v3840_v5 }
  0xbb   : > { %733 = vmatpush.bf16.msra.mxu0 %v3839_v6  ;;  %3989 = vmatpush.bf16.msra.mxu1 %v3839_v6 }
  0xbc   : > { %3990 = vmatpush.bf16.msra.mxu2 %v3839_v6  ;;  %3991 = vmatpush.bf16.msra.mxu3 %v3839_v6 }
  0xbf   : > { %734 = vmatpush.bf16.msra.mxu0 %v3838_v7  ;;  %3992 = vmatpush.bf16.msra.mxu1 %v3838_v7 }
  0xc0   : > { %3993 = vmatpush.bf16.msra.mxu2 %v3838_v7  ;;  %3994 = vmatpush.bf16.msra.mxu3 %v3838_v7 }
  0xc3   : > { %735 = vmatpush.bf16.msra.mxu0 %v3837_v8  ;;  %3995 = vmatpush.bf16.msra.mxu1 %v3837_v8 }
  0xc4   : > { %3996 = vmatpush.bf16.msra.mxu2 %v3837_v8  ;;  %3997 = vmatpush.bf16.msra.mxu3 %v3837_v8 }
  0xc6   : > { %736 = vmatmul.bf16.vlgmr.msra.gmra.mxu0 %v3805_v9  ;;  %776 = vmatmul.bf16.vlgmr.msra.gmra.mxu1 %v3813_v10 }
  0xc7   : > { %816 = vmatmul.bf16.vlgmr.msra.gmra.mxu2 %v3821_v11  ;;  %856 = vmatmul.bf16.vlgmr.msra.gmra.mxu3 %v3829_v12 }
  0xd6   : > { %741 = vmatmul.bf16.gmra.mxu0 %v3806_v13  ;;  %781 = vmatmul.bf16.gmra.mxu1 %v3814_v14 }
  0xd7   : > { %821 = vmatmul.bf16.gmra.mxu2 %v3822_v15  ;;  %861 = vmatmul.bf16.gmra.mxu3 %v3830_v16 }
  0xe6   : > { %746 = vmatmul.bf16.gmra.mxu0 %v3807_v17  ;;  %786 = vmatmul.bf16.gmra.mxu1 %v3815_v18 }
  0xe7   : > { %826 = vmatmul.bf16.gmra.mxu2 %v3823_v19  ;;  %866 = vmatmul.bf16.gmra.mxu3 %v3831_v20 }
  0xf6   : > { %751 = vmatmul.bf16.gmra.mxu0 %v3808_v21  ;;  %791 = vmatmul.bf16.gmra.mxu1 %v3816_v22 }
  0xf7   : > { %831 = vmatmul.bf16.gmra.mxu2 %v3824_v23  ;;  %871 = vmatmul.bf16.gmra.mxu3 %v3832_v24 }
 0x106   : > { %756 = vmatmul.bf16.gmra.mxu0 %v3809_v25  ;;  %796 = vmatmul.bf16.gmra.mxu1 %v3817_v26 }
 0x107   : > { %836 = vmatmul.bf16.gmra.mxu2 %v3825_v27  ;;  %876 = vmatmul.bf16.gmra.mxu3 %v3833_v28 }
 0x116   : > { %761 = vmatmul.bf16.gmra.mxu0 %v3810_v29  ;;  %801 = vmatmul.bf16.gmra.mxu1 %v3818_v30 }
 0x117   : > { %841 = vmatmul.bf16.gmra.mxu2 %v3826_v31  ;;  %881 = vmatmul.bf16.gmra.mxu3 %v3834_v32 }
 0x126   : > { %766 = vmatmul.bf16.gmra.mxu0 %v3811_v33  ;;  %806 = vmatmul.bf16.gmra.mxu1 %v3819_v34 }
 0x127   : > { %846 = vmatmul.bf16.gmra.mxu2 %v3827_v35  ;;  %886 = vmatmul.bf16.gmra.mxu3 %v3835_v36 }
 0x136   : > { %771 = vmatmul.bf16.gmra.mxu0 %v3812_v37  ;;  %811 = vmatmul.bf16.gmra.mxu1 %v3820_v38 }
 0x137   : > { %851 = vmatmul.bf16.gmra.mxu2 %v3828_v39  ;;  %891 = vmatmul.bf16.gmra.mxu3 %v3836_v40 }
 0x143   : > { %v4854_v41 = vpop.f32.mrf.mxu0  ;;  %v4856_v42 = vpop.f32.mrf.mxu1 }
 0x144   : > { %5769 = vst [vmem:[#allocation28_spill] sm:$0xff] %v4856_v42 }
 0x14a   : > { %v4858_v43 = vpop.f32.mrf.mxu2  ;;  %v4860_v44 = vpop.f32.mrf.mxu3 }
 0x14b   : > { %5770 = vst [vmem:[#allocation29_spill] sm:$0xff] %v4858_v43  ;;  %v4862_v45 = vpop.f32.mrf.mxu0  ;;  %v4864_v46 = vpop.f32.mrf.mxu1 }
 0x14c   : > { %5771 = vst [vmem:[#allocation30_spill] sm:$0xff] %v4860_v44 }
 0x14d   : > { %5772 = vst [vmem:[#allocation31_spill] sm:$0xff] %v4864_v46 }
 0x152   : > { %v4866_v47 = vpop.f32.mrf.mxu2  ;;  %v4868_v48 = vpop.f32.mrf.mxu3 }
 0x153   : > { %5773 = vst [vmem:[#allocation32_spill] sm:$0xff] %v4866_v47  ;;  %v4870_v49 = vpop.f32.mrf.mxu0  ;;  %v4872_v50 = vpop.f32.mrf.mxu1 }
 0x154   : > { %5774 = vst [vmem:[#allocation33_spill] sm:$0xff] %v4868_v48 }
 0x15a   : > { %v4874_v51 = vpop.f32.mrf.mxu2  ;;  %v4876_v52 = vpop.f32.mrf.mxu3 }
 0x15b   : > { %5775 = vst [vmem:[#allocation34_spill] sm:$0xff] %v4874_v51  ;;  %v4878_v53 = vpop.f32.mrf.mxu0  ;;  %v4880_v54 = vpop.f32.mrf.mxu1 }
 0x15c   : > { %5776 = vst [vmem:[#allocation35_spill] sm:$0xff] %v4876_v52 }
 0x162   : > { %v4882_v55 = vpop.f32.mrf.mxu2  ;;  %v4884_v56 = vpop.f32.mrf.mxu3 }
 0x163   : > { %5777 = vst [vmem:[#allocation36_spill] sm:$0xff] %v4882_v55  ;;  %v4886_v57 = vpop.f32.mrf.mxu0  ;;  %v4888_v58 = vpop.f32.mrf.mxu1 }
 0x164   : > { %5778 = vst [vmem:[#allocation37_spill] sm:$0xff] %v4884_v56 }
 0x16a   : > { %v4890_v59 = vpop.f32.mrf.mxu2  ;;  %v4892_v60 = vpop.f32.mrf.mxu3 }
 0x16b   : > { %v4894_v61 = vpop.f32.mrf.mxu0  ;;  %v4896_v62 = vpop.f32.mrf.mxu1 }
 0x172   : > { %v4898_v63 = vpop.f32.mrf.mxu2  ;;  %v4900_v0 = vpop.f32.mrf.mxu3 }
 0x173   : > { %v4902_v1 = vpop.f32.mrf.mxu0  ;;  %v4904_v2 = vpop.f32.mrf.mxu1 }
 0x17a   : > { %v4906_v3 = vpop.f32.mrf.mxu2  ;;  %v4908_v4 = vpop.f32.mrf.mxu3 }
 0x17b   : > { %v4910_v5 = vpop.f32.mrf.mxu0  ;;  %v4912_v6 = vpop.f32.mrf.mxu1 }
 0x182   : > { %v4914_v7 = vpop.f32.mrf.mxu2  ;;  %v4916_v8 = vpop.f32.mrf.mxu3 }
 0x183   : > { %v757_v9 = vpop.f32.mrf.mxu0  ;;  %v797_v10 = vpop.f32.mrf.mxu1 }
 0x18a   : > { %v4918_v11 = vpop.f32.mrf.mxu2  ;;  %v4920_v12 = vpop.f32.mrf.mxu3 }
 0x18b   : > { %v759_v13 = vpop.f32.mrf.mxu0  ;;  %v799_v14 = vpop.f32.mrf.mxu1 }
 0x192   : > { %v839_v15 = vpop.f32.mrf.mxu2  ;;  %v879_v16 = vpop.f32.mrf.mxu3 }
 0x193   : > { %v762_v17 = vpop.f32.mrf.mxu0  ;;  %v802_v18 = vpop.f32.mrf.mxu1 }
 0x19a   : > { %v842_v19 = vpop.f32.mrf.mxu2  ;;  %v882_v20 = vpop.f32.mrf.mxu3 }
 0x19b   : > { %v764_v21 = vpop.f32.mrf.mxu0  ;;  %v804_v22 = vpop.f32.mrf.mxu1 }
 0x19c   : > { %v902_v55 = vpack.c.bf16 %v764_v21, %v762_v17  ;;  %v910_v51 = vpack.c.bf16 %v804_v22, %v802_v18  ;;  %v3849_v17 = vld [vmem:[%s4666_s16 + $0x24] sm:$0xf]  ;;  %v3305_v18 = vld [vmem:[%s4666_s16 + $0x30] sm:$0xf0] }
 0x19d   : > { %v3308_v21 = vor.u32 %v3849_v17, %v3305_v18 }
 0x1a2   : > { %v844_v23 = vpop.f32.mrf.mxu2  ;;  %v884_v24 = vpop.f32.mrf.mxu3 }
 0x1a3   : > { %v767_v25 = vpop.f32.mrf.mxu0  ;;  %v807_v26 = vpop.f32.mrf.mxu1 }
 0x1aa   : > { %v847_v27 = vpop.f32.mrf.mxu2  ;;  %v887_v28 = vpop.f32.mrf.mxu3 }
 0x1ab   : > { %v769_v29 = vpop.f32.mrf.mxu0  ;;  %v809_v30 = vpop.f32.mrf.mxu1 }
 0x1ac   : > { %v903_v48 = vpack.c.bf16 %v769_v29, %v767_v25  ;;  %v911_v44 = vpack.c.bf16 %v809_v30, %v807_v26  ;;  %v918_v25 = vpack.c.bf16 %v844_v23, %v842_v19  ;;  %v926_v26 = vpack.c.bf16 %v884_v24, %v882_v20  ;;  %v3303_v19 = vld [vmem:[%s4666_s16 + $0x20] sm:$0xf]  ;;  %v3851_v20 = vld [vmem:[%s4666_s16 + $0x2c] sm:$0xf0]  ;;  %v3311_v23 = vld [vmem:[%s4666_s16 + $0x28] sm:$0xf] }
 0x1ad   : > { %v3304_v22 = vor.u32 %v3851_v20, %v3303_v19  ;;  %v3852_v24 = vld [vmem:[%s4666_s16 + $0x34] sm:$0xf0]  ;;  %v3391_v19 = vld [vmem:[%s4666_s16 + $0xc8] sm:$0xf] }
 0x1ae   : > { %v3312_v29 = vor.u32 %v3852_v24, %v3311_v23  ;;  %v3872_v20 = vld [vmem:[%s4666_s16 + $0xd4] sm:$0xf0] }
 0x1af   : > { %v3392_v23 = vor.u32 %v3872_v20, %v3391_v19  ;;  %v3885_v20 = vld [vmem:[%s4666_s16 + $0x144] sm:$0xf] }
 0x1b2   : > { %v849_v31 = vpop.f32.mrf.mxu2  ;;  %v889_v32 = vpop.f32.mrf.mxu3 }
 0x1b3   : > { %v772_v33 = vpop.f32.mrf.mxu0  ;;  %v812_v34 = vpop.f32.mrf.mxu1  ;;  %v919_v46 = vpack.c.bf16 %v849_v31, %v847_v27  ;;  %v927_v42 = vpack.c.bf16 %v889_v32, %v887_v28  ;;  %v3850_v27 = vld [vmem:[%s4666_s16 + $0x2c] sm:$0xf]  ;;  %v3313_v28 = vld [vmem:[%s4666_s16 + $0x38] sm:$0xf0]  ;;  %v3853_v31 = vld [vmem:[%s4666_s16 + $0x44] sm:$0xf] }
 0x1b4   : > { %v3316_v30 = vor.u32 %v3850_v27, %v3313_v28  ;;  %v3321_v32 = vld [vmem:[%s4666_s16 + $0x50] sm:$0xf0]  ;;  %v3873_v27 = vld [vmem:[%s4666_s16 + $0xe4] sm:$0xf] }
 0x1b5   : > { %v3401_v28 = vld [vmem:[%s4666_s16 + $0xf0] sm:$0xf0] }
 0x1ba   : > { %v852_v35 = vpop.f32.mrf.mxu2  ;;  %v892_v36 = vpop.f32.mrf.mxu3 }
 0x1bb   : > { %v774_v37 = vpop.f32.mrf.mxu0  ;;  %v814_v38 = vpop.f32.mrf.mxu1 }
 0x1bc   : > { %v904_v39 = vpack.c.bf16 %v774_v37, %v772_v33  ;;  %v912_v40 = vpack.c.bf16 %v814_v38, %v812_v34  ;;  %v901_v33 = vpack.c.bf16 %v759_v13, %v757_v9  ;;  %v909_v34 = vpack.c.bf16 %v799_v14, %v797_v10  ;;  %v5785_v9 = vld [vmem:[#allocation29_spill] sm:$0xff]  ;;  %v5786_v10 = vld [vmem:[#allocation32_spill] sm:$0xff] }
 0x1bd   : > { %v5788_v13 = vld [vmem:[#allocation33_spill] sm:$0xff]  ;;  %v3324_v37 = vor.u32 %v3853_v31, %v3321_v32  ;;  %v3404_v31 = vor.u32 %v3873_v27, %v3401_v28  ;;  %v931_v28 = vld [vmem:[%s4691_s2 + $0x10] sm:$0xff] }
 0x1be   : > { %1761 = vmatpush.bf16.msrb.mxu1 %v904_v39  ;;  %1930 = vmatpush.bf16.msrb.mxu2 %v912_v40  ;;  %v3327_v39 = vld [vmem:[%s4666_s16 + $0x48] sm:$0xf]  ;;  %v3856_v40 = vld [vmem:[%s4666_s16 + $0x54] sm:$0xf0] }
 0x1c2   : > { %v854_v47 = vpop.f32.mrf.mxu2  ;;  %v894_v43 = vpop.f32.mrf.mxu3  ;;  %1762 = vmatpush.bf16.msrb.mxu1 %v903_v48  ;;  %1931 = vmatpush.bf16.msrb.mxu2 %v911_v44  ;;  %v900_v44 = vpack.c.bf16 %v4910_v5, %v4902_v1  ;;  %v907_v48 = vpack.c.bf16 %v4896_v62, %v4888_v58  ;;  %v915_v58 = vpack.c.bf16 %v4898_v63, %v4890_v59  ;;  %v3289_v62 = vld [vmem:[%s4666_s16 + $0x10] sm:$0xf0]  ;;  %v3287_v1 = vld [vmem:[%s4666_s16] sm:$0xf]  ;;  %v5784_v5 = vld [vmem:[#allocation37_spill] sm:$0xff] }
 0x1c3   : > { %v920_v56 = vpack.c.bf16 %v854_v47, %v852_v35  ;;  %v928_v52 = vpack.c.bf16 %v894_v43, %v892_v36  ;;  %v908_v43 = vpack.c.bf16 %v4912_v6, %v4904_v2  ;;  %v917_v47 = vpack.c.bf16 %v839_v15, %v4918_v11  ;;  %v3319_v35 = vld [vmem:[%s4666_s16 + $0x40] sm:$0xf]  ;;  %v3855_v36 = vld [vmem:[%s4666_s16 + $0x4c] sm:$0xf0] }
 0x1c4   : > { %v913_v11 = vpack.c.bf16 %v5786_v10, %v5785_v9  ;;  %v3320_v38 = vor.u32 %v3855_v36, %v3319_v35  ;;  %v3866_v9 = vld [vmem:[%s4666_s16 + $0xac] sm:$0xf]  ;;  %v3377_v10 = vld [vmem:[%s4666_s16 + $0xb8] sm:$0xf0]  ;;  %v3407_v35 = vld [vmem:[%s4666_s16 + $0xe8] sm:$0xf] }
 0x1c5   : > { %2099 = vmatpush.bf16.msrb.mxu3 %v920_v56  ;;  %2268 = vmatpush.bf16.msrb.mxu0 %v928_v52  ;;  %v924_v52 = vpack.c.bf16 %v4916_v8, %v4908_v4  ;;  %v906_v56 = vpack.c.bf16 %v4880_v54, %v4872_v50  ;;  %v897_v50 = vpack.c.bf16 %v4862_v45, %v4854_v41  ;;  %v5780_v54 = vld [vmem:[#allocation31_spill] sm:$0xff]  ;;  %v3846_v45 = vld [vmem:[%s4666_s16 + $0xc] sm:$0xf] }
 0x1c6   : > { %1763 = vmatpush.bf16.msrb.mxu1 %v902_v55  ;;  %1932 = vmatpush.bf16.msrb.mxu2 %v910_v51  ;;  %v916_v51 = vpack.c.bf16 %v4914_v7, %v4906_v3  ;;  %v898_v55 = vpack.c.bf16 %v4878_v53, %v4870_v49  ;;  %v3847_v49 = vld [vmem:[%s4666_s16 + $0xc] sm:$0xf0]  ;;  %v5779_v53 = vld [vmem:[#allocation28_spill] sm:$0xff]  ;;  %v5783_v4 = vld [vmem:[#allocation35_spill] sm:$0xff] }
 0x1c7   : > { %v905_v2 = vpack.c.bf16 %v5780_v54, %v5779_v53  ;;  %v3288_v63 = vor.u32 %v3847_v49, %v3287_v1  ;;  %v5781_v3 = vld [vmem:[#allocation34_spill] sm:$0xff]  ;;  %v922_v6 = vpack.c.bf16 %v5784_v5, %v5783_v4  ;;  %v3295_v7 = vld [vmem:[%s4666_s16 + $0x8] sm:$0xf]  ;;  %v3297_v8 = vld [vmem:[%s4666_s16 + $0x18] sm:$0xf0] }
 0x1c8   : > { %v3848_v41 = vld [vmem:[%s4666_s16 + $0x14] sm:$0xf0]  ;;  %v3351_v1 = vld [vmem:[%s4666_s16 + $0x80] sm:$0xf]  ;;  %v3863_v49 = vld [vmem:[%s4666_s16 + $0x8c] sm:$0xf0] }
 0x1c9   : > { %2100 = vmatpush.bf16.msrb.mxu3 %v919_v46  ;;  %2269 = vmatpush.bf16.msrb.mxu0 %v927_v42  ;;  %v925_v46 = vpack.c.bf16 %v879_v16, %v4920_v12  ;;  %v899_v42 = vpack.c.bf16 %v4894_v61, %v4886_v57  ;;  %v3845_v57 = vld [vmem:[%s4666_s16 + $0x4] sm:$0xf]  ;;  %v923_v61 = vpack.c.bf16 %v4900_v0, %v4892_v60  ;;  %v5787_v12 = vld [vmem:[#allocation30_spill] sm:$0xff]  ;;  %v3359_v54 = vld [vmem:[%s4666_s16 + $0x88] sm:$0xf] }
 0x1ca   : > { %1764 = vmatpush.bf16.msrb.mxu1 %v901_v33  ;;  %1933 = vmatpush.bf16.msrb.mxu2 %v909_v34  ;;  %v3292_v59 = vor.u32 %v3845_v57, %v3289_v62  ;;  %v5782_v60 = vld [vmem:[#allocation36_spill] sm:$0xff]  ;;  %v921_v14 = vpack.c.bf16 %v5788_v13, %v5787_v12  ;;  %v3296_v15 = vor.u32 %v3848_v41, %v3295_v7  ;;  %v3854_v33 = vld [vmem:[%s4666_s16 + $0x4c] sm:$0xf]  ;;  %v3329_v34 = vld [vmem:[%s4666_s16 + $0x58] sm:$0xf0] }
 0x1cb   : > { %v914_v0 = vpack.c.bf16 %v5782_v60, %v5781_v3  ;;  %v3300_v16 = vor.u32 %v3846_v45, %v3297_v8  ;;  %v3353_v62 = vld [vmem:[%s4666_s16 + $0x90] sm:$0xf0]  ;;  %v3352_v53 = vor.u32 %v3863_v49, %v3351_v1  ;;  %v3367_v5 = vld [vmem:[%s4666_s16 + $0xa0] sm:$0xf]  ;;  %v3375_v45 = vld [vmem:[%s4666_s16 + $0xa8] sm:$0xf]  ;;  %v3380_v12 = vor.u32 %v3866_v9, %v3377_v10 }
 0x1cc   : > { %v3369_v4 = vld [vmem:[%s4666_s16 + $0xb0] sm:$0xf0]  ;;  %v3868_v8 = vld [vmem:[%s4666_s16 + $0xb4] sm:$0xf0]  ;;  %v3869_v13 = vld [vmem:[%s4666_s16 + $0xc4] sm:$0xf] }
 0x1cd   : > { %2101 = vmatpush.bf16.msrb.mxu3 %v918_v25  ;;  %2270 = vmatpush.bf16.msrb.mxu0 %v926_v26  ;;  %v3328_v25 = vor.u32 %v3856_v40, %v3327_v39  ;;  %v3332_v26 = vor.u32 %v3854_v33, %v3329_v34  ;;  %v3876_v36 = vld [vmem:[%s4666_s16 + $0xf4] sm:$0xf0]  ;;  %v3877_v33 = vld [vmem:[%s4666_s16 + $0x104] sm:$0xf]  ;;  %v3417_v34 = vld [vmem:[%s4666_s16 + $0x110] sm:$0xf0] }
 0x1ce   : > { %1765 = vmatpush.bf16.msrb.mxu1 %v900_v44  ;;  %1934 = vmatpush.bf16.msrb.mxu2 %v908_v43  ;;  %v3857_v44 = vld [vmem:[%s4666_s16 + $0x64] sm:$0xf]  ;;  %v3337_v43 = vld [vmem:[%s4666_s16 + $0x70] sm:$0xf0]  ;;  %v3408_v39 = vor.u32 %v3876_v36, %v3407_v35 }
 0x1cf   : > { %v3433_v49 = vld [vmem:[%s4666_s16 + $0x130] sm:$0xf0] }
 0x1d1   : > { %2102 = vmatpush.bf16.msrb.mxu3 %v917_v47  ;;  %2271 = vmatpush.bf16.msrb.mxu0 %v925_v46  ;;  %v3335_v47 = vld [vmem:[%s4666_s16 + $0x60] sm:$0xf]  ;;  %v3859_v46 = vld [vmem:[%s4666_s16 + $0x6c] sm:$0xf0] }
 0x1d2   : > { %1766 = vmatpush.bf16.msrb.mxu1 %v899_v42  ;;  %1935 = vmatpush.bf16.msrb.mxu2 %v907_v48  ;;  %v3340_v42 = vor.u32 %v3857_v44, %v3337_v43  ;;  %v3336_v48 = vor.u32 %v3859_v46, %v3335_v47  ;;  %v3420_v44 = vor.u32 %v3877_v33, %v3417_v34  ;;  %v3423_v46 = vld [vmem:[%s4666_s16 + $0x108] sm:$0xf]  ;;  %v3457_v33 = vld [vmem:[%s4666_s16 + $0x158] sm:$0xf0] }
 0x1d5   : > { %2103 = vmatpush.bf16.msrb.mxu3 %v916_v51  ;;  %2272 = vmatpush.bf16.msrb.mxu0 %v924_v52  ;;  %v3343_v51 = vld [vmem:[%s4666_s16 + $0x68] sm:$0xf]  ;;  %v3860_v52 = vld [vmem:[%s4666_s16 + $0x74] sm:$0xf0] }
 0x1d6   : > { %1767 = vmatpush.bf16.msrb.mxu1 %v898_v55  ;;  %1936 = vmatpush.bf16.msrb.mxu2 %v906_v56  ;;  %v3858_v55 = vld [vmem:[%s4666_s16 + $0x6c] sm:$0xf]  ;;  %v3345_v56 = vld [vmem:[%s4666_s16 + $0x78] sm:$0xf0]  ;;  %v3344_v57 = vor.u32 %v3860_v52, %v3343_v51 }
 0x1d7   : > { %v3425_v51 = vld [vmem:[%s4666_s16 + $0x118] sm:$0xf0] }
 0x1d9   : > { %2104 = vmatpush.bf16.msrb.mxu3 %v915_v58  ;;  %2273 = vmatpush.bf16.msrb.mxu0 %v923_v61  ;;  %v3348_v58 = vor.u32 %v3858_v55, %v3345_v56  ;;  %v3861_v61 = vld [vmem:[%s4666_s16 + $0x84] sm:$0xf] }
 0x1da   : > { %1768 = vmatpush.bf16.msrb.mxu1 %v897_v50  ;;  %1937 = vmatpush.bf16.msrb.mxu2 %v905_v2  ;;  %v3356_v50 = vor.u32 %v3861_v61, %v3353_v62  ;;  %v3864_v2 = vld [vmem:[%s4666_s16 + $0x94] sm:$0xf0]  ;;  %v3881_v62 = vld [vmem:[%s4666_s16 + $0x124] sm:$0xf] }
 0x1db   : > { %v3360_v3 = vor.u32 %v3864_v2, %v3359_v54  ;;  %v929_v2 = vld [vmem:[%s4691_s2] sm:$0xff] }
 0x1dd   : > { %2105 = vmatpush.bf16.msrb.mxu3 %v914_v0  ;;  %2274 = vmatpush.bf16.msrb.mxu0 %v922_v6  ;;  %v3865_v0 = vld [vmem:[%s4666_s16 + $0xa4] sm:$0xf]  ;;  %v3867_v6 = vld [vmem:[%s4666_s16 + $0xac] sm:$0xf0] }
 0x1de   : > { %1938 = vmatmul.bf16.vlgmr.msrb.gmra.mxu2 %v3292_v59  ;;  %1769 = vmatmul.bf16.vlgmr.msrb.gmra.mxu1 %v3288_v63  ;;  %v3862_v59 = vld [vmem:[%s4666_s16 + $0x8c] sm:$0xf]  ;;  %v3361_v63 = vld [vmem:[%s4666_s16 + $0x98] sm:$0xf0]  ;;  %v3372_v7 = vor.u32 %v3865_v0, %v3369_v4  ;;  %v3368_v41 = vor.u32 %v3867_v6, %v3367_v5  ;;  %v3439_v6 = vld [vmem:[%s4666_s16 + $0x128] sm:$0xf] }
 0x1df   : > { %v3364_v60 = vor.u32 %v3862_v59, %v3361_v63 }
 0x1e1   : > { %2106 = vmatpush.bf16.msrb.mxu3 %v913_v11  ;;  %2275 = vmatpush.bf16.msrb.mxu0 %v921_v14  ;;  %v3376_v11 = vor.u32 %v3868_v8, %v3375_v45  ;;  %v3385_v14 = vld [vmem:[%s4666_s16 + $0xd0] sm:$0xf0]  ;;  %v3441_v45 = vld [vmem:[%s4666_s16 + $0x138] sm:$0xf0] }
 0x1e2   : > { %v3388_v17 = vor.u32 %v3869_v13, %v3385_v14  ;;  %v930_v13 = vld [vmem:[%s4691_s2 + $0x8] sm:$0xff] }
 0x1e4   : > { %2107 = vmatmul.bf16.vlgmr.msrb.gmra.mxu3 %v3296_v15  ;;  %2276 = vmatmul.bf16.vlgmr.msrb.gmra.mxu0 %v3300_v16  ;;  %v3383_v15 = vld [vmem:[%s4666_s16 + $0xc0] sm:$0xf]  ;;  %v3871_v16 = vld [vmem:[%s4666_s16 + $0xcc] sm:$0xf0] }
 0x1e5   : > { %v3384_v18 = vor.u32 %v3871_v16, %v3383_v15 }
 0x1ee   : > { %1943 = vmatmul.bf16.gmra.mxu2 %v3308_v21  ;;  %1774 = vmatmul.bf16.gmra.mxu1 %v3304_v22  ;;  %v3870_v21 = vld [vmem:[%s4666_s16 + $0xcc] sm:$0xf]  ;;  %v3393_v22 = vld [vmem:[%s4666_s16 + $0xd8] sm:$0xf0] }
 0x1ef   : > { %v3396_v24 = vor.u32 %v3870_v21, %v3393_v22  ;;  %v3449_v22 = vld [vmem:[%s4666_s16 + $0x150] sm:$0xf0] }
 0x1f4   : > { %2112 = vmatmul.bf16.gmra.mxu3 %v3312_v29  ;;  %2281 = vmatmul.bf16.gmra.mxu0 %v3316_v30  ;;  %v3399_v29 = vld [vmem:[%s4666_s16 + $0xe0] sm:$0xf]  ;;  %v3875_v30 = vld [vmem:[%s4666_s16 + $0xec] sm:$0xf0] }
 0x1f5   : > { %v3400_v32 = vor.u32 %v3875_v30, %v3399_v29 }
 0x1fe   : > { %1948 = vmatmul.bf16.gmra.mxu2 %v3324_v37  ;;  %1779 = vmatmul.bf16.gmra.mxu1 %v3320_v38  ;;  %v3874_v37 = vld [vmem:[%s4666_s16 + $0xec] sm:$0xf]  ;;  %v3409_v38 = vld [vmem:[%s4666_s16 + $0xf8] sm:$0xf0] }
 0x1ff   : > { %v3412_v40 = vor.u32 %v3874_v37, %v3409_v38  ;;  %v3455_v38 = vld [vmem:[%s4666_s16 + $0x148] sm:$0xf] }
 0x204   : > { %2117 = vmatmul.bf16.gmra.mxu3 %v3328_v25  ;;  %2286 = vmatmul.bf16.gmra.mxu0 %v3332_v26  ;;  %v3415_v25 = vld [vmem:[%s4666_s16 + $0x100] sm:$0xf]  ;;  %v3879_v26 = vld [vmem:[%s4666_s16 + $0x10c] sm:$0xf0] }
 0x205   : > { %v3416_v43 = vor.u32 %v3879_v26, %v3415_v25 }
 0x20e   : > { %1953 = vmatmul.bf16.gmra.mxu2 %v3340_v42  ;;  %1784 = vmatmul.bf16.gmra.mxu1 %v3336_v48  ;;  %v3880_v42 = vld [vmem:[%s4666_s16 + $0x114] sm:$0xf0]  ;;  %v3878_v48 = vld [vmem:[%s4666_s16 + $0x10c] sm:$0xf] }
 0x20f   : > { %v3424_v52 = vor.u32 %v3880_v42, %v3423_v46  ;;  %v3428_v55 = vor.u32 %v3878_v48, %v3425_v51 }
 0x214   : > { %2122 = vmatmul.bf16.gmra.mxu3 %v3344_v57  ;;  %2291 = vmatmul.bf16.gmra.mxu0 %v3348_v58 }
 0x21e   : > { %1958 = vmatmul.bf16.gmra.mxu2 %v3356_v50  ;;  %1789 = vmatmul.bf16.gmra.mxu1 %v3352_v53  ;;  %v3431_v50 = vld [vmem:[%s4666_s16 + $0x120] sm:$0xf]  ;;  %v3883_v53 = vld [vmem:[%s4666_s16 + $0x12c] sm:$0xf0] }
 0x21f   : > { %v3432_v0 = vor.u32 %v3883_v53, %v3431_v50 }
 0x224   : > { %2127 = vmatmul.bf16.gmra.mxu3 %v3360_v3  ;;  %2296 = vmatmul.bf16.gmra.mxu0 %v3364_v60  ;;  %v3436_v60 = vor.u32 %v3881_v62, %v3433_v49  ;;  %v3891_v62 = vld [vmem:[%s4666_s16 + $0x16c] sm:$0xf0]  ;;  %v933_v49 = vld [vmem:[%s4691_s2 + $0x20] sm:$0xff] }
 0x22e   : > { %1963 = vmatmul.bf16.gmra.mxu2 %v3372_v7  ;;  %1794 = vmatmul.bf16.gmra.mxu1 %v3368_v41  ;;  %v3884_v7 = vld [vmem:[%s4666_s16 + $0x134] sm:$0xf0]  ;;  %v3882_v41 = vld [vmem:[%s4666_s16 + $0x12c] sm:$0xf] }
 0x234   : > { %2132 = vmatmul.bf16.gmra.mxu3 %v3376_v11  ;;  %2301 = vmatmul.bf16.gmra.mxu0 %v3380_v12  ;;  %v3440_v11 = vor.u32 %v3884_v7, %v3439_v6  ;;  %v3444_v12 = vor.u32 %v3882_v41, %v3441_v45 }
 0x23e   : > { %1968 = vmatmul.bf16.gmra.mxu2 %v3388_v17  ;;  %1799 = vmatmul.bf16.gmra.mxu1 %v3384_v18 }
 0x244   : > { %2137 = vmatmul.bf16.gmra.mxu3 %v3392_v23  ;;  %2306 = vmatmul.bf16.gmra.mxu0 %v3396_v24  ;;  %v3447_v23 = vld [vmem:[%s4666_s16 + $0x140] sm:$0xf]  ;;  %v3887_v24 = vld [vmem:[%s4666_s16 + $0x14c] sm:$0xf0] }
 0x245   : > { %v3448_v35 = vor.u32 %v3887_v24, %v3447_v23 }
 0x24e   : > { %1973 = vmatmul.bf16.gmra.mxu2 %v3404_v31  ;;  %1804 = vmatmul.bf16.gmra.mxu1 %v3400_v32  ;;  %v3452_v32 = vor.u32 %v3885_v20, %v3449_v22  ;;  %v3895_v20 = vld [vmem:[%s4666_s16 + $0x18c] sm:$0xf0] }
 0x24f   : > { %v935_v22 = vld [vmem:[%s4691_s2 + $0x30] sm:$0xff] }
 0x254   : > { %2142 = vmatmul.bf16.gmra.mxu3 %v3408_v39  ;;  %2311 = vmatmul.bf16.gmra.mxu0 %v3412_v40  ;;  %v3888_v39 = vld [vmem:[%s4666_s16 + $0x154] sm:$0xf0]  ;;  %v3886_v40 = vld [vmem:[%s4666_s16 + $0x14c] sm:$0xf] }
 0x25b   : > { %v1770_v47 = vpop.f32.mrf.mxu1 }
 0x25e   : > { %1978 = vmatmul.bf16.gmra.mxu2 %v3420_v44  ;;  %1809 = vmatmul.bf16.gmra.mxu1 %v3416_v43  ;;  %v3456_v44 = vor.u32 %v3888_v39, %v3455_v38  ;;  %v3460_v43 = vor.u32 %v3886_v40, %v3457_v33 }
 0x261   : > { %v1939_v56 = vpop.f32.mrf.mxu2  ;;  %v2277_v57 = vpop.f32.mrf.mxu0 }
 0x262   : > { %v1940_v61 = vadd.f32 %v1939_v56, %v1770_v47  ;;  %v932_v47 = vld [vmem:[%s4691_s2 + $0x18] sm:$0xff]  ;;  %v3889_v56 = vld [vmem:[%s4666_s16 + $0x164] sm:$0xf] }
 0x263   : > { %v1772_v58 = vpop.f32.mrf.mxu1 }
 0x264   : > { %2147 = vmatmul.bf16.gmra.mxu3 %v3424_v52  ;;  %2316 = vmatmul.bf16.gmra.mxu0 %v3428_v55 }
 0x267   : > { %v2108_v1 = vpop.f32.mrf.mxu3 }
 0x268   : > { %v2109_v54 = vadd.f32 %v2108_v1, %v1940_v61  ;;  %v3463_v61 = vld [vmem:[%s4666_s16 + $0x160] sm:$0xf] }
 0x269   : > { %v1941_v59 = vpop.f32.mrf.mxu2  ;;  %v2279_v63 = vpop.f32.mrf.mxu0 }
 0x26a   : > { %v2278_v3 = vadd.f32 %v2277_v57, %v2109_v54  ;;  %v1942_v8 = vadd.f32 %v1941_v59, %v1772_v58  ;;  %v3465_v58 = vld [vmem:[%s4666_s16 + $0x170] sm:$0xf0]  ;;  %v3464_v59 = vor.u32 %v3891_v62, %v3463_v61 }
 0x26b   : > { %v1775_v4 = vpop.f32.mrf.mxu1 }
 0x26c   : > { %v2437_v5 = vadd.f32 %v2278_v3, %v929_v2  ;;  %v3468_v2 = vor.u32 %v3889_v56, %v3465_v58  ;;  %v3899_v56 = vld [vmem:[%s4666_s16 + $0x1ac] sm:$0xf0]  ;;  %v937_v58 = vld [vmem:[%s4691_s2 + $0x40] sm:$0xff] }
 0x26e   : > { %2501 = vst [vmem:[%s4691_s2] sm:$0xff] %v2437_v5  ;;  %1983 = vmatmul.bf16.gmra.mxu2 %v3436_v60  ;;  %1814 = vmatmul.bf16.gmra.mxu1 %v3432_v0  ;;  %v3471_v60 = vld [vmem:[%s4666_s16 + $0x168] sm:$0xf]  ;;  %v3892_v0 = vld [vmem:[%s4666_s16 + $0x174] sm:$0xf0]  ;;  %v3473_v5 = vld [vmem:[%s4666_s16 + $0x178] sm:$0xf0] }
 0x26f   : > { %v2110_v9 = vpop.f32.mrf.mxu3  ;;  %v3472_v45 = vor.u32 %v3892_v0, %v3471_v60 }
 0x270   : > { %v2111_v10 = vadd.f32 %v2110_v9, %v1942_v8  ;;  %v934_v9 = vld [vmem:[%s4691_s2 + $0x28] sm:$0xff] }
 0x271   : > { %v1944_v14 = vpop.f32.mrf.mxu2  ;;  %v2282_v15 = vpop.f32.mrf.mxu0 }
 0x272   : > { %v2280_v16 = vadd.f32 %v2279_v63, %v2111_v10  ;;  %v1945_v19 = vadd.f32 %v1944_v14, %v1775_v4  ;;  %v3890_v4 = vld [vmem:[%s4666_s16 + $0x16c] sm:$0xf] }
 0x273   : > { %v1777_v17 = vpop.f32.mrf.mxu1  ;;  %v3476_v8 = vor.u32 %v3890_v4, %v3473_v5 }
 0x274   : > { %v2438_v18 = vadd.f32 %v2280_v16, %v930_v13  ;;  %2152 = vmatmul.bf16.gmra.mxu3 %v3440_v11  ;;  %2321 = vmatmul.bf16.gmra.mxu0 %v3444_v12  ;;  %v3893_v16 = vld [vmem:[%s4666_s16 + $0x184] sm:$0xf] }
 0x276   : > { %2502 = vst [vmem:[%s4691_s2 + $0x8] sm:$0xff] %v2438_v18  ;;  %v3481_v18 = vld [vmem:[%s4666_s16 + $0x190] sm:$0xf0] }
 0x277   : > { %v2113_v21 = vpop.f32.mrf.mxu3 }
 0x278   : > { %v2114_v27 = vadd.f32 %v2113_v21, %v1945_v19  ;;  %v3479_v19 = vld [vmem:[%s4666_s16 + $0x180] sm:$0xf] }
 0x279   : > { %v1946_v29 = vpop.f32.mrf.mxu2  ;;  %v2284_v30 = vpop.f32.mrf.mxu0 }
 0x27a   : > { %v2283_v31 = vadd.f32 %v2282_v15, %v2114_v27  ;;  %v1947_v34 = vadd.f32 %v1946_v29, %v1777_v17  ;;  %v3480_v29 = vor.u32 %v3895_v20, %v3479_v19 }
 0x27b   : > { %v1780_v36 = vpop.f32.mrf.mxu1 }
 0x27c   : > { %v2439_v37 = vadd.f32 %v2283_v31, %v931_v28  ;;  %v3484_v28 = vor.u32 %v3893_v16, %v3481_v18  ;;  %v3903_v16 = vld [vmem:[%s4666_s16 + $0x1cc] sm:$0xf0] }
 0x27d   : > { %v939_v18 = vld [vmem:[%s4691_s2 + $0x50] sm:$0xff] }
 0x27e   : > { %2503 = vst [vmem:[%s4691_s2 + $0x10] sm:$0xff] %v2439_v37  ;;  %1988 = vmatmul.bf16.gmra.mxu2 %v3452_v32  ;;  %1819 = vmatmul.bf16.gmra.mxu1 %v3448_v35  ;;  %v3487_v32 = vld [vmem:[%s4666_s16 + $0x188] sm:$0xf]  ;;  %v3896_v35 = vld [vmem:[%s4666_s16 + $0x194] sm:$0xf0] }
 0x27f   : > { %v2115_v25 = vpop.f32.mrf.mxu3  ;;  %v3489_v37 = vld [vmem:[%s4666_s16 + $0x198] sm:$0xf0]  ;;  %v3488_v33 = vor.u32 %v3896_v35, %v3487_v32 }
 0x280   : > { %v2116_v26 = vadd.f32 %v2115_v25, %v1947_v34  ;;  %v936_v25 = vld [vmem:[%s4691_s2 + $0x38] sm:$0xff] }
 0x281   : > { %v1949_v46 = vpop.f32.mrf.mxu2  ;;  %v2287_v42 = vpop.f32.mrf.mxu0 }
 0x282   : > { %v2285_v48 = vadd.f32 %v2284_v30, %v2116_v26  ;;  %v1950_v55 = vadd.f32 %v1949_v46, %v1780_v36  ;;  %v3894_v36 = vld [vmem:[%s4666_s16 + $0x18c] sm:$0xf] }
 0x283   : > { %v1782_v51 = vpop.f32.mrf.mxu1  ;;  %v3492_v34 = vor.u32 %v3894_v36, %v3489_v37 }
 0x284   : > { %v2440_v52 = vadd.f32 %v2285_v48, %v932_v47  ;;  %2157 = vmatmul.bf16.gmra.mxu3 %v3456_v44  ;;  %2326 = vmatmul.bf16.gmra.mxu0 %v3460_v43  ;;  %v3897_v48 = vld [vmem:[%s4666_s16 + $0x1a4] sm:$0xf] }
 0x286   : > { %2504 = vst [vmem:[%s4691_s2 + $0x18] sm:$0xff] %v2440_v52  ;;  %v3497_v52 = vld [vmem:[%s4666_s16 + $0x1b0] sm:$0xf0] }
 0x287   : > { %v2118_v57 = vpop.f32.mrf.mxu3 }
 0x288   : > { %v2119_v1 = vadd.f32 %v2118_v57, %v1950_v55  ;;  %v3495_v55 = vld [vmem:[%s4666_s16 + $0x1a0] sm:$0xf] }
 0x289   : > { %v1951_v50 = vpop.f32.mrf.mxu2  ;;  %v2289_v53 = vpop.f32.mrf.mxu0 }
 0x28a   : > { %v2288_v54 = vadd.f32 %v2287_v42, %v2119_v1  ;;  %v1952_v6 = vadd.f32 %v1951_v50, %v1782_v51  ;;  %v3496_v50 = vor.u32 %v3899_v56, %v3495_v55 }
 0x28b   : > { %v1785_v63 = vpop.f32.mrf.mxu1 }
 0x28c   : > { %v2441_v3 = vadd.f32 %v2288_v54, %v933_v49  ;;  %v3500_v49 = vor.u32 %v3897_v48, %v3497_v52  ;;  %v3907_v48 = vld [vmem:[%s4666_s16 + $0x1ec] sm:$0xf0]  ;;  %v941_v52 = vld [vmem:[%s4691_s2 + $0x60] sm:$0xff] }
 0x28e   : > { %2505 = vst [vmem:[%s4691_s2 + $0x20] sm:$0xff] %v2441_v3  ;;  %1993 = vmatmul.bf16.gmra.mxu2 %v3468_v2  ;;  %1824 = vmatmul.bf16.gmra.mxu1 %v3464_v59  ;;  %v3503_v2 = vld [vmem:[%s4666_s16 + $0x1a8] sm:$0xf]  ;;  %v3900_v59 = vld [vmem:[%s4666_s16 + $0x1b4] sm:$0xf0] }
 0x28f   : > { %v2120_v7 = vpop.f32.mrf.mxu3  ;;  %v3505_v3 = vld [vmem:[%s4666_s16 + $0x1b8] sm:$0xf0]  ;;  %v3504_v5 = vor.u32 %v3900_v59, %v3503_v2 }
 0x290   : > { %v2121_v41 = vadd.f32 %v2120_v7, %v1952_v6  ;;  %v938_v7 = vld [vmem:[%s4691_s2 + $0x48] sm:$0xff] }
 0x291   : > { %v1954_v10 = vpop.f32.mrf.mxu2  ;;  %v2292_v11 = vpop.f32.mrf.mxu0 }
 0x292   : > { %v2290_v12 = vadd.f32 %v2289_v53, %v2121_v41  ;;  %v1955_v15 = vadd.f32 %v1954_v10, %v1785_v63  ;;  %v3898_v63 = vld [vmem:[%s4666_s16 + $0x1ac] sm:$0xf] }
 0x293   : > { %v1787_v13 = vpop.f32.mrf.mxu1  ;;  %v3508_v6 = vor.u32 %v3898_v63, %v3505_v3 }
 0x294   : > { %v2442_v14 = vadd.f32 %v2290_v12, %v934_v9  ;;  %2162 = vmatmul.bf16.gmra.mxu3 %v3472_v45  ;;  %2331 = vmatmul.bf16.gmra.mxu0 %v3476_v8  ;;  %v3901_v12 = vld [vmem:[%s4666_s16 + $0x1c4] sm:$0xf] }
 0x296   : > { %2506 = vst [vmem:[%s4691_s2 + $0x28] sm:$0xff] %v2442_v14  ;;  %v3513_v14 = vld [vmem:[%s4666_s16 + $0x1d0] sm:$0xf0] }
 0x297   : > { %v2123_v17 = vpop.f32.mrf.mxu3 }
 0x298   : > { %v2124_v21 = vadd.f32 %v2123_v17, %v1955_v15  ;;  %v3511_v15 = vld [vmem:[%s4666_s16 + $0x1c0] sm:$0xf] }
 0x299   : > { %v1956_v23 = vpop.f32.mrf.mxu2  ;;  %v2294_v24 = vpop.f32.mrf.mxu0 }
 0x29a   : > { %v2293_v27 = vadd.f32 %v2292_v11, %v2124_v21  ;;  %v1957_v38 = vadd.f32 %v1956_v23, %v1787_v13  ;;  %v3512_v23 = vor.u32 %v3903_v16, %v3511_v15 }
 0x29b   : > { %v1790_v30 = vpop.f32.mrf.mxu1 }
 0x29c   : > { %v2443_v31 = vadd.f32 %v2293_v27, %v935_v22  ;;  %v3516_v22 = vor.u32 %v3901_v12, %v3513_v14  ;;  %v3911_v12 = vld [vmem:[%s4666_s16 + $0x20c] sm:$0xf0] }
 0x29d   : > { %v943_v14 = vld [vmem:[%s4691_s2 + $0x70] sm:$0xff] }
 0x29e   : > { %2507 = vst [vmem:[%s4691_s2 + $0x30] sm:$0xff] %v2443_v31  ;;  %1998 = vmatmul.bf16.gmra.mxu2 %v3484_v28  ;;  %1829 = vmatmul.bf16.gmra.mxu1 %v3480_v29  ;;  %v3519_v28 = vld [vmem:[%s4666_s16 + $0x1c8] sm:$0xf]  ;;  %v3904_v29 = vld [vmem:[%s4666_s16 + $0x1d4] sm:$0xf0] }
 0x29f   : > { %v2125_v39 = vpop.f32.mrf.mxu3  ;;  %v3521_v31 = vld [vmem:[%s4666_s16 + $0x1d8] sm:$0xf0]  ;;  %v3520_v37 = vor.u32 %v3904_v29, %v3519_v28 }
 0x2a0   : > { %v2126_v40 = vadd.f32 %v2125_v39, %v1957_v38  ;;  %v940_v39 = vld [vmem:[%s4691_s2 + $0x58] sm:$0xff] }
 0x2a1   : > { %v1959_v26 = vpop.f32.mrf.mxu2  ;;  %v2297_v44 = vpop.f32.mrf.mxu0 }
 0x2a2   : > { %v2295_v43 = vadd.f32 %v2294_v24, %v2126_v40  ;;  %v1960_v42 = vadd.f32 %v1959_v26, %v1790_v30  ;;  %v3902_v30 = vld [vmem:[%s4666_s16 + $0x1cc] sm:$0xf] }
 0x2a3   : > { %v1792_v47 = vpop.f32.mrf.mxu1  ;;  %v3524_v38 = vor.u32 %v3902_v30, %v3521_v31 }
 0x2a4   : > { %v2444_v46 = vadd.f32 %v2295_v43, %v936_v25  ;;  %2167 = vmatmul.bf16.gmra.mxu3 %v3488_v33  ;;  %2336 = vmatmul.bf16.gmra.mxu0 %v3492_v34  ;;  %v3905_v43 = vld [vmem:[%s4666_s16 + $0x1e4] sm:$0xf] }
 0x2a6   : > { %2508 = vst [vmem:[%s4691_s2 + $0x38] sm:$0xff] %v2444_v46  ;;  %v3529_v46 = vld [vmem:[%s4666_s16 + $0x1f0] sm:$0xf0] }
 0x2a7   : > { %v2128_v51 = vpop.f32.mrf.mxu3 }
 0x2a8   : > { %v2129_v57 = vadd.f32 %v2128_v51, %v1960_v42  ;;  %v3527_v42 = vld [vmem:[%s4666_s16 + $0x1e0] sm:$0xf] }
 0x2a9   : > { %v1961_v61 = vpop.f32.mrf.mxu2  ;;  %v2299_v62 = vpop.f32.mrf.mxu0 }
 0x2aa   : > { %v2298_v1 = vadd.f32 %v2297_v44, %v2129_v57  ;;  %v1962_v60 = vadd.f32 %v1961_v61, %v1792_v47  ;;  %v3528_v61 = vor.u32 %v3907_v48, %v3527_v42 }
 0x2ab   : > { %v1795_v53 = vpop.f32.mrf.mxu1 }
 0x2ac   : > { %v2445_v54 = vadd.f32 %v2298_v1, %v937_v58  ;;  %v3532_v58 = vor.u32 %v3905_v43, %v3529_v46  ;;  %v3915_v43 = vld [vmem:[%s4666_s16 + $0x22c] sm:$0xf0]  ;;  %v945_v46 = vld [vmem:[%s4691_s2 + $0x80] sm:$0xff] }
 0x2ae   : > { %2509 = vst [vmem:[%s4691_s2 + $0x40] sm:$0xff] %v2445_v54  ;;  %2003 = vmatmul.bf16.gmra.mxu2 %v3500_v49  ;;  %1834 = vmatmul.bf16.gmra.mxu1 %v3496_v50  ;;  %v3535_v49 = vld [vmem:[%s4666_s16 + $0x1e8] sm:$0xf]  ;;  %v3908_v50 = vld [vmem:[%s4666_s16 + $0x1f4] sm:$0xf0] }
 0x2af   : > { %v2130_v0 = vpop.f32.mrf.mxu3  ;;  %v3537_v54 = vld [vmem:[%s4666_s16 + $0x1f8] sm:$0xf0]  ;;  %v3536_v3 = vor.u32 %v3908_v50, %v3535_v49 }
 0x2b0   : > { %v2131_v4 = vadd.f32 %v2130_v0, %v1962_v60  ;;  %v942_v0 = vld [vmem:[%s4691_s2 + $0x68] sm:$0xff] }
 0x2b1   : > { %v1964_v41 = vpop.f32.mrf.mxu2  ;;  %v2302_v45 = vpop.f32.mrf.mxu0 }
 0x2b2   : > { %v2300_v8 = vadd.f32 %v2299_v62, %v2131_v4  ;;  %v1965_v11 = vadd.f32 %v1964_v41, %v1795_v53  ;;  %v3906_v53 = vld [vmem:[%s4666_s16 + $0x1ec] sm:$0xf] }
 0x2b3   : > { %v1797_v9 = vpop.f32.mrf.mxu1  ;;  %v3540_v60 = vor.u32 %v3906_v53, %v3537_v54 }
 0x2b4   : > { %v2446_v10 = vadd.f32 %v2300_v8, %v938_v7  ;;  %2172 = vmatmul.bf16.gmra.mxu3 %v3504_v5  ;;  %2341 = vmatmul.bf16.gmra.mxu0 %v3508_v6  ;;  %v3909_v8 = vld [vmem:[%s4666_s16 + $0x204] sm:$0xf] }
 0x2b6   : > { %2510 = vst [vmem:[%s4691_s2 + $0x48] sm:$0xff] %v2446_v10  ;;  %v3545_v10 = vld [vmem:[%s4666_s16 + $0x210] sm:$0xf0] }
 0x2b7   : > { %v2133_v13 = vpop.f32.mrf.mxu3 }
 0x2b8   : > { %v2134_v17 = vadd.f32 %v2133_v13, %v1965_v11  ;;  %v3543_v11 = vld [vmem:[%s4666_s16 + $0x200] sm:$0xf] }
 0x2b9   : > { %v1966_v19 = vpop.f32.mrf.mxu2  ;;  %v2304_v20 = vpop.f32.mrf.mxu0 }
 0x2ba   : > { %v2303_v21 = vadd.f32 %v2302_v45, %v2134_v17  ;;  %v1967_v32 = vadd.f32 %v1966_v19, %v1797_v9  ;;  %v3544_v19 = vor.u32 %v3911_v12, %v3543_v11 }
 0x2bb   : > { %v1800_v24 = vpop.f32.mrf.mxu1 }
 0x2bc   : > { %v2447_v27 = vadd.f32 %v2303_v21, %v939_v18  ;;  %v3548_v18 = vor.u32 %v3909_v8, %v3545_v10  ;;  %v3919_v8 = vld [vmem:[%s4666_s16 + $0x24c] sm:$0xf0] }
 0x2bd   : > { %v947_v10 = vld [vmem:[%s4691_s2 + $0x90] sm:$0xff] }
 0x2be   : > { %2511 = vst [vmem:[%s4691_s2 + $0x50] sm:$0xff] %v2447_v27  ;;  %2008 = vmatmul.bf16.gmra.mxu2 %v3516_v22  ;;  %1839 = vmatmul.bf16.gmra.mxu1 %v3512_v23  ;;  %v3551_v22 = vld [vmem:[%s4666_s16 + $0x208] sm:$0xf]  ;;  %v3912_v23 = vld [vmem:[%s4666_s16 + $0x214] sm:$0xf0] }
 0x2bf   : > { %v2135_v35 = vpop.f32.mrf.mxu3  ;;  %v3553_v27 = vld [vmem:[%s4666_s16 + $0x218] sm:$0xf0]  ;;  %v3552_v31 = vor.u32 %v3912_v23, %v3551_v22 }
 0x2c0   : > { %v2136_v36 = vadd.f32 %v2135_v35, %v1967_v32  ;;  %v944_v35 = vld [vmem:[%s4691_s2 + $0x78] sm:$0xff] }
 0x2c1   : > { %v1969_v40 = vpop.f32.mrf.mxu2  ;;  %v2307_v33 = vpop.f32.mrf.mxu0 }
 0x2c2   : > { %v2305_v34 = vadd.f32 %v2304_v20, %v2136_v36  ;;  %v1970_v44 = vadd.f32 %v1969_v40, %v1800_v24  ;;  %v3910_v24 = vld [vmem:[%s4666_s16 + $0x20c] sm:$0xf] }
 0x2c3   : > { %v1802_v25 = vpop.f32.mrf.mxu1  ;;  %v3556_v32 = vor.u32 %v3910_v24, %v3553_v27 }
 0x2c4   : > { %v2448_v26 = vadd.f32 %v2305_v34, %v940_v39  ;;  %2177 = vmatmul.bf16.gmra.mxu3 %v3520_v37  ;;  %2346 = vmatmul.bf16.gmra.mxu0 %v3524_v38  ;;  %v3913_v34 = vld [vmem:[%s4666_s16 + $0x224] sm:$0xf] }
 0x2c6   : > { %2512 = vst [vmem:[%s4691_s2 + $0x58] sm:$0xff] %v2448_v26  ;;  %v3561_v26 = vld [vmem:[%s4666_s16 + $0x230] sm:$0xf0] }
 0x2c7   : > { %v2138_v47 = vpop.f32.mrf.mxu3 }
 0x2c8   : > { %v2139_v51 = vadd.f32 %v2138_v47, %v1970_v44  ;;  %v3559_v44 = vld [vmem:[%s4666_s16 + $0x220] sm:$0xf] }
 0x2c9   : > { %v1971_v55 = vpop.f32.mrf.mxu2  ;;  %v2309_v56 = vpop.f32.mrf.mxu0 }
 0x2ca   : > { %v2308_v57 = vadd.f32 %v2307_v33, %v2139_v51  ;;  %v1972_v2 = vadd.f32 %v1971_v55, %v1802_v25  ;;  %v3560_v55 = vor.u32 %v3915_v43, %v3559_v44 }
 0x2cb   : > { %v1805_v62 = vpop.f32.mrf.mxu1 }
 0x2cc   : > { %v2449_v1 = vadd.f32 %v2308_v57, %v941_v52  ;;  %v3564_v52 = vor.u32 %v3913_v34, %v3561_v26  ;;  %v3923_v34 = vld [vmem:[%s4666_s16 + $0x26c] sm:$0xf0]  ;;  %v949_v26 = vld [vmem:[%s4691_s2 + $0xa0] sm:$0xff] }
 0x2ce   : > { %2513 = vst [vmem:[%s4691_s2 + $0x60] sm:$0xff] %v2449_v1  ;;  %2013 = vmatmul.bf16.gmra.mxu2 %v3532_v58  ;;  %1844 = vmatmul.bf16.gmra.mxu1 %v3528_v61  ;;  %v3567_v58 = vld [vmem:[%s4666_s16 + $0x228] sm:$0xf]  ;;  %v3916_v61 = vld [vmem:[%s4666_s16 + $0x234] sm:$0xf0] }
 0x2cf   : > { %v2140_v59 = vpop.f32.mrf.mxu3  ;;  %v3569_v1 = vld [vmem:[%s4666_s16 + $0x238] sm:$0xf0]  ;;  %v3568_v54 = vor.u32 %v3916_v61, %v3567_v58 }
 0x2d0   : > { %v2141_v63 = vadd.f32 %v2140_v59, %v1972_v2  ;;  %v946_v59 = vld [vmem:[%s4691_s2 + $0x88] sm:$0xff] }
 0x2d1   : > { %v1974_v4 = vpop.f32.mrf.mxu2  ;;  %v2312_v5 = vpop.f32.mrf.mxu0 }
 0x2d2   : > { %v2310_v6 = vadd.f32 %v2309_v56, %v2141_v63  ;;  %v1975_v45 = vadd.f32 %v1974_v4, %v1805_v62  ;;  %v3914_v62 = vld [vmem:[%s4666_s16 + $0x22c] sm:$0xf] }
 0x2d3   : > { %v1807_v7 = vpop.f32.mrf.mxu1  ;;  %v3572_v2 = vor.u32 %v3914_v62, %v3569_v1 }
 0x2d4   : > { %v2450_v41 = vadd.f32 %v2310_v6, %v942_v0  ;;  %2182 = vmatmul.bf16.gmra.mxu3 %v3536_v3  ;;  %2351 = vmatmul.bf16.gmra.mxu0 %v3540_v60  ;;  %v3917_v6 = vld [vmem:[%s4666_s16 + $0x244] sm:$0xf] }
 0x2d6   : > { %2514 = vst [vmem:[%s4691_s2 + $0x68] sm:$0xff] %v2450_v41  ;;  %v3577_v41 = vld [vmem:[%s4666_s16 + $0x250] sm:$0xf0] }
 0x2d7   : > { %v2143_v9 = vpop.f32.mrf.mxu3 }
 0x2d8   : > { %v2144_v13 = vadd.f32 %v2143_v9, %v1975_v45  ;;  %v3575_v45 = vld [vmem:[%s4666_s16 + $0x240] sm:$0xf] }
 0x2d9   : > { %v1976_v15 = vpop.f32.mrf.mxu2  ;;  %v2314_v16 = vpop.f32.mrf.mxu0 }
 0x2da   : > { %v2313_v17 = vadd.f32 %v2312_v5, %v2144_v13  ;;  %v1977_v28 = vadd.f32 %v1976_v15, %v1807_v7  ;;  %v3576_v15 = vor.u32 %v3919_v8, %v3575_v45 }
 0x2db   : > { %v1810_v20 = vpop.f32.mrf.mxu1 }
 0x2dc   : > { %v2451_v21 = vadd.f32 %v2313_v17, %v943_v14  ;;  %v3580_v14 = vor.u32 %v3917_v6, %v3577_v41  ;;  %v3927_v6 = vld [vmem:[%s4666_s16 + $0x28c] sm:$0xf0] }
 0x2dd   : > { %v951_v41 = vld [vmem:[%s4691_s2 + $0xb0] sm:$0xff] }
 0x2de   : > { %2515 = vst [vmem:[%s4691_s2 + $0x70] sm:$0xff] %v2451_v21  ;;  %2018 = vmatmul.bf16.gmra.mxu2 %v3548_v18  ;;  %1849 = vmatmul.bf16.gmra.mxu1 %v3544_v19  ;;  %v3583_v18 = vld [vmem:[%s4666_s16 + $0x248] sm:$0xf]  ;;  %v3920_v19 = vld [vmem:[%s4666_s16 + $0x254] sm:$0xf0] }
 0x2df   : > { %v2145_v29 = vpop.f32.mrf.mxu3  ;;  %v3585_v21 = vld [vmem:[%s4666_s16 + $0x258] sm:$0xf0]  ;;  %v3584_v27 = vor.u32 %v3920_v19, %v3583_v18 }
 0x2e0   : > { %v2146_v30 = vadd.f32 %v2145_v29, %v1977_v28  ;;  %v948_v29 = vld [vmem:[%s4691_s2 + $0x98] sm:$0xff] }
 0x2e1   : > { %v1979_v36 = vpop.f32.mrf.mxu2  ;;  %v2317_v37 = vpop.f32.mrf.mxu0 }
 0x2e2   : > { %v2315_v38 = vadd.f32 %v2314_v16, %v2146_v30  ;;  %v1980_v33 = vadd.f32 %v1979_v36, %v1810_v20  ;;  %v3918_v20 = vld [vmem:[%s4666_s16 + $0x24c] sm:$0xf] }
 0x2e3   : > { %v1812_v39 = vpop.f32.mrf.mxu1  ;;  %v3588_v28 = vor.u32 %v3918_v20, %v3585_v21 }
 0x2e4   : > { %v2452_v40 = vadd.f32 %v2315_v38, %v944_v35  ;;  %2187 = vmatmul.bf16.gmra.mxu3 %v3552_v31  ;;  %2356 = vmatmul.bf16.gmra.mxu0 %v3556_v32  ;;  %v3921_v38 = vld [vmem:[%s4666_s16 + $0x264] sm:$0xf] }
 0x2e6   : > { %2516 = vst [vmem:[%s4691_s2 + $0x78] sm:$0xff] %v2452_v40  ;;  %v3593_v40 = vld [vmem:[%s4666_s16 + $0x270] sm:$0xf0] }
 0x2e7   : > { %v2148_v25 = vpop.f32.mrf.mxu3 }
 0x2e8   : > { %v2149_v47 = vadd.f32 %v2148_v25, %v1980_v33  ;;  %v3591_v33 = vld [vmem:[%s4666_s16 + $0x260] sm:$0xf] }
 0x2e9   : > { %v1981_v42 = vpop.f32.mrf.mxu2  ;;  %v2319_v48 = vpop.f32.mrf.mxu0 }
 0x2ea   : > { %v2318_v51 = vadd.f32 %v2317_v37, %v2149_v47  ;;  %v1982_v49 = vadd.f32 %v1981_v42, %v1812_v39  ;;  %v3592_v42 = vor.u32 %v3923_v34, %v3591_v33 }
 0x2eb   : > { %v1815_v56 = vpop.f32.mrf.mxu1 }
 0x2ec   : > { %v2453_v57 = vadd.f32 %v2318_v51, %v945_v46  ;;  %v3596_v46 = vor.u32 %v3921_v38, %v3593_v40  ;;  %v3931_v38 = vld [vmem:[%s4666_s16 + $0x2ac] sm:$0xf0]  ;;  %v953_v40 = vld [vmem:[%s4691_s2 + $0xc0] sm:$0xff] }
 0x2ee   : > { %2517 = vst [vmem:[%s4691_s2 + $0x80] sm:$0xff] %v2453_v57  ;;  %2023 = vmatmul.bf16.gmra.mxu2 %v3564_v52  ;;  %1854 = vmatmul.bf16.gmra.mxu1 %v3560_v55  ;;  %v3599_v52 = vld [vmem:[%s4666_s16 + $0x268] sm:$0xf]  ;;  %v3924_v55 = vld [vmem:[%s4666_s16 + $0x274] sm:$0xf0] }
 0x2ef   : > { %v2150_v50 = vpop.f32.mrf.mxu3  ;;  %v3601_v57 = vld [vmem:[%s4666_s16 + $0x278] sm:$0xf0]  ;;  %v3600_v1 = vor.u32 %v3924_v55, %v3599_v52 }
 0x2f0   : > { %v2151_v53 = vadd.f32 %v2150_v50, %v1982_v49  ;;  %v950_v50 = vld [vmem:[%s4691_s2 + $0xa8] sm:$0xff] }
 0x2f1   : > { %v1984_v63 = vpop.f32.mrf.mxu2  ;;  %v2322_v3 = vpop.f32.mrf.mxu0 }
 0x2f2   : > { %v2320_v60 = vadd.f32 %v2319_v48, %v2151_v53  ;;  %v1985_v5 = vadd.f32 %v1984_v63, %v1815_v56  ;;  %v3922_v56 = vld [vmem:[%s4666_s16 + $0x26c] sm:$0xf] }
 0x2f3   : > { %v1817_v0 = vpop.f32.mrf.mxu1  ;;  %v3604_v49 = vor.u32 %v3922_v56, %v3601_v57 }
 0x2f4   : > { %v2454_v4 = vadd.f32 %v2320_v60, %v946_v59  ;;  %2192 = vmatmul.bf16.gmra.mxu3 %v3568_v54  ;;  %2361 = vmatmul.bf16.gmra.mxu0 %v3572_v2  ;;  %v3925_v60 = vld [vmem:[%s4666_s16 + $0x284] sm:$0xf] }
 0x2f6   : > { %2518 = vst [vmem:[%s4691_s2 + $0x88] sm:$0xff] %v2454_v4  ;;  %v3609_v4 = vld [vmem:[%s4666_s16 + $0x290] sm:$0xf0] }
 0x2f7   : > { %v2153_v7 = vpop.f32.mrf.mxu3 }
 0x2f8   : > { %v2154_v9 = vadd.f32 %v2153_v7, %v1985_v5  ;;  %v3607_v5 = vld [vmem:[%s4666_s16 + $0x280] sm:$0xf] }
 0x2f9   : > { %v1986_v11 = vpop.f32.mrf.mxu2  ;;  %v2324_v12 = vpop.f32.mrf.mxu0 }
 0x2fa   : > { %v2323_v13 = vadd.f32 %v2322_v3, %v2154_v9  ;;  %v1987_v22 = vadd.f32 %v1986_v11, %v1817_v0  ;;  %v3608_v11 = vor.u32 %v3927_v6, %v3607_v5 }
 0x2fb   : > { %v1820_v16 = vpop.f32.mrf.mxu1 }
 0x2fc   : > { %v2455_v17 = vadd.f32 %v2323_v13, %v947_v10  ;;  %v3612_v10 = vor.u32 %v3925_v60, %v3609_v4  ;;  %v3935_v60 = vld [vmem:[%s4666_s16 + $0x2cc] sm:$0xf0] }
 0x2fd   : > { %v955_v4 = vld [vmem:[%s4691_s2 + $0xd0] sm:$0xff] }
 0x2fe   : > { %2519 = vst [vmem:[%s4691_s2 + $0x90] sm:$0xff] %v2455_v17  ;;  %2028 = vmatmul.bf16.gmra.mxu2 %v3580_v14  ;;  %1859 = vmatmul.bf16.gmra.mxu1 %v3576_v15  ;;  %v3615_v14 = vld [vmem:[%s4666_s16 + $0x288] sm:$0xf]  ;;  %v3928_v15 = vld [vmem:[%s4666_s16 + $0x294] sm:$0xf0] }
 0x2ff   : > { %v2155_v23 = vpop.f32.mrf.mxu3  ;;  %v3617_v17 = vld [vmem:[%s4666_s16 + $0x298] sm:$0xf0]  ;;  %v3616_v21 = vor.u32 %v3928_v15, %v3615_v14 }
 0x300   : > { %v2156_v24 = vadd.f32 %v2155_v23, %v1987_v22  ;;  %v952_v23 = vld [vmem:[%s4691_s2 + $0xb8] sm:$0xff] }
 0x301   : > { %v1989_v30 = vpop.f32.mrf.mxu2  ;;  %v2327_v31 = vpop.f32.mrf.mxu0 }
 0x302   : > { %v2325_v32 = vadd.f32 %v2324_v12, %v2156_v24  ;;  %v1990_v37 = vadd.f32 %v1989_v30, %v1820_v16  ;;  %v3926_v16 = vld [vmem:[%s4666_s16 + $0x28c] sm:$0xf] }
 0x303   : > { %v1822_v35 = vpop.f32.mrf.mxu1  ;;  %v3620_v22 = vor.u32 %v3926_v16, %v3617_v17 }
 0x304   : > { %v2456_v36 = vadd.f32 %v2325_v32, %v948_v29  ;;  %2197 = vmatmul.bf16.gmra.mxu3 %v3584_v27  ;;  %2366 = vmatmul.bf16.gmra.mxu0 %v3588_v28  ;;  %v3929_v32 = vld [vmem:[%s4666_s16 + $0x2a4] sm:$0xf] }
 0x306   : > { %2520 = vst [vmem:[%s4691_s2 + $0x98] sm:$0xff] %v2456_v36  ;;  %v3625_v36 = vld [vmem:[%s4666_s16 + $0x2b0] sm:$0xf0] }
 0x307   : > { %v2158_v39 = vpop.f32.mrf.mxu3 }
 0x308   : > { %v2159_v25 = vadd.f32 %v2158_v39, %v1990_v37  ;;  %v3623_v37 = vld [vmem:[%s4666_s16 + $0x2a0] sm:$0xf] }
 0x309   : > { %v1991_v44 = vpop.f32.mrf.mxu2  ;;  %v2329_v43 = vpop.f32.mrf.mxu0 }
 0x30a   : > { %v2328_v47 = vadd.f32 %v2327_v31, %v2159_v25  ;;  %v1992_v58 = vadd.f32 %v1991_v44, %v1822_v35  ;;  %v3624_v44 = vor.u32 %v3931_v38, %v3623_v37 }
 0x30b   : > { %v1825_v48 = vpop.f32.mrf.mxu1 }
 0x30c   : > { %v2457_v51 = vadd.f32 %v2328_v47, %v949_v26  ;;  %v3628_v26 = vor.u32 %v3929_v32, %v3625_v36  ;;  %v3939_v32 = vld [vmem:[%s4666_s16 + $0x2ec] sm:$0xf0]  ;;  %v957_v36 = vld [vmem:[%s4691_s2 + $0xe0] sm:$0xff] }
 0x30e   : > { %2521 = vst [vmem:[%s4691_s2 + $0xa0] sm:$0xff] %v2457_v51  ;;  %2033 = vmatmul.bf16.gmra.mxu2 %v3596_v46  ;;  %1864 = vmatmul.bf16.gmra.mxu1 %v3592_v42  ;;  %v3631_v46 = vld [vmem:[%s4666_s16 + $0x2a8] sm:$0xf]  ;;  %v3932_v42 = vld [vmem:[%s4666_s16 + $0x2b4] sm:$0xf0] }
 0x30f   : > { %v2160_v61 = vpop.f32.mrf.mxu3  ;;  %v3633_v51 = vld [vmem:[%s4666_s16 + $0x2b8] sm:$0xf0]  ;;  %v3632_v57 = vor.u32 %v3932_v42, %v3631_v46 }
 0x310   : > { %v2161_v62 = vadd.f32 %v2160_v61, %v1992_v58  ;;  %v954_v61 = vld [vmem:[%s4691_s2 + $0xc8] sm:$0xff] }
 0x311   : > { %v1994_v53 = vpop.f32.mrf.mxu2  ;;  %v2332_v54 = vpop.f32.mrf.mxu0 }
 0x312   : > { %v2330_v2 = vadd.f32 %v2329_v43, %v2161_v62  ;;  %v1995_v3 = vadd.f32 %v1994_v53, %v1825_v48  ;;  %v3930_v48 = vld [vmem:[%s4666_s16 + $0x2ac] sm:$0xf] }
 0x313   : > { %v1827_v59 = vpop.f32.mrf.mxu1  ;;  %v3636_v58 = vor.u32 %v3930_v48, %v3633_v51 }
 0x314   : > { %v2458_v63 = vadd.f32 %v2330_v2, %v950_v50  ;;  %2202 = vmatmul.bf16.gmra.mxu3 %v3600_v1  ;;  %2371 = vmatmul.bf16.gmra.mxu0 %v3604_v49  ;;  %v3933_v2 = vld [vmem:[%s4666_s16 + $0x2c4] sm:$0xf] }
 0x316   : > { %2522 = vst [vmem:[%s4691_s2 + $0xa8] sm:$0xff] %v2458_v63  ;;  %v3641_v63 = vld [vmem:[%s4666_s16 + $0x2d0] sm:$0xf0] }
 0x317   : > { %v2163_v0 = vpop.f32.mrf.mxu3 }
 0x318   : > { %v2164_v7 = vadd.f32 %v2163_v0, %v1995_v3  ;;  %v3639_v3 = vld [vmem:[%s4666_s16 + $0x2c0] sm:$0xf] }
 0x319   : > { %v1996_v45 = vpop.f32.mrf.mxu2  ;;  %v2334_v8 = vpop.f32.mrf.mxu0 }
 0x31a   : > { %v2333_v9 = vadd.f32 %v2332_v54, %v2164_v7  ;;  %v1997_v18 = vadd.f32 %v1996_v45, %v1827_v59  ;;  %v3640_v45 = vor.u32 %v3935_v60, %v3639_v3 }
 0x31b   : > { %v1830_v12 = vpop.f32.mrf.mxu1 }
 0x31c   : > { %v2459_v13 = vadd.f32 %v2333_v9, %v951_v41  ;;  %v3644_v41 = vor.u32 %v3933_v2, %v3641_v63  ;;  %v3943_v2 = vld [vmem:[%s4666_s16 + $0x30c] sm:$0xf0] }
 0x31d   : > { %v959_v63 = vld [vmem:[%s4691_s2 + $0xf0] sm:$0xff] }
 0x31e   : > { %2523 = vst [vmem:[%s4691_s2 + $0xb0] sm:$0xff] %v2459_v13  ;;  %2038 = vmatmul.bf16.gmra.mxu2 %v3612_v10  ;;  %1869 = vmatmul.bf16.gmra.mxu1 %v3608_v11  ;;  %v3647_v10 = vld [vmem:[%s4666_s16 + $0x2c8] sm:$0xf]  ;;  %v3936_v11 = vld [vmem:[%s4666_s16 + $0x2d4] sm:$0xf0] }
 0x31f   : > { %v2165_v19 = vpop.f32.mrf.mxu3  ;;  %v3649_v13 = vld [vmem:[%s4666_s16 + $0x2d8] sm:$0xf0]  ;;  %v3648_v17 = vor.u32 %v3936_v11, %v3647_v10 }
 0x320   : > { %v2166_v20 = vadd.f32 %v2165_v19, %v1997_v18  ;;  %v956_v19 = vld [vmem:[%s4691_s2 + $0xd8] sm:$0xff] }
 0x321   : > { %v1999_v24 = vpop.f32.mrf.mxu2  ;;  %v2337_v27 = vpop.f32.mrf.mxu0 }
 0x322   : > { %v2335_v28 = vadd.f32 %v2334_v8, %v2166_v20  ;;  %v2000_v31 = vadd.f32 %v1999_v24, %v1830_v12  ;;  %v3934_v12 = vld [vmem:[%s4666_s16 + $0x2cc] sm:$0xf] }
 0x323   : > { %v1832_v29 = vpop.f32.mrf.mxu1  ;;  %v3652_v18 = vor.u32 %v3934_v12, %v3649_v13 }
 0x324   : > { %v2460_v30 = vadd.f32 %v2335_v28, %v952_v23  ;;  %2207 = vmatmul.bf16.gmra.mxu3 %v3616_v21  ;;  %2376 = vmatmul.bf16.gmra.mxu0 %v3620_v22  ;;  %v3937_v28 = vld [vmem:[%s4666_s16 + $0x2e4] sm:$0xf] }
 0x326   : > { %2524 = vst [vmem:[%s4691_s2 + $0xb8] sm:$0xff] %v2460_v30  ;;  %v3657_v30 = vld [vmem:[%s4666_s16 + $0x2f0] sm:$0xf0] }
 0x327   : > { %v2168_v35 = vpop.f32.mrf.mxu3 }
 0x328   : > { %v2169_v39 = vadd.f32 %v2168_v35, %v2000_v31  ;;  %v3655_v31 = vld [vmem:[%s4666_s16 + $0x2e0] sm:$0xf] }
 0x329   : > { %v2001_v33 = vpop.f32.mrf.mxu2  ;;  %v2339_v34 = vpop.f32.mrf.mxu0 }
 0x32a   : > { %v2338_v25 = vadd.f32 %v2337_v27, %v2169_v39  ;;  %v2002_v52 = vadd.f32 %v2001_v33, %v1832_v29  ;;  %v3656_v33 = vor.u32 %v3939_v32, %v3655_v31 }
 0x32b   : > { %v1835_v43 = vpop.f32.mrf.mxu1 }
 0x32c   : > { %v2461_v47 = vadd.f32 %v2338_v25, %v953_v40  ;;  %v3660_v40 = vor.u32 %v3937_v28, %v3657_v30  ;;  %v3947_v28 = vld [vmem:[%s4666_s16 + $0x32c] sm:$0xf0]  ;;  %v961_v30 = vld [vmem:[%s4691_s2 + $0x100] sm:$0xff] }
 0x32e   : > { %2525 = vst [vmem:[%s4691_s2 + $0xc0] sm:$0xff] %v2461_v47  ;;  %2043 = vmatmul.bf16.gmra.mxu2 %v3628_v26  ;;  %1874 = vmatmul.bf16.gmra.mxu1 %v3624_v44  ;;  %v3663_v26 = vld [vmem:[%s4666_s16 + $0x2e8] sm:$0xf]  ;;  %v3940_v44 = vld [vmem:[%s4666_s16 + $0x2f4] sm:$0xf0] }
 0x32f   : > { %v2170_v55 = vpop.f32.mrf.mxu3  ;;  %v3665_v47 = vld [vmem:[%s4666_s16 + $0x2f8] sm:$0xf0]  ;;  %v3664_v51 = vor.u32 %v3940_v44, %v3663_v26 }
 0x330   : > { %v2171_v56 = vadd.f32 %v2170_v55, %v2002_v52  ;;  %v958_v55 = vld [vmem:[%s4691_s2 + $0xe8] sm:$0xff] }
 0x331   : > { %v2004_v62 = vpop.f32.mrf.mxu2  ;;  %v2342_v1 = vpop.f32.mrf.mxu0 }
 0x332   : > { %v2340_v49 = vadd.f32 %v2339_v34, %v2171_v56  ;;  %v2005_v54 = vadd.f32 %v2004_v62, %v1835_v43  ;;  %v3938_v43 = vld [vmem:[%s4666_s16 + $0x2ec] sm:$0xf] }
 0x333   : > { %v1837_v50 = vpop.f32.mrf.mxu1  ;;  %v3668_v52 = vor.u32 %v3938_v43, %v3665_v47 }
 0x334   : > { %v2462_v53 = vadd.f32 %v2340_v49, %v954_v61  ;;  %2212 = vmatmul.bf16.gmra.mxu3 %v3632_v57  ;;  %2381 = vmatmul.bf16.gmra.mxu0 %v3636_v58  ;;  %v3941_v49 = vld [vmem:[%s4666_s16 + $0x304] sm:$0xf] }
 0x336   : > { %2526 = vst [vmem:[%s4691_s2 + $0xc8] sm:$0xff] %v2462_v53  ;;  %v3673_v53 = vld [vmem:[%s4666_s16 + $0x310] sm:$0xf0] }
 0x337   : > { %v2173_v59 = vpop.f32.mrf.mxu3 }
 0x338   : > { %v2174_v0 = vadd.f32 %v2173_v59, %v2005_v54  ;;  %v3671_v54 = vld [vmem:[%s4666_s16 + $0x300] sm:$0xf] }
 0x339   : > { %v2006_v5 = vpop.f32.mrf.mxu2  ;;  %v2344_v6 = vpop.f32.mrf.mxu0 }
 0x33a   : > { %v2343_v7 = vadd.f32 %v2342_v1, %v2174_v0  ;;  %v2007_v14 = vadd.f32 %v2006_v5, %v1837_v50  ;;  %v3672_v5 = vor.u32 %v3943_v2, %v3671_v54 }
 0x33b   : > { %v1840_v8 = vpop.f32.mrf.mxu1 }
 0x33c   : > { %v2463_v9 = vadd.f32 %v2343_v7, %v955_v4  ;;  %v3676_v4 = vor.u32 %v3941_v49, %v3673_v53  ;;  %v3951_v49 = vld [vmem:[%s4666_s16 + $0x34c] sm:$0xf0] }
 0x33d   : > { %v963_v53 = vld [vmem:[%s4691_s2 + $0x110] sm:$0xff] }
 0x33e   : > { %2527 = vst [vmem:[%s4691_s2 + $0xd0] sm:$0xff] %v2463_v9  ;;  %2048 = vmatmul.bf16.gmra.mxu2 %v3644_v41  ;;  %1879 = vmatmul.bf16.gmra.mxu1 %v3640_v45  ;;  %v3679_v41 = vld [vmem:[%s4666_s16 + $0x308] sm:$0xf]  ;;  %v3944_v45 = vld [vmem:[%s4666_s16 + $0x314] sm:$0xf0] }
 0x33f   : > { %v2175_v15 = vpop.f32.mrf.mxu3  ;;  %v3681_v9 = vld [vmem:[%s4666_s16 + $0x318] sm:$0xf0]  ;;  %v3680_v13 = vor.u32 %v3944_v45, %v3679_v41 }
 0x340   : > { %v2176_v16 = vadd.f32 %v2175_v15, %v2007_v14  ;;  %v960_v15 = vld [vmem:[%s4691_s2 + $0xf8] sm:$0xff] }
 0x341   : > { %v2009_v20 = vpop.f32.mrf.mxu2  ;;  %v2347_v21 = vpop.f32.mrf.mxu0 }
 0x342   : > { %v2345_v22 = vadd.f32 %v2344_v6, %v2176_v16  ;;  %v2010_v27 = vadd.f32 %v2009_v20, %v1840_v8  ;;  %v3942_v8 = vld [vmem:[%s4666_s16 + $0x30c] sm:$0xf] }
 0x343   : > { %v1842_v23 = vpop.f32.mrf.mxu1  ;;  %v3684_v14 = vor.u32 %v3942_v8, %v3681_v9 }
 0x344   : > { %v2464_v24 = vadd.f32 %v2345_v22, %v956_v19  ;;  %2217 = vmatmul.bf16.gmra.mxu3 %v3648_v17  ;;  %2386 = vmatmul.bf16.gmra.mxu0 %v3652_v18  ;;  %v3945_v22 = vld [vmem:[%s4666_s16 + $0x324] sm:$0xf] }
 0x346   : > { %2528 = vst [vmem:[%s4691_s2 + $0xd8] sm:$0xff] %v2464_v24  ;;  %v3689_v24 = vld [vmem:[%s4666_s16 + $0x330] sm:$0xf0] }
 0x347   : > { %v2178_v29 = vpop.f32.mrf.mxu3 }
 0x348   : > { %v2179_v35 = vadd.f32 %v2178_v29, %v2010_v27  ;;  %v3687_v27 = vld [vmem:[%s4666_s16 + $0x320] sm:$0xf] }
 0x349   : > { %v2011_v37 = vpop.f32.mrf.mxu2  ;;  %v2349_v38 = vpop.f32.mrf.mxu0 }
 0x34a   : > { %v2348_v39 = vadd.f32 %v2347_v21, %v2179_v35  ;;  %v2012_v46 = vadd.f32 %v2011_v37, %v1842_v23  ;;  %v3688_v37 = vor.u32 %v3947_v28, %v3687_v27 }
 0x34b   : > { %v1845_v34 = vpop.f32.mrf.mxu1 }
 0x34c   : > { %v2465_v25 = vadd.f32 %v2348_v39, %v957_v36  ;;  %v3692_v36 = vor.u32 %v3945_v22, %v3689_v24  ;;  %v3955_v22 = vld [vmem:[%s4666_s16 + $0x36c] sm:$0xf0]  ;;  %v965_v24 = vld [vmem:[%s4691_s2 + $0x120] sm:$0xff] }
 0x34e   : > { %2529 = vst [vmem:[%s4691_s2 + $0xe0] sm:$0xff] %v2465_v25  ;;  %2053 = vmatmul.bf16.gmra.mxu2 %v3660_v40  ;;  %1884 = vmatmul.bf16.gmra.mxu1 %v3656_v33  ;;  %v3695_v40 = vld [vmem:[%s4666_s16 + $0x328] sm:$0xf]  ;;  %v3948_v33 = vld [vmem:[%s4666_s16 + $0x334] sm:$0xf0] }
 0x34f   : > { %v2180_v42 = vpop.f32.mrf.mxu3  ;;  %v3697_v25 = vld [vmem:[%s4666_s16 + $0x338] sm:$0xf0]  ;;  %v3696_v47 = vor.u32 %v3948_v33, %v3695_v40 }
 0x350   : > { %v2181_v48 = vadd.f32 %v2180_v42, %v2012_v46  ;;  %v962_v42 = vld [vmem:[%s4691_s2 + $0x108] sm:$0xff] }
 0x351   : > { %v2014_v56 = vpop.f32.mrf.mxu2  ;;  %v2352_v57 = vpop.f32.mrf.mxu0 }
 0x352   : > { %v2350_v58 = vadd.f32 %v2349_v38, %v2181_v48  ;;  %v2015_v1 = vadd.f32 %v2014_v56, %v1845_v34  ;;  %v3946_v34 = vld [vmem:[%s4666_s16 + $0x32c] sm:$0xf] }
 0x353   : > { %v1847_v61 = vpop.f32.mrf.mxu1  ;;  %v3700_v46 = vor.u32 %v3946_v34, %v3697_v25 }
 0x354   : > { %v2466_v62 = vadd.f32 %v2350_v58, %v958_v55  ;;  %2222 = vmatmul.bf16.gmra.mxu3 %v3664_v51  ;;  %2391 = vmatmul.bf16.gmra.mxu0 %v3668_v52  ;;  %v3949_v58 = vld [vmem:[%s4666_s16 + $0x344] sm:$0xf] }
 0x356   : > { %2530 = vst [vmem:[%s4691_s2 + $0xe8] sm:$0xff] %v2466_v62  ;;  %v3705_v62 = vld [vmem:[%s4666_s16 + $0x350] sm:$0xf0] }
 0x357   : > { %v2183_v50 = vpop.f32.mrf.mxu3 }
 0x358   : > { %v2184_v59 = vadd.f32 %v2183_v50, %v2015_v1  ;;  %v3703_v1 = vld [vmem:[%s4666_s16 + $0x340] sm:$0xf] }
 0x359   : > { %v2016_v3 = vpop.f32.mrf.mxu2  ;;  %v2354_v60 = vpop.f32.mrf.mxu0 }
 0x35a   : > { %v2353_v0 = vadd.f32 %v2352_v57, %v2184_v59  ;;  %v2017_v10 = vadd.f32 %v2016_v3, %v1847_v61  ;;  %v3704_v3 = vor.u32 %v3951_v49, %v3703_v1 }
 0x35b   : > { %v1850_v6 = vpop.f32.mrf.mxu1 }
 0x35c   : > { %v2467_v7 = vadd.f32 %v2353_v0, %v959_v63  ;;  %v3708_v63 = vor.u32 %v3949_v58, %v3705_v62  ;;  %v3959_v58 = vld [vmem:[%s4666_s16 + $0x38c] sm:$0xf0] }
 0x35d   : > { %v967_v62 = vld [vmem:[%s4691_s2 + $0x130] sm:$0xff] }
 0x35e   : > { %2531 = vst [vmem:[%s4691_s2 + $0xf0] sm:$0xff] %v2467_v7  ;;  %2058 = vmatmul.bf16.gmra.mxu2 %v3676_v4  ;;  %1889 = vmatmul.bf16.gmra.mxu1 %v3672_v5  ;;  %v3711_v4 = vld [vmem:[%s4666_s16 + $0x348] sm:$0xf]  ;;  %v3952_v5 = vld [vmem:[%s4666_s16 + $0x354] sm:$0xf0] }
 0x35f   : > { %v2185_v11 = vpop.f32.mrf.mxu3  ;;  %v3713_v7 = vld [vmem:[%s4666_s16 + $0x358] sm:$0xf0]  ;;  %v3712_v9 = vor.u32 %v3952_v5, %v3711_v4 }
 0x360   : > { %v2186_v12 = vadd.f32 %v2185_v11, %v2017_v10  ;;  %v964_v11 = vld [vmem:[%s4691_s2 + $0x118] sm:$0xff] }
 0x361   : > { %v2019_v16 = vpop.f32.mrf.mxu2  ;;  %v2357_v17 = vpop.f32.mrf.mxu0 }
 0x362   : > { %v2355_v18 = vadd.f32 %v2354_v60, %v2186_v12  ;;  %v2020_v21 = vadd.f32 %v2019_v16, %v1850_v6  ;;  %v3950_v6 = vld [vmem:[%s4666_s16 + $0x34c] sm:$0xf] }
 0x363   : > { %v1852_v19 = vpop.f32.mrf.mxu1  ;;  %v3716_v10 = vor.u32 %v3950_v6, %v3713_v7 }
 0x364   : > { %v2468_v20 = vadd.f32 %v2355_v18, %v960_v15  ;;  %2227 = vmatmul.bf16.gmra.mxu3 %v3680_v13  ;;  %2396 = vmatmul.bf16.gmra.mxu0 %v3684_v14  ;;  %v3953_v18 = vld [vmem:[%s4666_s16 + $0x364] sm:$0xf] }
 0x366   : > { %2532 = vst [vmem:[%s4691_s2 + $0xf8] sm:$0xff] %v2468_v20  ;;  %v3721_v20 = vld [vmem:[%s4666_s16 + $0x370] sm:$0xf0] }
 0x367   : > { %v2188_v23 = vpop.f32.mrf.mxu3 }
 0x368   : > { %v2189_v29 = vadd.f32 %v2188_v23, %v2020_v21  ;;  %v3719_v21 = vld [vmem:[%s4666_s16 + $0x360] sm:$0xf] }
 0x369   : > { %v2021_v31 = vpop.f32.mrf.mxu2  ;;  %v2359_v32 = vpop.f32.mrf.mxu0 }
 0x36a   : > { %v2358_v35 = vadd.f32 %v2357_v17, %v2189_v29  ;;  %v2022_v26 = vadd.f32 %v2021_v31, %v1852_v19  ;;  %v3720_v31 = vor.u32 %v3955_v22, %v3719_v21 }
 0x36b   : > { %v1855_v38 = vpop.f32.mrf.mxu1 }
 0x36c   : > { %v2469_v39 = vadd.f32 %v2358_v35, %v961_v30  ;;  %v3724_v30 = vor.u32 %v3953_v18, %v3721_v20  ;;  %v3963_v18 = vld [vmem:[%s4666_s16 + $0x3ac] sm:$0xf0]  ;;  %v969_v20 = vld [vmem:[%s4691_s2 + $0x140] sm:$0xff] }
 0x36e   : > { %2533 = vst [vmem:[%s4691_s2 + $0x100] sm:$0xff] %v2469_v39  ;;  %2063 = vmatmul.bf16.gmra.mxu2 %v3692_v36  ;;  %1894 = vmatmul.bf16.gmra.mxu1 %v3688_v37  ;;  %v3727_v36 = vld [vmem:[%s4666_s16 + $0x368] sm:$0xf]  ;;  %v3956_v37 = vld [vmem:[%s4666_s16 + $0x374] sm:$0xf0] }
 0x36f   : > { %v2190_v44 = vpop.f32.mrf.mxu3  ;;  %v3729_v39 = vld [vmem:[%s4666_s16 + $0x378] sm:$0xf0]  ;;  %v3728_v25 = vor.u32 %v3956_v37, %v3727_v36 }
 0x370   : > { %v2191_v43 = vadd.f32 %v2190_v44, %v2022_v26  ;;  %v966_v44 = vld [vmem:[%s4691_s2 + $0x128] sm:$0xff] }
 0x371   : > { %v2024_v48 = vpop.f32.mrf.mxu2  ;;  %v2362_v51 = vpop.f32.mrf.mxu0 }
 0x372   : > { %v2360_v52 = vadd.f32 %v2359_v32, %v2191_v43  ;;  %v2025_v57 = vadd.f32 %v2024_v48, %v1855_v38  ;;  %v3954_v38 = vld [vmem:[%s4666_s16 + $0x36c] sm:$0xf] }
 0x373   : > { %v1857_v55 = vpop.f32.mrf.mxu1  ;;  %v3732_v26 = vor.u32 %v3954_v38, %v3729_v39 }
 0x374   : > { %v2470_v56 = vadd.f32 %v2360_v52, %v962_v42  ;;  %2232 = vmatmul.bf16.gmra.mxu3 %v3696_v47  ;;  %2401 = vmatmul.bf16.gmra.mxu0 %v3700_v46  ;;  %v3957_v52 = vld [vmem:[%s4666_s16 + $0x384] sm:$0xf] }
 0x376   : > { %2534 = vst [vmem:[%s4691_s2 + $0x108] sm:$0xff] %v2470_v56  ;;  %v3737_v56 = vld [vmem:[%s4666_s16 + $0x390] sm:$0xf0] }
 0x377   : > { %v2193_v61 = vpop.f32.mrf.mxu3 }
 0x378   : > { %v2194_v50 = vadd.f32 %v2193_v61, %v2025_v57  ;;  %v3735_v57 = vld [vmem:[%s4666_s16 + $0x380] sm:$0xf] }
 0x379   : > { %v2026_v54 = vpop.f32.mrf.mxu2  ;;  %v2364_v2 = vpop.f32.mrf.mxu0 }
 0x37a   : > { %v2363_v59 = vadd.f32 %v2362_v51, %v2194_v50  ;;  %v2027_v41 = vadd.f32 %v2026_v54, %v1857_v55  ;;  %v3736_v54 = vor.u32 %v3959_v58, %v3735_v57 }
 0x37b   : > { %v1860_v60 = vpop.f32.mrf.mxu1 }
 0x37c   : > { %v2471_v0 = vadd.f32 %v2363_v59, %v963_v53  ;;  %v3740_v53 = vor.u32 %v3957_v52, %v3737_v56  ;;  %v3967_v52 = vld [vmem:[%s4666_s16 + $0x3cc] sm:$0xf0] }
 0x37d   : > { %v971_v56 = vld [vmem:[%s4691_s2 + $0x150] sm:$0xff] }
 0x37e   : > { %2535 = vst [vmem:[%s4691_s2 + $0x110] sm:$0xff] %v2471_v0  ;;  %2068 = vmatmul.bf16.gmra.mxu2 %v3708_v63  ;;  %1899 = vmatmul.bf16.gmra.mxu1 %v3704_v3  ;;  %v3743_v63 = vld [vmem:[%s4666_s16 + $0x388] sm:$0xf]  ;;  %v3960_v3 = vld [vmem:[%s4666_s16 + $0x394] sm:$0xf0] }
 0x37f   : > { %v2195_v45 = vpop.f32.mrf.mxu3  ;;  %v3745_v0 = vld [vmem:[%s4666_s16 + $0x398] sm:$0xf0]  ;;  %v3744_v7 = vor.u32 %v3960_v3, %v3743_v63 }
 0x380   : > { %v2196_v8 = vadd.f32 %v2195_v45, %v2027_v41  ;;  %v968_v45 = vld [vmem:[%s4691_s2 + $0x138] sm:$0xff] }
 0x381   : > { %v2029_v12 = vpop.f32.mrf.mxu2  ;;  %v2367_v13 = vpop.f32.mrf.mxu0 }
 0x382   : > { %v2365_v14 = vadd.f32 %v2364_v2, %v2196_v8  ;;  %v2030_v17 = vadd.f32 %v2029_v12, %v1860_v60  ;;  %v3958_v60 = vld [vmem:[%s4666_s16 + $0x38c] sm:$0xf] }
 0x383   : > { %v1862_v15 = vpop.f32.mrf.mxu1  ;;  %v3748_v41 = vor.u32 %v3958_v60, %v3745_v0 }
 0x384   : > { %v2472_v16 = vadd.f32 %v2365_v14, %v964_v11  ;;  %2237 = vmatmul.bf16.gmra.mxu3 %v3712_v9  ;;  %2406 = vmatmul.bf16.gmra.mxu0 %v3716_v10  ;;  %v3961_v14 = vld [vmem:[%s4666_s16 + $0x3a4] sm:$0xf] }
 0x386   : > { %2536 = vst [vmem:[%s4691_s2 + $0x118] sm:$0xff] %v2472_v16  ;;  %v3753_v16 = vld [vmem:[%s4666_s16 + $0x3b0] sm:$0xf0] }
 0x387   : > { %v2198_v19 = vpop.f32.mrf.mxu3 }
 0x388   : > { %v2199_v23 = vadd.f32 %v2198_v19, %v2030_v17  ;;  %v3751_v17 = vld [vmem:[%s4666_s16 + $0x3a0] sm:$0xf] }
 0x389   : > { %v2031_v27 = vpop.f32.mrf.mxu2  ;;  %v2369_v28 = vpop.f32.mrf.mxu0 }
 0x38a   : > { %v2368_v29 = vadd.f32 %v2367_v13, %v2199_v23  ;;  %v2032_v40 = vadd.f32 %v2031_v27, %v1862_v15  ;;  %v3752_v27 = vor.u32 %v3963_v18, %v3751_v17 }
 0x38b   : > { %v1865_v32 = vpop.f32.mrf.mxu1 }
 0x38c   : > { %v2473_v35 = vadd.f32 %v2368_v29, %v965_v24  ;;  %v3756_v24 = vor.u32 %v3961_v14, %v3753_v16  ;;  %v3971_v14 = vld [vmem:[%s4666_s16 + $0x3ec] sm:$0xf0]  ;;  %v973_v16 = vld [vmem:[%s4691_s2 + $0x160] sm:$0xff] }
 0x38e   : > { %2537 = vst [vmem:[%s4691_s2 + $0x120] sm:$0xff] %v2473_v35  ;;  %2073 = vmatmul.bf16.gmra.mxu2 %v3724_v30  ;;  %1904 = vmatmul.bf16.gmra.mxu1 %v3720_v31  ;;  %v3759_v30 = vld [vmem:[%s4666_s16 + $0x3a8] sm:$0xf]  ;;  %v3964_v31 = vld [vmem:[%s4666_s16 + $0x3b4] sm:$0xf0] }
 0x38f   : > { %v2200_v33 = vpop.f32.mrf.mxu3  ;;  %v3761_v35 = vld [vmem:[%s4666_s16 + $0x3b8] sm:$0xf0]  ;;  %v3760_v39 = vor.u32 %v3964_v31, %v3759_v30 }
 0x390   : > { %v2201_v34 = vadd.f32 %v2200_v33, %v2032_v40  ;;  %v970_v33 = vld [vmem:[%s4691_s2 + $0x148] sm:$0xff] }
 0x391   : > { %v2034_v43 = vpop.f32.mrf.mxu2  ;;  %v2372_v47 = vpop.f32.mrf.mxu0 }
 0x392   : > { %v2370_v46 = vadd.f32 %v2369_v28, %v2201_v34  ;;  %v2035_v51 = vadd.f32 %v2034_v43, %v1865_v32  ;;  %v3962_v32 = vld [vmem:[%s4666_s16 + $0x3ac] sm:$0xf] }
 0x393   : > { %v1867_v42 = vpop.f32.mrf.mxu1  ;;  %v3764_v40 = vor.u32 %v3962_v32, %v3761_v35 }
 0x394   : > { %v2474_v48 = vadd.f32 %v2370_v46, %v966_v44  ;;  %2242 = vmatmul.bf16.gmra.mxu3 %v3728_v25  ;;  %2411 = vmatmul.bf16.gmra.mxu0 %v3732_v26  ;;  %v3965_v46 = vld [vmem:[%s4666_s16 + $0x3c4] sm:$0xf] }
 0x396   : > { %2538 = vst [vmem:[%s4691_s2 + $0x128] sm:$0xff] %v2474_v48  ;;  %v3769_v48 = vld [vmem:[%s4666_s16 + $0x3d0] sm:$0xf0] }
 0x397   : > { %v2203_v55 = vpop.f32.mrf.mxu3 }
 0x398   : > { %v2204_v61 = vadd.f32 %v2203_v55, %v2035_v51  ;;  %v3767_v51 = vld [vmem:[%s4666_s16 + $0x3c0] sm:$0xf] }
 0x399   : > { %v2036_v1 = vpop.f32.mrf.mxu2  ;;  %v2374_v49 = vpop.f32.mrf.mxu0 }
 0x39a   : > { %v2373_v50 = vadd.f32 %v2372_v47, %v2204_v61  ;;  %v2037_v4 = vadd.f32 %v2036_v1, %v1867_v42  ;;  %v3768_v1 = vor.u32 %v3967_v52, %v3767_v51 }
 0x39b   : > { %v1870_v2 = vpop.f32.mrf.mxu1 }
 0x39c   : > { %v2475_v59 = vadd.f32 %v2373_v50, %v967_v62  ;;  %v3772_v62 = vor.u32 %v3965_v46, %v3769_v48 }
 0x39e   : > { %2539 = vst [vmem:[%s4691_s2 + $0x130] sm:$0xff] %v2475_v59  ;;  %2078 = vmatmul.bf16.gmra.mxu2 %v3740_v53  ;;  %1909 = vmatmul.bf16.gmra.mxu1 %v3736_v54  ;;  %v3775_v53 = vld [vmem:[%s4666_s16 + $0x3c8] sm:$0xf]  ;;  %v3968_v54 = vld [vmem:[%s4666_s16 + $0x3d4] sm:$0xf0] }
 0x39f   : > { %v2205_v5 = vpop.f32.mrf.mxu3  ;;  %v3777_v59 = vld [vmem:[%s4666_s16 + $0x3d8] sm:$0xf0]  ;;  %v3776_v0 = vor.u32 %v3968_v54, %v3775_v53 }
 0x3a0   : > { %v2206_v6 = vadd.f32 %v2205_v5, %v2037_v4  ;;  %v972_v5 = vld [vmem:[%s4691_s2 + $0x158] sm:$0xff] }
 0x3a1   : > { %v2039_v8 = vpop.f32.mrf.mxu2  ;;  %v2377_v9 = vpop.f32.mrf.mxu0 }
 0x3a2   : > { %v2375_v10 = vadd.f32 %v2374_v49, %v2206_v6  ;;  %v2040_v13 = vadd.f32 %v2039_v8, %v1870_v2  ;;  %v3966_v2 = vld [vmem:[%s4666_s16 + $0x3cc] sm:$0xf] }
 0x3a3   : > { %v1872_v11 = vpop.f32.mrf.mxu1  ;;  %v3780_v4 = vor.u32 %v3966_v2, %v3777_v59  ;;  %v977_v2 = vld [vmem:[%s4691_s2 + $0x180] sm:$0xff] }
 0x3a4   : > { %v2476_v12 = vadd.f32 %v2375_v10, %v968_v45  ;;  %2247 = vmatmul.bf16.gmra.mxu3 %v3744_v7  ;;  %2416 = vmatmul.bf16.gmra.mxu0 %v3748_v41  ;;  %v3969_v10 = vld [vmem:[%s4666_s16 + $0x3e4] sm:$0xf] }
 0x3a6   : > { %2540 = vst [vmem:[%s4691_s2 + $0x138] sm:$0xff] %v2476_v12  ;;  %v3785_v12 = vld [vmem:[%s4666_s16 + $0x3f0] sm:$0xf0] }
 0x3a7   : > { %v2208_v15 = vpop.f32.mrf.mxu3 }
 0x3a8   : > { %v2209_v19 = vadd.f32 %v2208_v15, %v2040_v13  ;;  %v3783_v13 = vld [vmem:[%s4666_s16 + $0x3e0] sm:$0xf] }
 0x3a9   : > { %v2041_v21 = vpop.f32.mrf.mxu2  ;;  %v2379_v22 = vpop.f32.mrf.mxu0 }
 0x3aa   : > { %v2378_v23 = vadd.f32 %v2377_v9, %v2209_v19  ;;  %v2042_v36 = vadd.f32 %v2041_v21, %v1872_v11  ;;  %v3784_v21 = vor.u32 %v3971_v14, %v3783_v13  ;;  %v979_v14 = vld [vmem:[%s4691_s2 + $0x190] sm:$0xff] }
 0x3ab   : > { %v1875_v28 = vpop.f32.mrf.mxu1 }
 0x3ac   : > { %v2477_v29 = vadd.f32 %v2378_v23, %v969_v20  ;;  %v3788_v20 = vor.u32 %v3969_v10, %v3785_v12 }
 0x3ae   : > { %2541 = vst [vmem:[%s4691_s2 + $0x140] sm:$0xff] %v2477_v29  ;;  %2083 = vmatmul.bf16.gmra.mxu2 %v3756_v24  ;;  %1914 = vmatmul.bf16.gmra.mxu1 %v3752_v27  ;;  %v3791_v24 = vld [vmem:[%s4666_s16 + $0x3e8] sm:$0xf]  ;;  %v3972_v27 = vld [vmem:[%s4666_s16 + $0x3f4] sm:$0xf0] }
 0x3af   : > { %v2210_v37 = vpop.f32.mrf.mxu3  ;;  %v3793_v29 = vld [vmem:[%s4666_s16 + $0x3f8] sm:$0xf0]  ;;  %v3792_v35 = vor.u32 %v3972_v27, %v3791_v24 }
 0x3b0   : > { %v2211_v38 = vadd.f32 %v2210_v37, %v2042_v36  ;;  %v974_v37 = vld [vmem:[%s4691_s2 + $0x168] sm:$0xff] }
 0x3b1   : > { %v2044_v34 = vpop.f32.mrf.mxu2  ;;  %v2382_v25 = vpop.f32.mrf.mxu0 }
 0x3b2   : > { %v2380_v26 = vadd.f32 %v2379_v22, %v2211_v38  ;;  %v2045_v47 = vadd.f32 %v2044_v34, %v1875_v28  ;;  %v3970_v28 = vld [vmem:[%s4666_s16 + $0x3ec] sm:$0xf] }
 0x3b3   : > { %v1877_v44 = vpop.f32.mrf.mxu1  ;;  %v3796_v36 = vor.u32 %v3970_v28, %v3793_v29 }
 0x3b4   : > { %v2478_v43 = vadd.f32 %v2380_v26, %v970_v33  ;;  %2252 = vmatmul.bf16.gmra.mxu3 %v3760_v39  ;;  %2421 = vmatmul.bf16.gmra.mxu0 %v3764_v40 }
 0x3b6   : > { %2542 = vst [vmem:[%s4691_s2 + $0x148] sm:$0xff] %v2478_v43  ;;  %v975_v43 = vld [vmem:[%s4691_s2 + $0x170] sm:$0xff] }
 0x3b7   : > { %v2213_v42 = vpop.f32.mrf.mxu3 }
 0x3b8   : > { %v2214_v55 = vadd.f32 %v2213_v42, %v2045_v47 }
 0x3b9   : > { %v2046_v57 = vpop.f32.mrf.mxu2  ;;  %v2384_v58 = vpop.f32.mrf.mxu0 }
 0x3ba   : > { %v2383_v61 = vadd.f32 %v2382_v25, %v2214_v55  ;;  %v2047_v63 = vadd.f32 %v2046_v57, %v1877_v44  ;;  %v976_v57 = vld [vmem:[%s4691_s2 + $0x178] sm:$0xff] }
 0x3bb   : > { %v1880_v49 = vpop.f32.mrf.mxu1 }
 0x3bc   : > { %v2479_v50 = vadd.f32 %v2383_v61, %v971_v56 }
 0x3be   : > { %2543 = vst [vmem:[%s4691_s2 + $0x150] sm:$0xff] %v2479_v50  ;;  %2088 = vmatmul.bf16.gmra.mxu2 %v3772_v62  ;;  %1919 = vmatmul.bf16.gmra.mxu1 %v3768_v1 }
 0x3bf   : > { %v2215_v3 = vpop.f32.mrf.mxu3 }
 0x3c0   : > { %v2216_v60 = vadd.f32 %v2215_v3, %v2047_v63 }
 0x3c1   : > { %v2049_v6 = vpop.f32.mrf.mxu2  ;;  %v2387_v7 = vpop.f32.mrf.mxu0 }
 0x3c2   : > { %v2385_v41 = vadd.f32 %v2384_v58, %v2216_v60  ;;  %v2050_v9 = vadd.f32 %v2049_v6, %v1880_v49 }
 0x3c3   : > { %v1882_v45 = vpop.f32.mrf.mxu1 }
 0x3c4   : > { %v2480_v8 = vadd.f32 %v2385_v41, %v972_v5  ;;  %2257 = vmatmul.bf16.gmra.mxu3 %v3776_v0  ;;  %2426 = vmatmul.bf16.gmra.mxu0 %v3780_v4 }
 0x3c6   : > { %2544 = vst [vmem:[%s4691_s2 + $0x158] sm:$0xff] %v2480_v8 }
 0x3c7   : > { %v2218_v11 = vpop.f32.mrf.mxu3 }
 0x3c8   : > { %v2219_v15 = vadd.f32 %v2218_v11, %v2050_v9 }
 0x3c9   : > { %v2051_v17 = vpop.f32.mrf.mxu2  ;;  %v2389_v18 = vpop.f32.mrf.mxu0 }
 0x3ca   : > { %v2388_v19 = vadd.f32 %v2387_v7, %v2219_v15  ;;  %v2052_v30 = vadd.f32 %v2051_v17, %v1882_v45  ;;  %v978_v7 = vld [vmem:[%s4691_s2 + $0x188] sm:$0xff] }
 0x3cb   : > { %v1885_v22 = vpop.f32.mrf.mxu1 }
 0x3cc   : > { %v2481_v23 = vadd.f32 %v2388_v19, %v973_v16 }
 0x3ce   : > { %2545 = vst [vmem:[%s4691_s2 + $0x160] sm:$0xff] %v2481_v23  ;;  %2093 = vmatmul.bf16.gmra.mxu2 %v3788_v20  ;;  %1924 = vmatmul.bf16.gmra.mxu1 %v3784_v21  ;;  %v980_v23 = vld [vmem:[%s4691_s2 + $0x198] sm:$0xff] }
 0x3cf   : > { %v2220_v31 = vpop.f32.mrf.mxu3 }
 0x3d0   : > { %v2221_v32 = vadd.f32 %v2220_v31, %v2052_v30 }
 0x3d1   : > { %v2054_v38 = vpop.f32.mrf.mxu2  ;;  %v2392_v39 = vpop.f32.mrf.mxu0 }
 0x3d2   : > { %v2390_v40 = vadd.f32 %v2389_v18, %v2221_v32  ;;  %v2055_v25 = vadd.f32 %v2054_v38, %v1885_v22 }
 0x3d3   : > { %v1887_v33 = vpop.f32.mrf.mxu1 }
 0x3d4   : > { %v2482_v34 = vadd.f32 %v2390_v40, %v974_v37  ;;  %2262 = vmatmul.bf16.gmra.mxu3 %v3792_v35  ;;  %2431 = vmatmul.bf16.gmra.mxu0 %v3796_v36  ;;  %v981_v36 = vld [vmem:[%s4691_s2 + $0x1a0] sm:$0xff] }
 0x3d6   : > { %2546 = vst [vmem:[%s4691_s2 + $0x168] sm:$0xff] %v2482_v34 }
 0x3d7   : > { %v2223_v26 = vpop.f32.mrf.mxu3 }
 0x3d8   : > { %v2224_v44 = vadd.f32 %v2223_v26, %v2055_v25 }
 0x3d9   : > { %v2056_v47 = vpop.f32.mrf.mxu2  ;;  %v2394_v46 = vpop.f32.mrf.mxu0 }
 0x3da   : > { %v2393_v42 = vadd.f32 %v2392_v39, %v2224_v44  ;;  %v2057_v52 = vadd.f32 %v2056_v47, %v1887_v33  ;;  %v982_v44 = vld [vmem:[%s4691_s2 + $0x1a8] sm:$0xff] }
 0x3db   : > { %v1890_v48 = vpop.f32.mrf.mxu1 }
 0x3dc   : > { %v2483_v51 = vadd.f32 %v2393_v42, %v975_v43 }
 0x3de   : > { %2547 = vst [vmem:[%s4691_s2 + $0x170] sm:$0xff] %v2483_v51 }
 0x3df   : > { %v2225_v55 = vpop.f32.mrf.mxu3 }
 0x3e0   : > { %v2226_v56 = vadd.f32 %v2225_v55, %v2057_v52 }
 0x3e1   : > { %v2059_v58 = vpop.f32.mrf.mxu2  ;;  %v2397_v61 = vpop.f32.mrf.mxu0 }
 0x3e2   : > { %v2395_v62 = vadd.f32 %v2394_v46, %v2226_v56  ;;  %v2060_v50 = vadd.f32 %v2059_v58, %v1890_v48  ;;  %v983_v56 = vld [vmem:[%s4691_s2 + $0x1b0] sm:$0xff] }
 0x3e3   : > { %v1892_v1 = vpop.f32.mrf.mxu1 }
 0x3e4   : > { %v2484_v49 = vadd.f32 %v2395_v62, %v976_v57 }
 0x3e6   : > { %2548 = vst [vmem:[%s4691_s2 + $0x178] sm:$0xff] %v2484_v49 }
 0x3e7   : > { %v2228_v53 = vpop.f32.mrf.mxu3 }
 0x3e8   : > { %v2229_v54 = vadd.f32 %v2228_v53, %v2060_v50 }
 0x3e9   : > { %v2061_v59 = vpop.f32.mrf.mxu2  ;;  %v2399_v63 = vpop.f32.mrf.mxu0 }
 0x3ea   : > { %v2398_v3 = vadd.f32 %v2397_v61, %v2229_v54  ;;  %v2062_v4 = vadd.f32 %v2061_v59, %v1892_v1  ;;  %v984_v54 = vld [vmem:[%s4691_s2 + $0x1b8] sm:$0xff] }
 0x3eb   : > { %v1895_v60 = vpop.f32.mrf.mxu1 }
 0x3ec   : > { %v2485_v0 = vadd.f32 %v2398_v3, %v977_v2 }
 0x3ee   : > { %2549 = vst [vmem:[%s4691_s2 + $0x180] sm:$0xff] %v2485_v0 }
 0x3ef   : > { %v2230_v5 = vpop.f32.mrf.mxu3 }
 0x3f0   : > { %v2231_v6 = vadd.f32 %v2230_v5, %v2062_v4 }
 0x3f1   : > { %v2064_v41 = vpop.f32.mrf.mxu2  ;;  %v2402_v45 = vpop.f32.mrf.mxu0 }
 0x3f2   : > { %v2400_v8 = vadd.f32 %v2399_v63, %v2231_v6  ;;  %v2065_v11 = vadd.f32 %v2064_v41, %v1895_v60  ;;  %v985_v6 = vld [vmem:[%s4691_s2 + $0x1c0] sm:$0xff] }
 0x3f3   : > { %v1897_v9 = vpop.f32.mrf.mxu1 }
 0x3f4   : > { %v2486_v10 = vadd.f32 %v2400_v8, %v978_v7 }
 0x3f6   : > { %2550 = vst [vmem:[%s4691_s2 + $0x188] sm:$0xff] %v2486_v10 }
 0x3f7   : > { %v2233_v12 = vpop.f32.mrf.mxu3 }
 0x3f8   : > { %v2234_v13 = vadd.f32 %v2233_v12, %v2065_v11 }
 0x3f9   : > { %v2066_v15 = vpop.f32.mrf.mxu2  ;;  %v2404_v16 = vpop.f32.mrf.mxu0 }
 0x3fa   : > { %v2403_v17 = vadd.f32 %v2402_v45, %v2234_v13  ;;  %v2067_v20 = vadd.f32 %v2066_v15, %v1897_v9  ;;  %v986_v13 = vld [vmem:[%s4691_s2 + $0x1c8] sm:$0xff] }
 0x3fb   : > { %v1900_v18 = vpop.f32.mrf.mxu1 }
 0x3fc   : > { %v2487_v19 = vadd.f32 %v2403_v17, %v979_v14 }
 0x3fe   : > { %2551 = vst [vmem:[%s4691_s2 + $0x190] sm:$0xff] %v2487_v19 }
 0x3ff   : > { %v2235_v21 = vpop.f32.mrf.mxu3 }
 0x400   : > { %v2236_v22 = vadd.f32 %v2235_v21, %v2067_v20 }
 0x401   : > { %v2069_v24 = vpop.f32.mrf.mxu2  ;;  %v2407_v27 = vpop.f32.mrf.mxu0 }
 0x402   : > { %v2405_v28 = vadd.f32 %v2404_v16, %v2236_v22  ;;  %v2070_v31 = vadd.f32 %v2069_v24, %v1900_v18  ;;  %v987_v22 = vld [vmem:[%s4691_s2 + $0x1d0] sm:$0xff] }
 0x403   : > { %v1902_v29 = vpop.f32.mrf.mxu1 }
 0x404   : > { %v2488_v30 = vadd.f32 %v2405_v28, %v980_v23 }
 0x406   : > { %2552 = vst [vmem:[%s4691_s2 + $0x198] sm:$0xff] %v2488_v30 }
 0x407   : > { %v2238_v32 = vpop.f32.mrf.mxu3 }
 0x408   : > { %v2239_v35 = vadd.f32 %v2238_v32, %v2070_v31 }
 0x409   : > { %v2071_v37 = vpop.f32.mrf.mxu2  ;;  %v2409_v38 = vpop.f32.mrf.mxu0 }
 0x40a   : > { %v2408_v39 = vadd.f32 %v2407_v27, %v2239_v35  ;;  %v2072_v34 = vadd.f32 %v2071_v37, %v1902_v29  ;;  %v988_v35 = vld [vmem:[%s4691_s2 + $0x1d8] sm:$0xff] }
 0x40b   : > { %v1905_v40 = vpop.f32.mrf.mxu1 }
 0x40c   : > { %v2489_v33 = vadd.f32 %v2408_v39, %v981_v36 }
 0x40e   : > { %2553 = vst [vmem:[%s4691_s2 + $0x1a0] sm:$0xff] %v2489_v33 }
 0x40f   : > { %v2240_v25 = vpop.f32.mrf.mxu3 }
 0x410   : > { %v2241_v26 = vadd.f32 %v2240_v25, %v2072_v34  ;;  %v989_v25 = vld [vmem:[%s4691_s2 + $0x1e0] sm:$0xff] }
 0x411   : > { %v2074_v43 = vpop.f32.mrf.mxu2  ;;  %v2412_v47 = vpop.f32.mrf.mxu0 }
 0x412   : > { %v2410_v46 = vadd.f32 %v2409_v38, %v2241_v26  ;;  %v2075_v51 = vadd.f32 %v2074_v43, %v1905_v40 }
 0x413   : > { %v1907_v42 = vpop.f32.mrf.mxu1 }
 0x414   : > { %v2490_v48 = vadd.f32 %v2410_v46, %v982_v44 }
 0x416   : > { %2554 = vst [vmem:[%s4691_s2 + $0x1a8] sm:$0xff] %v2490_v48 }
 0x417   : > { %v2243_v52 = vpop.f32.mrf.mxu3 }
 0x418   : > { %v2244_v55 = vadd.f32 %v2243_v52, %v2075_v51  ;;  %v990_v52 = vld [vmem:[%s4691_s2 + $0x1e8] sm:$0xff] }
 0x419   : > { %v2076_v57 = vpop.f32.mrf.mxu2  ;;  %v2414_v58 = vpop.f32.mrf.mxu0 }
 0x41a   : > { %v2413_v61 = vadd.f32 %v2412_v47, %v2244_v55  ;;  %v2077_v49 = vadd.f32 %v2076_v57, %v1907_v42 }
 0x41b   : > { %v1910_v62 = vpop.f32.mrf.mxu1 }
 0x41c   : > { %v2491_v1 = vadd.f32 %v2413_v61, %v983_v56 }
 0x41e   : > { %2555 = vst [vmem:[%s4691_s2 + $0x1b0] sm:$0xff] %v2491_v1 }
 0x41f   : > { %v2245_v50 = vpop.f32.mrf.mxu3 }
 0x420   : > { %v2246_v53 = vadd.f32 %v2245_v50, %v2077_v49  ;;  %v991_v50 = vld [vmem:[%s4691_s2 + $0x1f0] sm:$0xff] }
 0x421   : > { %v2079_v2 = vpop.f32.mrf.mxu2  ;;  %v2417_v59 = vpop.f32.mrf.mxu0 }
 0x422   : > { %v2415_v63 = vadd.f32 %v2414_v58, %v2246_v53  ;;  %v2080_v0 = vadd.f32 %v2079_v2, %v1910_v62 }
 0x423   : > { %v1912_v3 = vpop.f32.mrf.mxu1 }
 0x424   : > { %v2492_v60 = vadd.f32 %v2415_v63, %v984_v54 }
 0x426   : > { %2556 = vst [vmem:[%s4691_s2 + $0x1b8] sm:$0xff] %v2492_v60 }
 0x427   : > { %v2248_v4 = vpop.f32.mrf.mxu3 }
 0x428   : > { %v2249_v5 = vadd.f32 %v2248_v4, %v2080_v0  ;;  %v992_v0 = vld [vmem:[%s4691_s2 + $0x1f8] sm:$0xff] }
 0x429   : > { %v2081_v7 = vpop.f32.mrf.mxu2  ;;  %v2419_v41 = vpop.f32.mrf.mxu0 }
 0x42a   : > { %v2418_v45 = vadd.f32 %v2417_v59, %v2249_v5  ;;  %v2082_v10 = vadd.f32 %v2081_v7, %v1912_v3 }
 0x42b   : > { %v1915_v8 = vpop.f32.mrf.mxu1 }
 0x42c   : > { %v2493_v9 = vadd.f32 %v2418_v45, %v985_v6 }
 0x42e   : > { %2557 = vst [vmem:[%s4691_s2 + $0x1c0] sm:$0xff] %v2493_v9 }
 0x42f   : > { %v2250_v11 = vpop.f32.mrf.mxu3 }
 0x430   : > { %v2251_v12 = vadd.f32 %v2250_v11, %v2082_v10 }
 0x431   : > { %v2084_v14 = vpop.f32.mrf.mxu2  ;;  %v2422_v15 = vpop.f32.mrf.mxu0 }
 0x432   : > { %v2420_v16 = vadd.f32 %v2419_v41, %v2251_v12  ;;  %v2085_v18 = vadd.f32 %v2084_v14, %v1915_v8 }
 0x433   : > { %v1917_v19 = vpop.f32.mrf.mxu1 }
 0x434   : > { %v2494_v17 = vadd.f32 %v2420_v16, %v986_v13 }
 0x436   : > { %2558 = vst [vmem:[%s4691_s2 + $0x1c8] sm:$0xff] %v2494_v17 }
 0x437   : > { %v2253_v20 = vpop.f32.mrf.mxu3 }
 0x438   : > { %v2254_v21 = vadd.f32 %v2253_v20, %v2085_v18 }
 0x439   : > { %v2086_v23 = vpop.f32.mrf.mxu2  ;;  %v2424_v24 = vpop.f32.mrf.mxu0 }
 0x43a   : > { %v2423_v27 = vadd.f32 %v2422_v15, %v2254_v21  ;;  %v2087_v29 = vadd.f32 %v2086_v23, %v1917_v19 }
 0x43b   : > { %v1920_v31 = vpop.f32.mrf.mxu1 }
 0x43c   : > { %v2495_v28 = vadd.f32 %v2423_v27, %v987_v22 }
 0x43e   : > { %2559 = vst [vmem:[%s4691_s2 + $0x1d0] sm:$0xff] %v2495_v28 }
 0x43f   : > { %v2255_v30 = vpop.f32.mrf.mxu3 }
 0x440   : > { %v2256_v32 = vadd.f32 %v2255_v30, %v2087_v29 }
 0x441   : > { %v2089_v36 = vpop.f32.mrf.mxu2  ;;  %v2427_v38 = vpop.f32.mrf.mxu0 }
 0x442   : > { %v2425_v37 = vadd.f32 %v2424_v24, %v2256_v32  ;;  %v2090_v40 = vadd.f32 %v2089_v36, %v1920_v31 }
 0x443   : > { %v1922_v26 = vpop.f32.mrf.mxu1 }
 0x444   : > { %v2496_v39 = vadd.f32 %v2425_v37, %v988_v35 }
 0x446   : > { %2560 = vst [vmem:[%s4691_s2 + $0x1d8] sm:$0xff] %v2496_v39 }
 0x447   : > { %v2258_v33 = vpop.f32.mrf.mxu3 }
 0x448   : > { %v2259_v34 = vadd.f32 %v2258_v33, %v2090_v40 }
 0x449   : > { %v2091_v44 = vpop.f32.mrf.mxu2  ;;  %v2429_v46 = vpop.f32.mrf.mxu0 }
 0x44a   : > { %v2428_v43 = vadd.f32 %v2427_v38, %v2259_v34  ;;  %v2092_v42 = vadd.f32 %v2091_v44, %v1922_v26 }
 0x44b   : > { %v1925_v57 = vpop.f32.mrf.mxu1 }
 0x44c   : > { %v2497_v47 = vadd.f32 %v2428_v43, %v989_v25 }
 0x44e   : > { %2561 = vst [vmem:[%s4691_s2 + $0x1e0] sm:$0xff] %v2497_v47 }
 0x44f   : > { %v2260_v48 = vpop.f32.mrf.mxu3 }
 0x450   : > { %v2261_v51 = vadd.f32 %v2260_v48, %v2092_v42 }
 0x451   : > { %v2094_v55 = vpop.f32.mrf.mxu2  ;;  %v2432_v1 = vpop.f32.mrf.mxu0 }
 0x452   : > { %v2430_v56 = vadd.f32 %v2429_v46, %v2261_v51  ;;  %v2095_v61 = vadd.f32 %v2094_v55, %v1925_v57 }
 0x453   : > { %v1927_v59 = vpop.f32.mrf.mxu1 }
 0x454   : > { %v2498_v58 = vadd.f32 %v2430_v56, %v990_v52 }
 0x456   : > { %2562 = vst [vmem:[%s4691_s2 + $0x1e8] sm:$0xff] %v2498_v58 }
 0x457   : > { %v2263_v62 = vpop.f32.mrf.mxu3 }
 0x458   : > { %v2264_v49 = vadd.f32 %v2263_v62, %v2095_v61 }
 0x459   : > { %v2096_v54 = vpop.f32.mrf.mxu2  ;;  %v2434_v4 = vpop.f32.mrf.mxu0 }
 0x45a   : > { %v2433_v53 = vadd.f32 %v2432_v1, %v2264_v49  ;;  %v2097_v63 = vadd.f32 %v2096_v54, %v1927_v59 }
 0x45c   : > { %v2499_v2 = vadd.f32 %v2433_v53, %v991_v50 }
 0x45e   : > { %2563 = vst [vmem:[%s4691_s2 + $0x1f0] sm:$0xff] %v2499_v2 }
 0x45f   : > { %v2265_v3 = vpop.f32.mrf.mxu3 }
 0x460   : > { %v2266_v60 = vadd.f32 %v2265_v3, %v2097_v63 }
 0x462   : > { %v2435_v5 = vadd.f32 %v2434_v4, %v2266_v60  ;;  %2568 = sbr.rel (%p3797_p1) target bundleno = 1200 (0x4b0), region = 64 }
 0x464   : > { %v2500_v6 = vadd.f32 %v2435_v5, %v992_v0 }
 0x466   : > { %2564 = vst [vmem:[%s4691_s2 + $0x1f8] sm:$0xff] %v2500_v6 }
 0x467   : > { %v2569_v7 = vld [vmem:[%s4691_s2] sm:$0xff]  ;;  %v5342_v41 = vld [vmem:[#allocation9] ss:$0 sm:$0xff]  ;;  %v2570_v45 = vld [vmem:[%s4691_s2 + $0x8] sm:$0xff]  ;;  %v5364_v29 = vstv %s2701_s3 }
 0x468   : > { %v2571_v8 = vld [vmem:[%s4691_s2 + $0x10] sm:$0xff]  ;;  %v2572_v9 = vld [vmem:[%s4691_s2 + $0x18] sm:$0xff]  ;;  %v2637_v10 = vadd.f32 %v5342_v41, %v2569_v7  ;;  %v2638_v11 = vadd.f32 %v5342_v41, %v2570_v45  ;;  %v2573_v14 = vld [vmem:[%s4691_s2 + $0x20] sm:$0xff] }
 0x469   : > { %v2639_v12 = vadd.f32 %v5342_v41, %v2571_v8  ;;  %v2640_v13 = vadd.f32 %v5342_v41, %v2572_v9  ;;  %v2574_v15 = vld [vmem:[%s4691_s2 + $0x28] sm:$0xff]  ;;  %v2575_v16 = vld [vmem:[%s4691_s2 + $0x30] sm:$0xff]  ;;  %v2641_v17 = vadd.f32 %v5342_v41, %v2573_v14  ;;  %v2576_v20 = vld [vmem:[%s4691_s2 + $0x38] sm:$0xff] }
 0x46a   : > { %v2642_v18 = vadd.f32 %v5342_v41, %v2574_v15  ;;  %v2643_v19 = vadd.f32 %v5342_v41, %v2575_v16  ;;  %v2577_v21 = vld [vmem:[%s4691_s2 + $0x40] sm:$0xff]  ;;  %vm2702_vm0 = vcmp.gt.f32.partialorder %v2637_v10, 0.0  ;;  %v2578_v22 = vld [vmem:[%s4691_s2 + $0x48] sm:$0xff]  ;;  %v2579_v23 = vld [vmem:[%s4691_s2 + $0x50] sm:$0xff]  ;;  %vm2703_vm1 = vcmp.gt.f32.partialorder %v2638_v11, 0.0 }
 0x46b   : > { %v2580_v24 = vld [vmem:[%s4691_s2 + $0x58] sm:$0xff]  ;;  %vm2704_vm2 = vcmp.gt.f32.partialorder %v2639_v12, 0.0  ;;  %vm2705_vm3 = vcmp.gt.f32.partialorder %v2640_v13, 0.0  ;;  %v2644_v27 = vadd.f32 %v5342_v41, %v2576_v20  ;;  %vm2706_vm4 = vcmp.gt.f32.partialorder %v2641_v17, 0.0  ;;  %v2581_v39 = vld [vmem:[%s4691_s2 + $0x60] sm:$0xff]  ;;  %v2582_v40 = vld [vmem:[%s4691_s2 + $0x68] sm:$0xff] }
 0x46c   : > { %vm2707_vm5 = vcmp.gt.f32.partialorder %v2642_v18, 0.0  ;;  %vm2708_vm6 = vcmp.gt.f32.partialorder %v2643_v19, 0.0  ;;  %v2645_v28 = vadd.f32 %v5342_v41, %v2577_v21  ;;  %v2646_v30 = vadd.f32 %v5342_v41, %v2578_v22  ;;  %v2583_v61 = vld [vmem:[%s4691_s2 + $0x70] sm:$0xff]  ;;  %v2584_v62 = vld [vmem:[%s4691_s2 + $0x78] sm:$0xff]  ;;  %v2585_v1 = vld [vmem:[%s4691_s2 + $0x80] sm:$0xff] }
 0x46d   : > { %v2647_v31 = vadd.f32 %v5342_v41, %v2579_v23  ;;  %v2648_v32 = vadd.f32 %v5342_v41, %v2580_v24  ;;  %v2767_v35 = vmul.f32 %v5364_v29, %v2637_v10  ;;  %v2768_v36 = vmul.f32 %v5364_v29, %v2638_v11  ;;  %v2586_v53 = vld [vmem:[%s4691_s2 + $0x88] sm:$0xff]  ;;  %v2587_v54 = vld [vmem:[%s4691_s2 + $0x90] sm:$0xff]  ;;  %v2588_v2 = vld [vmem:[%s4691_s2 + $0x98] sm:$0xff] }
 0x46e   : > { %v2769_v37 = vmul.f32 %v5364_v29, %v2639_v12  ;;  %v2770_v38 = vmul.f32 %v5364_v29, %v2640_v13  ;;  %v2771_v33 = vmul.f32 %v5364_v29, %v2641_v17  ;;  %v2772_v34 = vmul.f32 %v5364_v29, %v2642_v18  ;;  %v2589_v14 = vld [vmem:[%s4691_s2 + $0xa0] sm:$0xff]  ;;  %v2590_v15 = vld [vmem:[%s4691_s2 + $0xa8] sm:$0xff]  ;;  %v2591_v16 = vld [vmem:[%s4691_s2 + $0xb0] sm:$0xff] }
 0x46f   : > { %v2773_v25 = vmul.f32 %v5364_v29, %v2643_v19  ;;  %v2774_v26 = vmul.f32 %v5364_v29, %v2644_v27  ;;  %v2831_v44 = vsel %vm2702_vm0, %v2637_v10, %v2767_v35  ;;  %v2832_v43 = vsel %vm2703_vm1, %v2638_v11, %v2768_v36  ;;  %v2593_v20 = vld [vmem:[%s4691_s2 + $0xc0] sm:$0xff]  ;;  %v2594_v21 = vld [vmem:[%s4691_s2 + $0xc8] sm:$0xff] }
 0x470   : > { %v2833_v47 = vsel %vm2704_vm2, %v2639_v12, %v2769_v37  ;;  %vm2709_vm7 = vcmp.gt.f32.partialorder %v2644_v27, 0.0  ;;  %2895 = vst [vmem:[%s4691_s2] sm:$0xff] %v2831_v44  ;;  %v2834_v46 = vsel %vm2705_vm3, %v2640_v13, %v2770_v38  ;;  %v2649_v42 = vadd.f32 %v5342_v41, %v2581_v39  ;;  %v2597_v44 = vld [vmem:[%s4691_s2 + $0xe0] sm:$0xff] }
 0x471   : > { %v2650_v48 = vadd.f32 %v5342_v41, %v2582_v40  ;;  %2896 = vst [vmem:[%s4691_s2 + $0x8] sm:$0xff] %v2832_v43  ;;  %v2835_v51 = vsel %vm2706_vm4, %v2641_v17, %v2771_v33  ;;  %v2836_v52 = vsel %vm2707_vm5, %v2642_v18, %v2772_v34  ;;  %vm2710_vm8 = vcmp.gt.f32.partialorder %v2645_v28, 0.0 }
 0x472   : > { %v2775_v55 = vmul.f32 %v5364_v29, %v2645_v28  ;;  %2897 = vst [vmem:[%s4691_s2 + $0x10] sm:$0xff] %v2833_v47  ;;  %v2837_v56 = vsel %vm2708_vm6, %v2643_v19, %v2773_v25  ;;  %v2838_v57 = vsel %vm2709_vm7, %v2644_v27, %v2774_v26  ;;  %vm2711_vm9 = vcmp.gt.f32.partialorder %v2646_v30, 0.0  ;;  %v2592_v19 = vld [vmem:[%s4691_s2 + $0xb8] sm:$0xff]  ;;  %v2595_v25 = vld [vmem:[%s4691_s2 + $0xd0] sm:$0xff] }
 0x473   : > { %v2776_v58 = vmul.f32 %v5364_v29, %v2646_v30  ;;  %2898 = vst [vmem:[%s4691_s2 + $0x18] sm:$0xff] %v2834_v46  ;;  %vm2712_vm10 = vcmp.gt.f32.partialorder %v2647_v31, 0.0  ;;  %v2777_v49 = vmul.f32 %v5364_v29, %v2647_v31  ;;  %vm2713_vm11 = vcmp.gt.f32.partialorder %v2648_v32, 0.0  ;;  %v2596_v26 = vld [vmem:[%s4691_s2 + $0xd8] sm:$0xff]  ;;  %v2598_v46 = vld [vmem:[%s4691_s2 + $0xe8] sm:$0xff] }
 0x474   : > { %v2778_v50 = vmul.f32 %v5364_v29, %v2648_v32  ;;  %2899 = vst [vmem:[%s4691_s2 + $0x20] sm:$0xff] %v2835_v51  ;;  %v2839_v59 = vsel %vm2710_vm8, %v2645_v28, %v2775_v55  ;;  %vm2714_vm12 = vcmp.gt.f32.partialorder %v2649_v42, 0.0  ;;  %v2779_v63 = vmul.f32 %v5364_v29, %v2649_v42 }
 0x475   : > { %v2780_v3 = vmul.f32 %v5364_v29, %v2650_v48  ;;  %2900 = vst [vmem:[%s4691_s2 + $0x28] sm:$0xff] %v2836_v52  ;;  %vm2715_vm13 = vcmp.gt.f32.partialorder %v2650_v48, 0.0  ;;  %v2651_v60 = vadd.f32 %v5342_v41, %v2583_v61  ;;  %v2652_v0 = vadd.f32 %v5342_v41, %v2584_v62 }
 0x476   : > { %v2653_v4 = vadd.f32 %v5342_v41, %v2585_v1  ;;  %2901 = vst [vmem:[%s4691_s2 + $0x30] sm:$0xff] %v2837_v56  ;;  %v2840_v5 = vsel %vm2711_vm9, %v2646_v30, %v2776_v58  ;;  %v2654_v6 = vadd.f32 %v5342_v41, %v2586_v53  ;;  %v2655_v7 = vadd.f32 %v5342_v41, %v2587_v54 }
 0x477   : > { %v2656_v45 = vadd.f32 %v5342_v41, %v2588_v2  ;;  %2902 = vst [vmem:[%s4691_s2 + $0x38] sm:$0xff] %v2838_v57  ;;  %v2841_v8 = vsel %vm2712_vm10, %v2647_v31, %v2777_v49  ;;  %v2842_v9 = vsel %vm2713_vm11, %v2648_v32, %v2778_v50  ;;  %vm2716_vm14 = vcmp.gt.f32.partialorder %v2651_v60, 0.0 }
 0x478   : > { %v2781_v10 = vmul.f32 %v5364_v29, %v2651_v60  ;;  %2903 = vst [vmem:[%s4691_s2 + $0x40] sm:$0xff] %v2839_v59  ;;  %v2843_v11 = vsel %vm2714_vm12, %v2649_v42, %v2779_v63  ;;  %v2844_v12 = vsel %vm2715_vm13, %v2650_v48, %v2780_v3  ;;  %vm2717_vm15 = vcmp.gt.f32.partialorder %v2652_v0, 0.0  ;;  %v2599_v42 = vld [vmem:[%s4691_s2 + $0xf0] sm:$0xff]  ;;  %v2600_v48 = vld [vmem:[%s4691_s2 + $0xf8] sm:$0xff]  ;;  %v2601_v3 = vld [vmem:[%s4691_s2 + $0x100] sm:$0xff] }
 0x479   : > { %v2782_v13 = vmul.f32 %v5364_v29, %v2652_v0  ;;  %2904 = vst [vmem:[%s4691_s2 + $0x48] sm:$0xff] %v2840_v5  ;;  %vm2718_vm0 = vcmp.gt.f32.partialorder %v2653_v4, 0.0  ;;  %v2783_v17 = vmul.f32 %v5364_v29, %v2653_v4  ;;  %vm2719_vm1 = vcmp.gt.f32.partialorder %v2654_v6, 0.0 }
 0x47a   : > { %v2784_v18 = vmul.f32 %v5364_v29, %v2654_v6  ;;  %2905 = vst [vmem:[%s4691_s2 + $0x50] sm:$0xff] %v2841_v8  ;;  %v2845_v22 = vsel %vm2716_vm14, %v2651_v60, %v2781_v10  ;;  %vm2720_vm2 = vcmp.gt.f32.partialorder %v2655_v7, 0.0  ;;  %v2785_v23 = vmul.f32 %v5364_v29, %v2655_v7  ;;  %v2602_v60 = vld [vmem:[%s4691_s2 + $0x108] sm:$0xff] }
 0x47b   : > { %v2786_v24 = vmul.f32 %v5364_v29, %v2656_v45  ;;  %2906 = vst [vmem:[%s4691_s2 + $0x58] sm:$0xff] %v2842_v9  ;;  %vm2721_vm3 = vcmp.gt.f32.partialorder %v2656_v45, 0.0  ;;  %v2657_v27 = vadd.f32 %v5342_v41, %v2589_v14  ;;  %v2658_v28 = vadd.f32 %v5342_v41, %v2590_v15 }
 0x47c   : > { %v2659_v30 = vadd.f32 %v5342_v41, %v2591_v16  ;;  %2907 = vst [vmem:[%s4691_s2 + $0x60] sm:$0xff] %v2843_v11  ;;  %v2846_v31 = vsel %vm2717_vm15, %v2652_v0, %v2782_v13  ;;  %v2660_v32 = vadd.f32 %v5342_v41, %v2592_v19  ;;  %v2661_v35 = vadd.f32 %v5342_v41, %v2593_v20  ;;  %v2603_v0 = vld [vmem:[%s4691_s2 + $0x110] sm:$0xff] }
 0x47d   : > { %v2662_v36 = vadd.f32 %v5342_v41, %v2594_v21  ;;  %2908 = vst [vmem:[%s4691_s2 + $0x68] sm:$0xff] %v2844_v12  ;;  %v2847_v37 = vsel %vm2718_vm0, %v2653_v4, %v2783_v17  ;;  %v2848_v38 = vsel %vm2719_vm1, %v2654_v6, %v2784_v18  ;;  %vm2722_vm4 = vcmp.gt.f32.partialorder %v2657_v27, 0.0  ;;  %v2604_v6 = vld [vmem:[%s4691_s2 + $0x118] sm:$0xff] }
 0x47e   : > { %v2787_v39 = vmul.f32 %v5364_v29, %v2657_v27  ;;  %2909 = vst [vmem:[%s4691_s2 + $0x70] sm:$0xff] %v2845_v22  ;;  %v2849_v40 = vsel %vm2720_vm2, %v2655_v7, %v2785_v23  ;;  %v2850_v33 = vsel %vm2721_vm3, %v2656_v45, %v2786_v24  ;;  %vm2723_vm5 = vcmp.gt.f32.partialorder %v2658_v28, 0.0  ;;  %v2605_v7 = vld [vmem:[%s4691_s2 + $0x120] sm:$0xff]  ;;  %v2606_v45 = vld [vmem:[%s4691_s2 + $0x128] sm:$0xff]  ;;  %v2607_v24 = vld [vmem:[%s4691_s2 + $0x130] sm:$0xff] }
 0x47f   : > { %v2788_v34 = vmul.f32 %v5364_v29, %v2658_v28  ;;  %2910 = vst [vmem:[%s4691_s2 + $0x78] sm:$0xff] %v2846_v31  ;;  %vm2724_vm6 = vcmp.gt.f32.partialorder %v2659_v30, 0.0  ;;  %v2789_v43 = vmul.f32 %v5364_v29, %v2659_v30  ;;  %vm2725_vm7 = vcmp.gt.f32.partialorder %v2660_v32, 0.0 }
 0x480   : > { %v2790_v47 = vmul.f32 %v5364_v29, %v2660_v32  ;;  %2911 = vst [vmem:[%s4691_s2 + $0x80] sm:$0xff] %v2847_v37  ;;  %v2851_v51 = vsel %vm2722_vm4, %v2657_v27, %v2787_v39  ;;  %vm2726_vm8 = vcmp.gt.f32.partialorder %v2661_v35, 0.0  ;;  %v2791_v52 = vmul.f32 %v5364_v29, %v2661_v35  ;;  %v2608_v27 = vld [vmem:[%s4691_s2 + $0x138] sm:$0xff] }
 0x481   : > { %v2792_v55 = vmul.f32 %v5364_v29, %v2662_v36  ;;  %2912 = vst [vmem:[%s4691_s2 + $0x88] sm:$0xff] %v2848_v38  ;;  %vm2727_vm9 = vcmp.gt.f32.partialorder %v2662_v36, 0.0  ;;  %v2663_v56 = vadd.f32 %v5342_v41, %v2595_v25  ;;  %v2664_v57 = vadd.f32 %v5342_v41, %v2596_v26  ;;  %v2612_v39 = vld [vmem:[%s4691_s2 + $0x158] sm:$0xff] }
 0x482   : > { %v2665_v58 = vadd.f32 %v5342_v41, %v2597_v44  ;;  %2913 = vst [vmem:[%s4691_s2 + $0x90] sm:$0xff] %v2849_v40  ;;  %v2852_v61 = vsel %vm2723_vm5, %v2658_v28, %v2788_v34  ;;  %v2666_v62 = vadd.f32 %v5342_v41, %v2598_v46  ;;  %v2667_v1 = vadd.f32 %v5342_v41, %v2599_v42  ;;  %v2609_v28 = vld [vmem:[%s4691_s2 + $0x140] sm:$0xff] }
 0x483   : > { %v2668_v49 = vadd.f32 %v5342_v41, %v2600_v48  ;;  %2914 = vst [vmem:[%s4691_s2 + $0x98] sm:$0xff] %v2850_v33  ;;  %v2853_v50 = vsel %vm2724_vm6, %v2659_v30, %v2789_v43  ;;  %v2854_v53 = vsel %vm2725_vm7, %v2660_v32, %v2790_v47  ;;  %vm2728_vm10 = vcmp.gt.f32.partialorder %v2663_v56, 0.0  ;;  %v2610_v32 = vld [vmem:[%s4691_s2 + $0x148] sm:$0xff] }
 0x484   : > { %v2793_v54 = vmul.f32 %v5364_v29, %v2663_v56  ;;  %2915 = vst [vmem:[%s4691_s2 + $0xa0] sm:$0xff] %v2851_v51  ;;  %v2855_v2 = vsel %vm2726_vm8, %v2661_v35, %v2791_v52  ;;  %v2856_v59 = vsel %vm2727_vm9, %v2662_v36, %v2792_v55  ;;  %vm2729_vm11 = vcmp.gt.f32.partialorder %v2664_v57, 0.0  ;;  %v2611_v35 = vld [vmem:[%s4691_s2 + $0x150] sm:$0xff]  ;;  %v2613_v55 = vld [vmem:[%s4691_s2 + $0x160] sm:$0xff] }
 0x485   : > { %v2794_v63 = vmul.f32 %v5364_v29, %v2664_v57  ;;  %2916 = vst [vmem:[%s4691_s2 + $0xa8] sm:$0xff] %v2852_v61  ;;  %vm2730_vm12 = vcmp.gt.f32.partialorder %v2665_v58, 0.0  ;;  %v2795_v4 = vmul.f32 %v5364_v29, %v2665_v58  ;;  %vm2731_vm13 = vcmp.gt.f32.partialorder %v2666_v62, 0.0  ;;  %v2616_v61 = vld [vmem:[%s4691_s2 + $0x178] sm:$0xff] }
 0x486   : > { %v2796_v5 = vmul.f32 %v5364_v29, %v2666_v62  ;;  %2917 = vst [vmem:[%s4691_s2 + $0xb0] sm:$0xff] %v2853_v50  ;;  %v2857_v8 = vsel %vm2728_vm10, %v2663_v56, %v2793_v54  ;;  %vm2732_vm14 = vcmp.gt.f32.partialorder %v2667_v1, 0.0  ;;  %v2797_v9 = vmul.f32 %v5364_v29, %v2667_v1  ;;  %v2614_v56 = vld [vmem:[%s4691_s2 + $0x168] sm:$0xff] }
 0x487   : > { %v2798_v10 = vmul.f32 %v5364_v29, %v2668_v49  ;;  %2918 = vst [vmem:[%s4691_s2 + $0xb8] sm:$0xff] %v2854_v53  ;;  %vm2733_vm15 = vcmp.gt.f32.partialorder %v2668_v49, 0.0  ;;  %v2669_v11 = vadd.f32 %v5342_v41, %v2601_v3  ;;  %v2670_v12 = vadd.f32 %v5342_v41, %v2602_v60  ;;  %v2618_v53 = vld [vmem:[%s4691_s2 + $0x188] sm:$0xff] }
 0x488   : > { %v2671_v13 = vadd.f32 %v5342_v41, %v2603_v0  ;;  %2919 = vst [vmem:[%s4691_s2 + $0xc0] sm:$0xff] %v2855_v2  ;;  %v2858_v14 = vsel %vm2729_vm11, %v2664_v57, %v2794_v63  ;;  %v2672_v15 = vadd.f32 %v5342_v41, %v2604_v6  ;;  %v2673_v16 = vadd.f32 %v5342_v41, %v2605_v7  ;;  %v2615_v57 = vld [vmem:[%s4691_s2 + $0x170] sm:$0xff] }
 0x489   : > { %v2674_v17 = vadd.f32 %v5342_v41, %v2606_v45  ;;  %2920 = vst [vmem:[%s4691_s2 + $0xc8] sm:$0xff] %v2856_v59  ;;  %v2859_v18 = vsel %vm2730_vm12, %v2665_v58, %v2795_v4  ;;  %v2860_v19 = vsel %vm2731_vm13, %v2666_v62, %v2796_v5  ;;  %vm2734_vm0 = vcmp.gt.f32.partialorder %v2669_v11, 0.0  ;;  %v2617_v62 = vld [vmem:[%s4691_s2 + $0x180] sm:$0xff] }
 0x48a   : > { %v2799_v20 = vmul.f32 %v5364_v29, %v2669_v11  ;;  %2921 = vst [vmem:[%s4691_s2 + $0xd0] sm:$0xff] %v2857_v8  ;;  %v2861_v21 = vsel %vm2732_vm14, %v2667_v1, %v2797_v9  ;;  %v2862_v22 = vsel %vm2733_vm15, %v2668_v49, %v2798_v10  ;;  %vm2735_vm1 = vcmp.gt.f32.partialorder %v2670_v12, 0.0  ;;  %v2619_v9 = vld [vmem:[%s4691_s2 + $0x190] sm:$0xff]  ;;  %v2620_v10 = vld [vmem:[%s4691_s2 + $0x198] sm:$0xff] }
 0x48b   : > { %v2800_v23 = vmul.f32 %v5364_v29, %v2670_v12  ;;  %2922 = vst [vmem:[%s4691_s2 + $0xd8] sm:$0xff] %v2858_v14  ;;  %vm2736_vm2 = vcmp.gt.f32.partialorder %v2671_v13, 0.0  ;;  %v2801_v30 = vmul.f32 %v5364_v29, %v2671_v13  ;;  %vm2737_vm3 = vcmp.gt.f32.partialorder %v2672_v15, 0.0  ;;  %v2622_v14 = vld [vmem:[%s4691_s2 + $0x1a8] sm:$0xff] }
 0x48c   : > { %v2802_v31 = vmul.f32 %v5364_v29, %v2672_v15  ;;  %2923 = vst [vmem:[%s4691_s2 + $0xe0] sm:$0xff] %v2859_v18  ;;  %v2863_v36 = vsel %vm2734_vm0, %v2669_v11, %v2799_v20  ;;  %vm2738_vm4 = vcmp.gt.f32.partialorder %v2673_v16, 0.0  ;;  %v2803_v37 = vmul.f32 %v5364_v29, %v2673_v16  ;;  %v2621_v11 = vld [vmem:[%s4691_s2 + $0x1a0] sm:$0xff]  ;;  %v2623_v18 = vld [vmem:[%s4691_s2 + $0x1b0] sm:$0xff] }
 0x48d   : > { %v2804_v38 = vmul.f32 %v5364_v29, %v2674_v17  ;;  %2924 = vst [vmem:[%s4691_s2 + $0xe8] sm:$0xff] %v2860_v19  ;;  %vm2739_vm5 = vcmp.gt.f32.partialorder %v2674_v17, 0.0  ;;  %v2675_v40 = vadd.f32 %v5342_v41, %v2607_v24  ;;  %v2676_v33 = vadd.f32 %v5342_v41, %v2608_v27 }
 0x48e   : > { %v2677_v34 = vadd.f32 %v5342_v41, %v2609_v28  ;;  %2925 = vst [vmem:[%s4691_s2 + $0xf0] sm:$0xff] %v2861_v21  ;;  %v2864_v25 = vsel %vm2735_vm1, %v2670_v12, %v2800_v23  ;;  %v2678_v26 = vadd.f32 %v5342_v41, %v2610_v32  ;;  %v2679_v44 = vadd.f32 %v5342_v41, %v2611_v35  ;;  %v2624_v23 = vld [vmem:[%s4691_s2 + $0x1b8] sm:$0xff] }
 0x48f   : > { %2926 = vst [vmem:[%s4691_s2 + $0xf8] sm:$0xff] %v2862_v22  ;;  %v2865_v43 = vsel %vm2736_vm2, %v2671_v13, %v2801_v30  ;;  %vm2740_vm6 = vcmp.gt.f32.partialorder %v2675_v40, 0.0  ;;  %v2805_v47 = vmul.f32 %v5364_v29, %v2675_v40  ;;  %v2680_v46 = vadd.f32 %v5342_v41, %v2612_v39  ;;  %v2627_v39 = vld [vmem:[%s4691_s2 + $0x1d0] sm:$0xff] }
 0x490   : > { %2927 = vst [vmem:[%s4691_s2 + $0x100] sm:$0xff] %v2863_v36  ;;  %v2866_v42 = vsel %vm2737_vm3, %v2672_v15, %v2802_v31  ;;  %v2867_v48 = vsel %vm2738_vm4, %v2673_v16, %v2803_v37  ;;  %v2868_v51 = vsel %vm2739_vm5, %v2674_v17, %v2804_v38  ;;  %v2806_v52 = vmul.f32 %v5364_v29, %v2676_v33  ;;  %v2625_v37 = vld [vmem:[%s4691_s2 + $0x1c0] sm:$0xff]  ;;  %v2626_v38 = vld [vmem:[%s4691_s2 + $0x1c8] sm:$0xff] }
 0x491   : > { %2928 = vst [vmem:[%s4691_s2 + $0x108] sm:$0xff] %v2864_v25  ;;  %vm2741_vm7 = vcmp.gt.f32.partialorder %v2676_v33, 0.0  ;;  %vm2742_vm8 = vcmp.gt.f32.partialorder %v2677_v34, 0.0  ;;  %v2807_v58 = vmul.f32 %v5364_v29, %v2677_v34  ;;  %vm2743_vm9 = vcmp.gt.f32.partialorder %v2678_v26, 0.0  ;;  %v2628_v25 = vld [vmem:[%s4691_s2 + $0x1d8] sm:$0xff] }
 0x492   : > { %2929 = vst [vmem:[%s4691_s2 + $0x110] sm:$0xff] %v2865_v43  ;;  %v2869_v1 = vsel %vm2740_vm6, %v2675_v40, %v2805_v47  ;;  %v2808_v49 = vmul.f32 %v5364_v29, %v2678_v26  ;;  %vm2744_vm10 = vcmp.gt.f32.partialorder %v2679_v44, 0.0  ;;  %v2809_v50 = vmul.f32 %v5364_v29, %v2679_v44  ;;  %v2629_v43 = vld [vmem:[%s4691_s2 + $0x1e0] sm:$0xff] }
 0x493   : > { %2930 = vst [vmem:[%s4691_s2 + $0x118] sm:$0xff] %v2866_v42  ;;  %v2810_v54 = vmul.f32 %v5364_v29, %v2680_v46  ;;  %v2681_v2 = vadd.f32 %v5342_v41, %v2613_v55  ;;  %v2682_v59 = vadd.f32 %v5342_v41, %v2614_v56  ;;  %v2683_v63 = vadd.f32 %v5342_v41, %v2615_v57 }
 0x494   : > { %2931 = vst [vmem:[%s4691_s2 + $0x120] sm:$0xff] %v2867_v48  ;;  %v2870_v3 = vsel %vm2741_vm7, %v2676_v33, %v2806_v52  ;;  %vm2745_vm11 = vcmp.gt.f32.partialorder %v2680_v46, 0.0  ;;  %v2684_v60 = vadd.f32 %v5342_v41, %v2616_v61  ;;  %v2685_v0 = vadd.f32 %v5342_v41, %v2617_v62 }
 0x495   : > { %2932 = vst [vmem:[%s4691_s2 + $0x128] sm:$0xff] %v2868_v51  ;;  %v2871_v4 = vsel %vm2742_vm8, %v2677_v34, %v2807_v58  ;;  %vm2746_vm12 = vcmp.gt.f32.partialorder %v2681_v2, 0.0  ;;  %v2811_v5 = vmul.f32 %v5364_v29, %v2681_v2  ;;  %v2686_v6 = vadd.f32 %v5342_v41, %v2618_v53  ;;  %v2630_v51 = vld [vmem:[%s4691_s2 + $0x1e8] sm:$0xff]  ;;  %v2632_v53 = vld [vmem:[%s4691_s2 + $0x1f8] sm:$0xff] }
 0x496   : > { %2933 = vst [vmem:[%s4691_s2 + $0x130] sm:$0xff] %v2869_v1  ;;  %v2872_v7 = vsel %vm2743_vm9, %v2678_v26, %v2808_v49  ;;  %v2873_v45 = vsel %vm2744_vm10, %v2679_v44, %v2809_v50  ;;  %v2812_v8 = vmul.f32 %v5364_v29, %v2682_v59  ;;  %v2874_v12 = vsel %vm2745_vm11, %v2680_v46, %v2810_v54  ;;  %v2631_v50 = vld [vmem:[%s4691_s2 + $0x1f0] sm:$0xff] }
 0x497   : > { %2934 = vst [vmem:[%s4691_s2 + $0x138] sm:$0xff] %v2870_v3  ;;  %vm2747_vm13 = vcmp.gt.f32.partialorder %v2682_v59, 0.0  ;;  %vm2748_vm14 = vcmp.gt.f32.partialorder %v2683_v63, 0.0  ;;  %v2813_v13 = vmul.f32 %v5364_v29, %v2683_v63  ;;  %v2875_v15 = vsel %vm2746_vm12, %v2681_v2, %v2811_v5 }
 0x498   : > { %2935 = vst [vmem:[%s4691_s2 + $0x140] sm:$0xff] %v2871_v4  ;;  %vm2749_vm15 = vcmp.gt.f32.partialorder %v2684_v60, 0.0  ;;  %v2814_v16 = vmul.f32 %v5364_v29, %v2684_v60  ;;  %v2815_v17 = vmul.f32 %v5364_v29, %v2685_v0  ;;  %v2816_v19 = vmul.f32 %v5364_v29, %v2686_v6 }
 0x499   : > { %2936 = vst [vmem:[%s4691_s2 + $0x148] sm:$0xff] %v2872_v7  ;;  %v2687_v20 = vadd.f32 %v5342_v41, %v2619_v9  ;;  %v2688_v21 = vadd.f32 %v5342_v41, %v2620_v10  ;;  %v2689_v22 = vadd.f32 %v5342_v41, %v2621_v11  ;;  %v2876_v24 = vsel %vm2747_vm13, %v2682_v59, %v2812_v8 }
 0x49a   : > { %2937 = vst [vmem:[%s4691_s2 + $0x150] sm:$0xff] %v2873_v45  ;;  %vm2750_vm0 = vcmp.gt.f32.partialorder %v2685_v0, 0.0  ;;  %vm2751_vm1 = vcmp.gt.f32.partialorder %v2686_v6, 0.0  ;;  %v2690_v27 = vadd.f32 %v5342_v41, %v2622_v14  ;;  %v2877_v28 = vsel %vm2748_vm14, %v2683_v63, %v2813_v13 }
 0x49b   : > { %2938 = vst [vmem:[%s4691_s2 + $0x158] sm:$0xff] %v2874_v12  ;;  %vm2752_vm2 = vcmp.gt.f32.partialorder %v2687_v20, 0.0  ;;  %v2817_v30 = vmul.f32 %v5364_v29, %v2687_v20  ;;  %v2691_v31 = vadd.f32 %v5342_v41, %v2623_v18  ;;  %v2878_v32 = vsel %vm2749_vm15, %v2684_v60, %v2814_v16 }
 0x49c   : > { %2939 = vst [vmem:[%s4691_s2 + $0x160] sm:$0xff] %v2875_v15  ;;  %v2818_v35 = vmul.f32 %v5364_v29, %v2688_v21  ;;  %v2692_v36 = vadd.f32 %v5342_v41, %v2624_v23  ;;  %v2879_v40 = vsel %vm2750_vm0, %v2685_v0, %v2815_v17  ;;  %v2880_v33 = vsel %vm2751_vm1, %v2686_v6, %v2816_v19 }
 0x49d   : > { %2940 = vst [vmem:[%s4691_s2 + $0x168] sm:$0xff] %v2876_v24  ;;  %vm2753_vm3 = vcmp.gt.f32.partialorder %v2688_v21, 0.0  ;;  %v2819_v34 = vmul.f32 %v5364_v29, %v2689_v22  ;;  %v2881_v26 = vsel %vm2752_vm2, %v2687_v20, %v2817_v30  ;;  %vm2754_vm4 = vcmp.gt.f32.partialorder %v2689_v22, 0.0 }
 0x49e   : > { %2941 = vst [vmem:[%s4691_s2 + $0x170] sm:$0xff] %v2877_v28  ;;  %vm2755_vm5 = vcmp.gt.f32.partialorder %v2690_v27, 0.0  ;;  %v2820_v44 = vmul.f32 %v5364_v29, %v2690_v27  ;;  %v2821_v47 = vmul.f32 %v5364_v29, %v2691_v31  ;;  %v2693_v46 = vadd.f32 %v5342_v41, %v2625_v37 }
 0x49f   : > { %2942 = vst [vmem:[%s4691_s2 + $0x178] sm:$0xff] %v2878_v32  ;;  %v2694_v42 = vadd.f32 %v5342_v41, %v2626_v38  ;;  %v2695_v48 = vadd.f32 %v5342_v41, %v2627_v39  ;;  %v2882_v52 = vsel %vm2753_vm3, %v2688_v21, %v2818_v35  ;;  %vm2756_vm6 = vcmp.gt.f32.partialorder %v2691_v31, 0.0 }
 0x4a0   : > { %2943 = vst [vmem:[%s4691_s2 + $0x180] sm:$0xff] %v2879_v40  ;;  %v2822_v55 = vmul.f32 %v5364_v29, %v2692_v36  ;;  %v2696_v56 = vadd.f32 %v5342_v41, %v2628_v25  ;;  %v2883_v57 = vsel %vm2754_vm4, %v2689_v22, %v2819_v34  ;;  %vm2757_vm7 = vcmp.gt.f32.partialorder %v2692_v36, 0.0 }
 0x4a1   : > { %2944 = vst [vmem:[%s4691_s2 + $0x188] sm:$0xff] %v2880_v33  ;;  %v2823_v58 = vmul.f32 %v5364_v29, %v2693_v46  ;;  %v2697_v61 = vadd.f32 %v5342_v41, %v2629_v43  ;;  %v2884_v62 = vsel %vm2755_vm5, %v2690_v27, %v2820_v44  ;;  %vm2758_vm8 = vcmp.gt.f32.partialorder %v2693_v46, 0.0 }
 0x4a2   : > { %2945 = vst [vmem:[%s4691_s2 + $0x190] sm:$0xff] %v2881_v26  ;;  %v2824_v1 = vmul.f32 %v5364_v29, %v2694_v42  ;;  %v2698_v49 = vadd.f32 %v5342_v41, %v2630_v51  ;;  %v2885_v54 = vsel %vm2756_vm6, %v2691_v31, %v2821_v47  ;;  %vm2759_vm9 = vcmp.gt.f32.partialorder %v2694_v42, 0.0 }
 0x4a3   : > { %2946 = vst [vmem:[%s4691_s2 + $0x198] sm:$0xff] %v2882_v52  ;;  %v2825_v2 = vmul.f32 %v5364_v29, %v2695_v48  ;;  %v2886_v59 = vsel %vm2757_vm7, %v2692_v36, %v2822_v55  ;;  %vm2760_vm10 = vcmp.gt.f32.partialorder %v2695_v48, 0.0  ;;  %vm2761_vm11 = vcmp.gt.f32.partialorder %v2696_v56, 0.0 }
 0x4a4   : > { %2947 = vst [vmem:[%s4691_s2 + $0x1a0] sm:$0xff] %v2883_v57  ;;  %v2826_v63 = vmul.f32 %v5364_v29, %v2696_v56  ;;  %v2887_v3 = vsel %vm2758_vm8, %v2693_v46, %v2823_v58  ;;  %v2827_v60 = vmul.f32 %v5364_v29, %v2697_v61  ;;  %v2699_v0 = vadd.f32 %v5342_v41, %v2631_v50 }
 0x4a5   : > { %2948 = vst [vmem:[%s4691_s2 + $0x1a8] sm:$0xff] %v2884_v62  ;;  %v2700_v4 = vadd.f32 %v5342_v41, %v2632_v53  ;;  %v2888_v5 = vsel %vm2759_vm9, %v2694_v42, %v2824_v1  ;;  %vm2762_vm12 = vcmp.gt.f32.partialorder %v2697_v61, 0.0  ;;  %v2828_v6 = vmul.f32 %v5364_v29, %v2698_v49 }
 0x4a6   : > { %2949 = vst [vmem:[%s4691_s2 + $0x1b0] sm:$0xff] %v2885_v54  ;;  %v2889_v7 = vsel %vm2760_vm10, %v2695_v48, %v2825_v2  ;;  %vm2763_vm13 = vcmp.gt.f32.partialorder %v2698_v49, 0.0  ;;  %v2829_v45 = vmul.f32 %v5364_v29, %v2699_v0  ;;  %v2890_v8 = vsel %vm2761_vm11, %v2696_v56, %v2826_v63 }
 0x4a7   : > { %2950 = vst [vmem:[%s4691_s2 + $0x1b8] sm:$0xff] %v2886_v59  ;;  %vm2764_vm14 = vcmp.gt.f32.partialorder %v2699_v0, 0.0  ;;  %v2830_v41 = vmul.f32 %v5364_v29, %v2700_v4  ;;  %v2891_v9 = vsel %vm2762_vm12, %v2697_v61, %v2827_v60  ;;  %vm2765_vm15 = vcmp.gt.f32.partialorder %v2700_v4, 0.0 }
 0x4a8   : > { %2951 = vst [vmem:[%s4691_s2 + $0x1c0] sm:$0xff] %v2887_v3  ;;  %v2892_v10 = vsel %vm2763_vm13, %v2698_v49, %v2828_v6  ;;  %v2893_v11 = vsel %vm2764_vm14, %v2699_v0, %v2829_v45 }
 0x4a9   : > { %2952 = vst [vmem:[%s4691_s2 + $0x1c8] sm:$0xff] %v2888_v5  ;;  %v2894_v12 = vsel %vm2765_vm15, %v2700_v4, %v2830_v41 }
 0x4aa   : > { %2953 = vst [vmem:[%s4691_s2 + $0x1d0] sm:$0xff] %v2889_v7 }
 0x4ab   : > { %2954 = vst [vmem:[%s4691_s2 + $0x1d8] sm:$0xff] %v2890_v8 }
 0x4ac   : > { %2955 = vst [vmem:[%s4691_s2 + $0x1e0] sm:$0xff] %v2891_v9 }
 0x4ad   : > { %2956 = vst [vmem:[%s4691_s2 + $0x1e8] sm:$0xff] %v2892_v10 }
 0x4ae   : > { %2957 = vst [vmem:[%s4691_s2 + $0x1f0] sm:$0xff] %v2893_v11 }
 0x4af   : > { %2958 = vst [vmem:[%s4691_s2 + $0x1f8] sm:$0xff] %v2894_v12 }
 0x4b0 PF: > { %s5790_s15 = sld [smem:[#allocation20_spill]]  ;;  %s2972_s17 = sshll.u32 %s4691_s2, 4  ;;  %s2973_s17 = int_to_ptr.vmem [resolvable:$true] %s2972_s17 }
 0x4b1   : > { %s5792_s6 = sld [smem:[#allocation41_spill]]  ;;  %s2960_s16 = scalar_lea.sflag [#allocation5], %s333_s10 }
 0x4b6   : > { %s3973_s9 = sshll.u32 %s5790_s15, 9 }
 0x4b7   : > { %s5793_s13 = smov %s5792_s6  ;;  %s2971_s4 = scalar_lea.hbm %s5792_s6, %s3973_s9 }
 0x4b8   : > { %s2974_s27 = sshll.u32 %s2971_s4, 4  ;;  %s4299_s5 = scalar_lea.hbm %s5793_s13, 1024  ;;  %s2975_s27 = int_to_ptr.hbm [resolvable:$true] %s2974_s27 }
 0x4b9   : > { %s4293_s0 = sshra.s32 %s2975_s27, 4  ;;  %s4294_s0 = int_to_ptr.hbm [resolvable:$true] %s4293_s0 }
 0x4ba   : > { %s4295_s23 = scalar_lea.hbm %s4294_s0, 512  ;;  %p4300_p10 = scmp.lt.s32.totalorder %s4294_s0, %s5793_s13 }
 0x4bb   : > { %p4296_p6 = scmp.ne.s32.totalorder %s4294_s0, %s4295_s23  ;;  %p4301_p0 = scmp.lt.s32.totalorder %s4299_s5, %s4295_s23 }
 0x4bd   : > { %p4297_p13 = pnand %p4296_p6, %p4572_p8  ;;  %p4302_p3 = por %p4301_p0, %p4300_p10 }
 0x4bf   : > { %p4298_p7 = pneg %p4297_p13 }
 0x4c1   : > { %p4303_p5 = pnand %p4302_p3, %p4298_p7 }
 0x4c3   : > { %4306 = shalt.err (!%p4303_p5)
}
 0x4c4   : > { %s4447_s10 = smov 128   ;;  %s4448_s2 = smov 8  }
 0x4c5   : > { %4010 = dma.vmem_to_hbm [thread:$0]  (%p4572_p8), %s2973_s17, 8192, %s2975_s27, %s2960_s16, %s4447_s10, %s4447_s10, %s4448_s2  }
 0x4c6 PF: > { %s5794_s8 = sld [smem:[#allocation17_spill]]  ;;  %p4035_p9 = scmp.ge.s32.totalorder %s4437_s7, 2 }
 0x4c8   : > { %p4027_p11 = pnand %p4035_p9, %p4578_p12 }
 0x4ca   : > { %p4028_p2 = pneg %p4027_p11 }
 0x4cc   : > { %s2989_s15 = sand.u32 1, %s5794_s8  }
 0x4cd   : > { %s2990_s9 = scalar_lea.sflag [#allocation5], %s2989_s15 }
 0x4ce   : > { %4380 = dma.done.wait (%p4028_p2), %s2990_s9, 8192  }
 0x4cf   : > { %4382 = vsyncadd (%p4028_p2), %s2990_s9, 4294959104  ;;  %s26_s7 = sadd.s32 1, %s4437_s7   ;;  %s5797_s19 = sld [smem:[#allocation26_spill]] }
 0x4d0   : > { %p5678_p4 = scmp.ge.s32.totalorder %s26_s7, 6   ;;  %s5798_s29 = sld [smem:[#allocation18_spill]] }
 0x4d1   : > { %s5799_s27 = sld [smem:[#allocation27_spill]]  ;;  %s5803_s20 = smov %s4389_s21 }
 0x4d2   : > { %s5800_s6 = sld [smem:[#allocation21_spill]]  ;;  %s5804_s21 = smov %s4393_s22 }
 0x4d3   : > { %s5801_s17 = sld [smem:[#allocation24_spill]]  ;;  %s5806_s23 = smov %s4401_s24 }
 0x4d4   : > { %s5802_s16 = sld [smem:[#allocation25_spill]]  ;;  %s5807_s24 = smov %s4405_s25 }
 0x4d5   : > { %s5805_s22 = smov %s5797_s19  ;;  %s5808_s25 = smov %s4649_s28 }
 0x4d6   : > { %s5809_s4 = smov %s4413_s26  ;;  %s5810_s26 = smov %s5798_s29 }
 0x4d7   : > { %s5811_s28 = smov %s4429_s30  ;;  %25 = sbr.rel (!%p5678_p4) target bundleno = 19 (0x13), region = 114 }
 0x4d8   : > { %s5812_s29 = smov %s5800_s6 }
 0x4d9   : > { %s5813_s30 = smov %s5801_s17 }
 0x4da   : > { %s5814_s6 = smov %s5802_s16 }
 0x4dc   :  { %2996 = vsyncpa [#allocation4], 1 }
 0x4dd   :  { %2998 = vsyncpa [#allocation4 + $0x1], 1 }
 0x4de   :  { %2999 = vsyncpa [#allocation7], 1 }
 0x4df   :  { %3001 = vsyncpa [#allocation7 + $0x1], 1 }
 0x4e0   :  { %3002 = vsyncpa [#allocation10], 1 }
 0x4e1   :  { %3003 = vsyncpa [#allocation5], 1 }
 0x4e2   :  { %3005 = vsyncpa [#allocation5 + $0x1], 1 }

</bundles_post_ra>
